<compile_context>
chip_gen: v6e
topology: v6e:2x2x1
jax: 0.10.0
libtpu: 0.0.40
codegen_flags: <defaults>
</compile_context>

<pallas_src>
import jax
import jax.numpy as jnp
from jax import lax
from jax.experimental import pallas as pl
from jax.experimental.pallas import tpu as pltpu


# ----------------------------------------------------------------------------- kernel

def _lstm_kernel(g0_ref,        # (Tc, B, 4Hp)  precomputed x@W_ih0 + b0 for this chunk
                 w_hh0_ref,     # (Hp, 4Hp)     layer-0 recurrent weight
                 w_cat1_ref,    # (2Hp, 4Hp)    layer-1 fused [W_ih1; W_hh1]
                 b1_ref,        # (1, 4Hp)      layer-1 combined bias
                 w_fc_ref,      # (1, Hp)       fc weight (row)
                 b_fc_ref,      # (1, 1)        fc bias
                 out_ref,       # (B, 1)
                 h0_ref, c0_ref, h1_ref, c1_ref):   # VMEM scratch (B, Hp), carried across grid
    Tc = g0_ref.shape[0]
    B = g0_ref.shape[1]
    Hp = w_hh0_ref.shape[0]

    @pl.when(pl.program_id(0) == 0)
    def _init():
        z = jnp.zeros((B, Hp), jnp.float32)
        h0_ref[...] = z
        c0_ref[...] = z
        h1_ref[...] = z
        c1_ref[...] = z

    w_hh0 = w_hh0_ref[...]
    w_cat1 = w_cat1_ref[...]
    # Hoist bias broadcast out of the step loop (broadcast_in_dim is not CSE'd).
    b1 = jnp.broadcast_to(b1_ref[...], (B, 4 * Hp))

    def gates_to_hc(gates, c):
        # PyTorch gate order: i, f, g, o — each slice is a full 128-lane-aligned block.
        i = jax.nn.sigmoid(gates[:, 0:Hp])
        f = jax.nn.sigmoid(gates[:, Hp:2 * Hp])
        g = jnp.tanh(gates[:, 2 * Hp:3 * Hp])
        o = jax.nn.sigmoid(gates[:, 3 * Hp:4 * Hp])
        c_new = f * c + i * g
        h_new = o * jnp.tanh(c_new)
        return h_new, c_new

    def step(t, carry):
        h0, c0, h1, c1 = carry
        # Layer 0: input projection precomputed; only the recurrent matmul on the chain.
        gates0 = g0_ref[t] + jnp.dot(h0, w_hh0, preferred_element_type=jnp.float32)
        h0, c0 = gates_to_hc(gates0, c0)
        # Layer 1: single fused matmul over the concatenated [h0_t, h1_{t-1}].
        gates1 = jnp.dot(jnp.concatenate([h0, h1], axis=1), w_cat1,
                         preferred_element_type=jnp.float32) + b1
        h1, c1 = gates_to_hc(gates1, c1)
        return (h0, c0, h1, c1)

    carry = (h0_ref[...], c0_ref[...], h1_ref[...], c1_ref[...])
    h0, c0, h1, c1 = lax.fori_loop(0, Tc, step, carry, unroll=True)
    h0_ref[...] = h0
    c0_ref[...] = c0
    h1_ref[...] = h1
    c1_ref[...] = c1

    @pl.when(pl.program_id(0) == pl.num_programs(0) - 1)
    def _finalize():
        # fc(H,1) as VPU multiply + lane reduction (skip a 1-column MXU matmul).
        out_ref[...] = (jnp.sum(h1 * w_fc_ref[...], axis=-1, keepdims=True)
                        + b_fc_ref[...])


# ----------------------------------------------------------------------------- params

def init_params(key, input_size, hidden_size):
    """Deterministic init with PyTorch nn.LSTM / nn.Linear shapes & U(-1/sqrt(H), 1/sqrt(H))."""
    H = hidden_size
    k = 1.0 / jnp.sqrt(jnp.float32(H))
    keys = jax.random.split(key, 12)

    def u(kk, shape):
        return jax.random.uniform(kk, shape, jnp.float32, -k, k)

    return dict(
        w_ih_l0=u(keys[0], (4 * H, input_size)),
        w_hh_l0=u(keys[1], (4 * H, H)),
        b_ih_l0=u(keys[2], (4 * H,)),
        b_hh_l0=u(keys[3], (4 * H,)),
        w_ih_l1=u(keys[4], (4 * H, H)),
        w_hh_l1=u(keys[5], (4 * H, H)),
        b_ih_l1=u(keys[6], (4 * H,)),
        b_hh_l1=u(keys[7], (4 * H,)),
        w_fc=u(keys[8], (1, H)),
        b_fc=u(keys[9], (1,)),
    )


def _pad_gate_cols(w, H, Hp):
    """(rows, 4H) with gate blocks [i|f|g|o] of width H -> (rows, 4Hp), zero-padded per gate."""
    rows = w.shape[0]
    w4 = w.reshape(rows, 4, H)
    return jnp.pad(w4, ((0, 0), (0, 0), (0, Hp - H))).reshape(rows, 4 * Hp)


def pack_params(p, Hp):
    """Pre-transpose / pad / fuse PyTorch-layout params into the kernel layout."""
    H = p["w_hh_l0"].shape[1]
    w_ih0 = _pad_gate_cols(p["w_ih_l0"].T, H, Hp)                                   # (F, 4Hp)
    b0 = _pad_gate_cols((p["b_ih_l0"] + p["b_hh_l0"])[None, :], H, Hp)              # (1, 4Hp)
    w_hh0 = jnp.pad(_pad_gate_cols(p["w_hh_l0"].T, H, Hp), ((0, Hp - H), (0, 0)))   # (Hp, 4Hp)
    w_ih1 = jnp.pad(_pad_gate_cols(p["w_ih_l1"].T, H, Hp), ((0, Hp - H), (0, 0)))   # (Hp, 4Hp)
    w_hh1 = jnp.pad(_pad_gate_cols(p["w_hh_l1"].T, H, Hp), ((0, Hp - H), (0, 0)))   # (Hp, 4Hp)
    w_cat1 = jnp.concatenate([w_ih1, w_hh1], axis=0)                                # (2Hp, 4Hp)
    b1 = _pad_gate_cols((p["b_ih_l1"] + p["b_hh_l1"])[None, :], H, Hp)              # (1, 4Hp)
    w_fc_row = jnp.pad(p["w_fc"], ((0, 0), (0, Hp - H)))                            # (1, Hp)
    b_fc = p["b_fc"].reshape(1, 1)                                                  # (1, 1)
    return dict(w_ih0=w_ih0, b0=b0, w_hh0=w_hh0, w_cat1=w_cat1, b1=b1,
                w_fc_row=w_fc_row, b_fc=b_fc)


# ----------------------------------------------------------------------------- wrapper

def lstm_regressor(x, params):
    """x: (batch, seq, features) float32. Returns out.squeeze() like the PyTorch module."""
    B, T, F = x.shape
    H = params["w_hh_l0"].shape[1]
    Hp = ((H + 127) // 128) * 128          # lane-align the hidden dim (full-vreg gate slices)
    kp = pack_params(params, Hp)

    # Hoisted layer-0 input projection + bias: one big XLA matmul instead of T tiny ones.
    g0 = x.reshape(B * T, F) @ kp["w_ih0"] + kp["b0"]           # (B*T, 4Hp)
    g0 = g0.reshape(B, T, 4 * Hp).transpose(1, 0, 2)            # (T, B, 4Hp)

    # Stream the time axis through the grid in chunks (pipelined DMA, bounded VMEM).
    tc = 4 if T % 4 == 0 else (2 if T % 2 == 0 else 1)
    num_chunks = T // tc

    grid_spec = pltpu.PrefetchScalarGridSpec(
        num_scalar_prefetch=0,
        grid=(num_chunks,),
        in_specs=[
            pl.BlockSpec((tc, B, 4 * Hp), lambda t: (t, 0, 0)),   # g0 chunk (pipelined)
            pl.BlockSpec((Hp, 4 * Hp), lambda t: (0, 0)),         # w_hh0 (resident)
            pl.BlockSpec((2 * Hp, 4 * Hp), lambda t: (0, 0)),     # w_cat1 (resident)
            pl.BlockSpec((1, 4 * Hp), lambda t: (0, 0)),          # b1
            pl.BlockSpec((1, Hp), lambda t: (0, 0)),              # w_fc row
            pl.BlockSpec((1, 1), lambda t: (0, 0)),               # b_fc
        ],
        out_specs=pl.BlockSpec((B, 1), lambda t: (0, 0)),
        scratch_shapes=[pltpu.VMEM((B, Hp), jnp.float32)] * 4,    # h0, c0, h1, c1 carry
    )

    out = pl.pallas_call(
        _lstm_kernel,
        out_shape=jax.ShapeDtypeStruct((B, 1), jnp.float32),
        grid_spec=grid_spec,
        compiler_params=pltpu.CompilerParams(
            dimension_semantics=("arbitrary",)),   # time recurrence is serial
    )(g0, kp["w_hh0"], kp["w_cat1"], kp["b1"], kp["w_fc_row"], kp["b_fc"])

    return jnp.squeeze(out)   # matches torch .squeeze(): (B,) for B > 1


# ----------------------------------------------------------------------------- reference

def reference(x, p):
    """Pure-JAX reference reproducing torch.nn.LSTM (2 layers, batch_first) + Linear."""
    B, T, F = x.shape
    H = p["w_hh_l0"].shape[1]

    def cell(x_t, h, c, w_ih, w_hh, b_ih, b_hh):
        g = x_t @ w_ih.T + h @ w_hh.T + b_ih + b_hh
        i = jax.nn.sigmoid(g[:, :H])
        f = jax.nn.sigmoid(g[:, H:2 * H])
        gg = jnp.tanh(g[:, 2 * H:3 * H])
        o = jax.nn.sigmoid(g[:, 3 * H:])
        c = f * c + i * gg
        h = o * jnp.tanh(c)
        return h, c

    h0 = c0 = h1 = c1 = jnp.zeros((B, H), jnp.float32)
    for t in range(T):
        h0, c0 = cell(x[:, t, :], h0, c0, p["w_ih_l0"], p["w_hh_l0"],
                      p["b_ih_l0"], p["b_hh_l0"])
        h1, c1 = cell(h0, h1, c1, p["w_ih_l1"], p["w_hh_l1"],
                      p["b_ih_l1"], p["b_hh_l1"])
    return jnp.squeeze(h1 @ p["w_fc"].T + p["b_fc"])


# ----------------------------------------------------------------------------- main

if __name__ == "__main__":
    key = jax.random.PRNGKey(0)
    k_x, k_p = jax.random.split(key)

    batch, seq, input_size, hidden = 2, 8, 8, 64
    x = jax.random.normal(k_x, (batch, seq, input_size), jnp.float32)
    params = init_params(k_p, input_size, hidden)

    y = jax.block_until_ready(jax.jit(lstm_regressor)(x, params))
    y_ref = reference(x, params)

    assert y.shape == (batch,), y.shape
    assert jnp.allclose(y, y_ref, atol=1e-4, rtol=1e-4), (y, y_ref)
    print("KERNEL_OK")
</pallas_src>

<mosaic_0001>
module attributes {stable_mosaic.version = 11 : i64} {
  func.func @_lstm_kernel(%arg0: i32, %arg1: memref<4x2x512xf32, #tpu.memory_space<vmem>>, %arg2: memref<128x512xf32, #tpu.memory_space<vmem>>, %arg3: memref<256x512xf32, #tpu.memory_space<vmem>>, %arg4: memref<1x512xf32, #tpu.memory_space<vmem>>, %arg5: memref<1x128xf32, #tpu.memory_space<vmem>>, %arg6: memref<1x1xf32, #tpu.memory_space<vmem>>, %arg7: memref<2x1xf32, #tpu.memory_space<vmem>>, %arg8: memref<2x128xf32, #tpu.memory_space<vmem>>, %arg9: memref<2x128xf32, #tpu.memory_space<vmem>>, %arg10: memref<2x128xf32, #tpu.memory_space<vmem>>, %arg11: memref<2x128xf32, #tpu.memory_space<vmem>>) attributes {dimension_semantics = [#tpu.dimension_semantics<arbitrary>], iteration_bounds = array<i64: 2>, scalar_prefetch = 0 : i64, scratch_operands = 4 : i64, tpu.core_type = #tpu.core_type<tc>, window_params = [{transform_indices = @transform_0, window_bounds = array<i64: 4, 2, 512>}, {pipeline_mode = #tpu.pipeline_mode<synchronous>, transform_indices = @transform_1, window_bounds = array<i64: 128, 512>}, {pipeline_mode = #tpu.pipeline_mode<synchronous>, transform_indices = @transform_2, window_bounds = array<i64: 256, 512>}, {pipeline_mode = #tpu.pipeline_mode<synchronous>, transform_indices = @transform_3, window_bounds = array<i64: 1, 512>}, {pipeline_mode = #tpu.pipeline_mode<synchronous>, transform_indices = @transform_4, window_bounds = array<i64: 1, 128>}, {pipeline_mode = #tpu.pipeline_mode<synchronous>, transform_indices = @transform_5, window_bounds = array<i64: 1, 1>}, {pipeline_mode = #tpu.pipeline_mode<synchronous>, transform_indices = @transform_6, window_bounds = array<i64: 2, 1>}]} {
    %c0_i32 = arith.constant 0 : i32
    %0 = arith.cmpi eq, %arg0, %c0_i32 : i32
    %1 = arith.extui %0 : i1 to i32
    %c0_i32_0 = arith.constant 0 : i32
    %2 = arith.cmpi ne, %1, %c0_i32_0 : i32
    scf.if %2 {
      %cst_64 = arith.constant 0.000000e+00 : f32
      %251 = vector.broadcast %cst_64 : f32 to vector<2x128xf32>
      %c0_65 = arith.constant 0 : index
      %c0_66 = arith.constant 0 : index
      %252 = vector.load %arg8[%c0_65, %c0_66] : memref<2x128xf32, #tpu.memory_space<vmem>>, vector<2x128xf32>
      tpu.vector_store %arg8[%c0_65, %c0_66], %251 {strides = array<i32>} : memref<2x128xf32, #tpu.memory_space<vmem>>, vector<2x128xf32>,
      %c0_67 = arith.constant 0 : index
      %c0_68 = arith.constant 0 : index
      %253 = vector.load %arg9[%c0_67, %c0_68] : memref<2x128xf32, #tpu.memory_space<vmem>>, vector<2x128xf32>
      tpu.vector_store %arg9[%c0_67, %c0_68], %251 {strides = array<i32>} : memref<2x128xf32, #tpu.memory_space<vmem>>, vector<2x128xf32>,
      %c0_69 = arith.constant 0 : index
      %c0_70 = arith.constant 0 : index
      %254 = vector.load %arg10[%c0_69, %c0_70] : memref<2x128xf32, #tpu.memory_space<vmem>>, vector<2x128xf32>
      tpu.vector_store %arg10[%c0_69, %c0_70], %251 {strides = array<i32>} : memref<2x128xf32, #tpu.memory_space<vmem>>, vector<2x128xf32>,
      %c0_71 = arith.constant 0 : index
      %c0_72 = arith.constant 0 : index
      %255 = vector.load %arg11[%c0_71, %c0_72] : memref<2x128xf32, #tpu.memory_space<vmem>>, vector<2x128xf32>
      tpu.vector_store %arg11[%c0_71, %c0_72], %251 {strides = array<i32>} : memref<2x128xf32, #tpu.memory_space<vmem>>, vector<2x128xf32>,
    } else {
    }
    %c0 = arith.constant 0 : index
    %c0_1 = arith.constant 0 : index
    %3 = vector.load %arg2[%c0, %c0_1] : memref<128x512xf32, #tpu.memory_space<vmem>>, vector<128x512xf32>
    %c0_2 = arith.constant 0 : index
    %c0_3 = arith.constant 0 : index
    %4 = vector.load %arg3[%c0_2, %c0_3] : memref<256x512xf32, #tpu.memory_space<vmem>>, vector<256x512xf32>
    %c0_4 = arith.constant 0 : index
    %c0_5 = arith.constant 0 : index
    %5 = vector.load %arg4[%c0_4, %c0_5] : memref<1x512xf32, #tpu.memory_space<vmem>>, vector<1x512xf32>
    %6 = vector.shape_cast %5 : vector<1x512xf32> to vector<1x512xf32>
    %7 = vector.broadcast %6 : vector<1x512xf32> to vector<2x512xf32>
    %c0_6 = arith.constant 0 : index
    %c0_7 = arith.constant 0 : index
    %8 = vector.load %arg8[%c0_6, %c0_7] : memref<2x128xf32, #tpu.memory_space<vmem>>, vector<2x128xf32>
    %c0_8 = arith.constant 0 : index
    %c0_9 = arith.constant 0 : index
    %9 = vector.load %arg9[%c0_8, %c0_9] : memref<2x128xf32, #tpu.memory_space<vmem>>, vector<2x128xf32>
    %c0_10 = arith.constant 0 : index
    %c0_11 = arith.constant 0 : index
    %10 = vector.load %arg10[%c0_10, %c0_11] : memref<2x128xf32, #tpu.memory_space<vmem>>, vector<2x128xf32>
    %c0_12 = arith.constant 0 : index
    %c0_13 = arith.constant 0 : index
    %11 = vector.load %arg11[%c0_12, %c0_13] : memref<2x128xf32, #tpu.memory_space<vmem>>, vector<2x128xf32>
    %c0_i32_14 = arith.constant 0 : i32
    %12 = arith.index_cast %c0_i32_14 : i32 to index
    %c0_15 = arith.constant 0 : index
    %c0_16 = arith.constant 0 : index
    %13 = vector.load %arg1[%12, %c0_15, %c0_16] : memref<4x2x512xf32, #tpu.memory_space<vmem>>, vector<1x2x512xf32>
    %14 = vector.shape_cast %13 : vector<1x2x512xf32> to vector<2x512xf32>
    %cst = arith.constant dense<0.000000e+00> : vector<2x512xf32>
    %15 = tpu.matmul %8, %3, %cst {dimension_numbers = #tpu.dot_dimension_numbers<[1], [0], [0], [1], [0, 0, 1, 1], [], []>} : vector<2x128xf32>, vector<128x512xf32>, vector<2x512xf32> -> vector<2x512xf32>
    %16 = arith.addf %14, %15 : vector<2x512xf32>
    %17 = vector.extract_strided_slice %16 {offsets = [0, 0], sizes = [2, 128], strides = [1, 1]} : vector<2x512xf32> to vector<2x128xf32>
    %18 = arith.negf %17 : vector<2x128xf32>
    %19 = math.exp %18 : vector<2x128xf32>
    %cst_17 = arith.constant 1.000000e+00 : f32
    %20 = vector.broadcast %cst_17 : f32 to vector<2x128xf32>
    %21 = arith.addf %20, %19 : vector<2x128xf32>
    %22 = arith.divf %20, %21 : vector<2x128xf32>
    %23 = vector.extract_strided_slice %16 {offsets = [0, 128], sizes = [2, 128], strides = [1, 1]} : vector<2x512xf32> to vector<2x128xf32>
    %24 = arith.negf %23 : vector<2x128xf32>
    %25 = math.exp %24 : vector<2x128xf32>
    %cst_18 = arith.constant 1.000000e+00 : f32
    %26 = vector.broadcast %cst_18 : f32 to vector<2x128xf32>
    %27 = arith.addf %26, %25 : vector<2x128xf32>
    %28 = arith.divf %26, %27 : vector<2x128xf32>
    %29 = vector.extract_strided_slice %16 {offsets = [0, 256], sizes = [2, 128], strides = [1, 1]} : vector<2x512xf32> to vector<2x128xf32>
    %30 = math.tanh %29 : vector<2x128xf32>
    %31 = vector.extract_strided_slice %16 {offsets = [0, 384], sizes = [2, 128], strides = [1, 1]} : vector<2x512xf32> to vector<2x128xf32>
    %32 = arith.negf %31 : vector<2x128xf32>
    %33 = math.exp %32 : vector<2x128xf32>
    %cst_19 = arith.constant 1.000000e+00 : f32
    %34 = vector.broadcast %cst_19 : f32 to vector<2x128xf32>
    %35 = arith.addf %34, %33 : vector<2x128xf32>
    %36 = arith.divf %34, %35 : vector<2x128xf32>
    %37 = arith.mulf %28, %9 : vector<2x128xf32>
    %38 = arith.mulf %22, %30 : vector<2x128xf32>
    %39 = arith.addf %37, %38 : vector<2x128xf32>
    %40 = math.tanh %39 : vector<2x128xf32>
    %41 = arith.mulf %36, %40 : vector<2x128xf32>
    %42 = tpu.concatenate %41, %10 in 1 : vector<2x128xf32>, vector<2x128xf32> -> vector<2x256xf32>
    %cst_20 = arith.constant dense<0.000000e+00> : vector<2x512xf32>
    %43 = tpu.matmul %42, %4, %cst_20 {dimension_numbers = #tpu.dot_dimension_numbers<[1], [0], [0], [1], [0, 0, 1, 1], [], []>} : vector<2x256xf32>, vector<256x512xf32>, vector<2x512xf32> -> vector<2x512xf32>
    %44 = arith.addf %43, %7 : vector<2x512xf32>
    %45 = vector.extract_strided_slice %44 {offsets = [0, 0], sizes = [2, 128], strides = [1, 1]} : vector<2x512xf32> to vector<2x128xf32>
    %46 = arith.negf %45 : vector<2x128xf32>
    %47 = math.exp %46 : vector<2x128xf32>
    %cst_21 = arith.constant 1.000000e+00 : f32
    %48 = vector.broadcast %cst_21 : f32 to vector<2x128xf32>
    %49 = arith.addf %48, %47 : vector<2x128xf32>
    %50 = arith.divf %48, %49 : vector<2x128xf32>
    %51 = vector.extract_strided_slice %44 {offsets = [0, 128], sizes = [2, 128], strides = [1, 1]} : vector<2x512xf32> to vector<2x128xf32>
    %52 = arith.negf %51 : vector<2x128xf32>
    %53 = math.exp %52 : vector<2x128xf32>
    %cst_22 = arith.constant 1.000000e+00 : f32
    %54 = vector.broadcast %cst_22 : f32 to vector<2x128xf32>
    %55 = arith.addf %54, %53 : vector<2x128xf32>
    %56 = arith.divf %54, %55 : vector<2x128xf32>
    %57 = vector.extract_strided_slice %44 {offsets = [0, 256], sizes = [2, 128], strides = [1, 1]} : vector<2x512xf32> to vector<2x128xf32>
    %58 = math.tanh %57 : vector<2x128xf32>
    %59 = vector.extract_strided_slice %44 {offsets = [0, 384], sizes = [2, 128], strides = [1, 1]} : vector<2x512xf32> to vector<2x128xf32>
    %60 = arith.negf %59 : vector<2x128xf32>
    %61 = math.exp %60 : vector<2x128xf32>
    %cst_23 = arith.constant 1.000000e+00 : f32
    %62 = vector.broadcast %cst_23 : f32 to vector<2x128xf32>
    %63 = arith.addf %62, %61 : vector<2x128xf32>
    %64 = arith.divf %62, %63 : vector<2x128xf32>
    %65 = arith.mulf %56, %11 : vector<2x128xf32>
    %66 = arith.mulf %50, %58 : vector<2x128xf32>
    %67 = arith.addf %65, %66 : vector<2x128xf32>
    %68 = math.tanh %67 : vector<2x128xf32>
    %69 = arith.mulf %64, %68 : vector<2x128xf32>
    %c1_i32 = arith.constant 1 : i32
    %70 = arith.index_cast %c1_i32 : i32 to index
    %c0_24 = arith.constant 0 : index
    %c0_25 = arith.constant 0 : index
    %71 = vector.load %arg1[%70, %c0_24, %c0_25] : memref<4x2x512xf32, #tpu.memory_space<vmem>>, vector<1x2x512xf32>
    %72 = vector.shape_cast %71 : vector<1x2x512xf32> to vector<2x512xf32>
    %cst_26 = arith.constant dense<0.000000e+00> : vector<2x512xf32>
    %73 = tpu.matmul %41, %3, %cst_26 {dimension_numbers = #tpu.dot_dimension_numbers<[1], [0], [0], [1], [0, 0, 1, 1], [], []>} : vector<2x128xf32>, vector<128x512xf32>, vector<2x512xf32> -> vector<2x512xf32>
    %74 = arith.addf %72, %73 : vector<2x512xf32>
    %75 = vector.extract_strided_slice %74 {offsets = [0, 0], sizes = [2, 128], strides = [1, 1]} : vector<2x512xf32> to vector<2x128xf32>
    %76 = arith.negf %75 : vector<2x128xf32>
    %77 = math.exp %76 : vector<2x128xf32>
    %cst_27 = arith.constant 1.000000e+00 : f32
    %78 = vector.broadcast %cst_27 : f32 to vector<2x128xf32>
    %79 = arith.addf %78, %77 : vector<2x128xf32>
    %80 = arith.divf %78, %79 : vector<2x128xf32>
    %81 = vector.extract_strided_slice %74 {offsets = [0, 128], sizes = [2, 128], strides = [1, 1]} : vector<2x512xf32> to vector<2x128xf32>
    %82 = arith.negf %81 : vector<2x128xf32>
    %83 = math.exp %82 : vector<2x128xf32>
    %cst_28 = arith.constant 1.000000e+00 : f32
    %84 = vector.broadcast %cst_28 : f32 to vector<2x128xf32>
    %85 = arith.addf %84, %83 : vector<2x128xf32>
    %86 = arith.divf %84, %85 : vector<2x128xf32>
    %87 = vector.extract_strided_slice %74 {offsets = [0, 256], sizes = [2, 128], strides = [1, 1]} : vector<2x512xf32> to vector<2x128xf32>
    %88 = math.tanh %87 : vector<2x128xf32>
    %89 = vector.extract_strided_slice %74 {offsets = [0, 384], sizes = [2, 128], strides = [1, 1]} : vector<2x512xf32> to vector<2x128xf32>
    %90 = arith.negf %89 : vector<2x128xf32>
    %91 = math.exp %90 : vector<2x128xf32>
    %cst_29 = arith.constant 1.000000e+00 : f32
    %92 = vector.broadcast %cst_29 : f32 to vector<2x128xf32>
    %93 = arith.addf %92, %91 : vector<2x128xf32>
    %94 = arith.divf %92, %93 : vector<2x128xf32>
    %95 = arith.mulf %86, %39 : vector<2x128xf32>
    %96 = arith.mulf %80, %88 : vector<2x128xf32>
    %97 = arith.addf %95, %96 : vector<2x128xf32>
    %98 = math.tanh %97 : vector<2x128xf32>
    %99 = arith.mulf %94, %98 : vector<2x128xf32>
    %100 = tpu.concatenate %99, %69 in 1 : vector<2x128xf32>, vector<2x128xf32> -> vector<2x256xf32>
    %cst_30 = arith.constant dense<0.000000e+00> : vector<2x512xf32>
    %101 = tpu.matmul %100, %4, %cst_30 {dimension_numbers = #tpu.dot_dimension_numbers<[1], [0], [0], [1], [0, 0, 1, 1], [], []>} : vector<2x256xf32>, vector<256x512xf32>, vector<2x512xf32> -> vector<2x512xf32>
    %102 = arith.addf %101, %7 : vector<2x512xf32>
    %103 = vector.extract_strided_slice %102 {offsets = [0, 0], sizes = [2, 128], strides = [1, 1]} : vector<2x512xf32> to vector<2x128xf32>
    %104 = arith.negf %103 : vector<2x128xf32>
    %105 = math.exp %104 : vector<2x128xf32>
    %cst_31 = arith.constant 1.000000e+00 : f32
    %106 = vector.broadcast %cst_31 : f32 to vector<2x128xf32>
    %107 = arith.addf %106, %105 : vector<2x128xf32>
    %108 = arith.divf %106, %107 : vector<2x128xf32>
    %109 = vector.extract_strided_slice %102 {offsets = [0, 128], sizes = [2, 128], strides = [1, 1]} : vector<2x512xf32> to vector<2x128xf32>
    %110 = arith.negf %109 : vector<2x128xf32>
    %111 = math.exp %110 : vector<2x128xf32>
    %cst_32 = arith.constant 1.000000e+00 : f32
    %112 = vector.broadcast %cst_32 : f32 to vector<2x128xf32>
    %113 = arith.addf %112, %111 : vector<2x128xf32>
    %114 = arith.divf %112, %113 : vector<2x128xf32>
    %115 = vector.extract_strided_slice %102 {offsets = [0, 256], sizes = [2, 128], strides = [1, 1]} : vector<2x512xf32> to vector<2x128xf32>
    %116 = math.tanh %115 : vector<2x128xf32>
    %117 = vector.extract_strided_slice %102 {offsets = [0, 384], sizes = [2, 128], strides = [1, 1]} : vector<2x512xf32> to vector<2x128xf32>
    %118 = arith.negf %117 : vector<2x128xf32>
    %119 = math.exp %118 : vector<2x128xf32>
    %cst_33 = arith.constant 1.000000e+00 : f32
    %120 = vector.broadcast %cst_33 : f32 to vector<2x128xf32>
    %121 = arith.addf %120, %119 : vector<2x128xf32>
    %122 = arith.divf %120, %121 : vector<2x128xf32>
    %123 = arith.mulf %114, %67 : vector<2x128xf32>
    %124 = arith.mulf %108, %116 : vector<2x128xf32>
    %125 = arith.addf %123, %124 : vector<2x128xf32>
    %126 = math.tanh %125 : vector<2x128xf32>
    %127 = arith.mulf %122, %126 : vector<2x128xf32>
    %c2_i32 = arith.constant 2 : i32
    %128 = arith.index_cast %c2_i32 : i32 to index
    %c0_34 = arith.constant 0 : index
    %c0_35 = arith.constant 0 : index
    %129 = vector.load %arg1[%128, %c0_34, %c0_35] : memref<4x2x512xf32, #tpu.memory_space<vmem>>, vector<1x2x512xf32>
    %130 = vector.shape_cast %129 : vector<1x2x512xf32> to vector<2x512xf32>
    %cst_36 = arith.constant dense<0.000000e+00> : vector<2x512xf32>
    %131 = tpu.matmul %99, %3, %cst_36 {dimension_numbers = #tpu.dot_dimension_numbers<[1], [0], [0], [1], [0, 0, 1, 1], [], []>} : vector<2x128xf32>, vector<128x512xf32>, vector<2x512xf32> -> vector<2x512xf32>
    %132 = arith.addf %130, %131 : vector<2x512xf32>
    %133 = vector.extract_strided_slice %132 {offsets = [0, 0], sizes = [2, 128], strides = [1, 1]} : vector<2x512xf32> to vector<2x128xf32>
    %134 = arith.negf %133 : vector<2x128xf32>
    %135 = math.exp %134 : vector<2x128xf32>
    %cst_37 = arith.constant 1.000000e+00 : f32
    %136 = vector.broadcast %cst_37 : f32 to vector<2x128xf32>
    %137 = arith.addf %136, %135 : vector<2x128xf32>
    %138 = arith.divf %136, %137 : vector<2x128xf32>
    %139 = vector.extract_strided_slice %132 {offsets = [0, 128], sizes = [2, 128], strides = [1, 1]} : vector<2x512xf32> to vector<2x128xf32>
    %140 = arith.negf %139 : vector<2x128xf32>
    %141 = math.exp %140 : vector<2x128xf32>
    %cst_38 = arith.constant 1.000000e+00 : f32
    %142 = vector.broadcast %cst_38 : f32 to vector<2x128xf32>
    %143 = arith.addf %142, %141 : vector<2x128xf32>
    %144 = arith.divf %142, %143 : vector<2x128xf32>
    %145 = vector.extract_strided_slice %132 {offsets = [0, 256], sizes = [2, 128], strides = [1, 1]} : vector<2x512xf32> to vector<2x128xf32>
    %146 = math.tanh %145 : vector<2x128xf32>
    %147 = vector.extract_strided_slice %132 {offsets = [0, 384], sizes = [2, 128], strides = [1, 1]} : vector<2x512xf32> to vector<2x128xf32>
    %148 = arith.negf %147 : vector<2x128xf32>
    %149 = math.exp %148 : vector<2x128xf32>
    %cst_39 = arith.constant 1.000000e+00 : f32
    %150 = vector.broadcast %cst_39 : f32 to vector<2x128xf32>
    %151 = arith.addf %150, %149 : vector<2x128xf32>
    %152 = arith.divf %150, %151 : vector<2x128xf32>
    %153 = arith.mulf %144, %97 : vector<2x128xf32>
    %154 = arith.mulf %138, %146 : vector<2x128xf32>
    %155 = arith.addf %153, %154 : vector<2x128xf32>
    %156 = math.tanh %155 : vector<2x128xf32>
    %157 = arith.mulf %152, %156 : vector<2x128xf32>
    %158 = tpu.concatenate %157, %127 in 1 : vector<2x128xf32>, vector<2x128xf32> -> vector<2x256xf32>
    %cst_40 = arith.constant dense<0.000000e+00> : vector<2x512xf32>
    %159 = tpu.matmul %158, %4, %cst_40 {dimension_numbers = #tpu.dot_dimension_numbers<[1], [0], [0], [1], [0, 0, 1, 1], [], []>} : vector<2x256xf32>, vector<256x512xf32>, vector<2x512xf32> -> vector<2x512xf32>
    %160 = arith.addf %159, %7 : vector<2x512xf32>
    %161 = vector.extract_strided_slice %160 {offsets = [0, 0], sizes = [2, 128], strides = [1, 1]} : vector<2x512xf32> to vector<2x128xf32>
    %162 = arith.negf %161 : vector<2x128xf32>
    %163 = math.exp %162 : vector<2x128xf32>
    %cst_41 = arith.constant 1.000000e+00 : f32
    %164 = vector.broadcast %cst_41 : f32 to vector<2x128xf32>
    %165 = arith.addf %164, %163 : vector<2x128xf32>
    %166 = arith.divf %164, %165 : vector<2x128xf32>
    %167 = vector.extract_strided_slice %160 {offsets = [0, 128], sizes = [2, 128], strides = [1, 1]} : vector<2x512xf32> to vector<2x128xf32>
    %168 = arith.negf %167 : vector<2x128xf32>
    %169 = math.exp %168 : vector<2x128xf32>
    %cst_42 = arith.constant 1.000000e+00 : f32
    %170 = vector.broadcast %cst_42 : f32 to vector<2x128xf32>
    %171 = arith.addf %170, %169 : vector<2x128xf32>
    %172 = arith.divf %170, %171 : vector<2x128xf32>
    %173 = vector.extract_strided_slice %160 {offsets = [0, 256], sizes = [2, 128], strides = [1, 1]} : vector<2x512xf32> to vector<2x128xf32>
    %174 = math.tanh %173 : vector<2x128xf32>
    %175 = vector.extract_strided_slice %160 {offsets = [0, 384], sizes = [2, 128], strides = [1, 1]} : vector<2x512xf32> to vector<2x128xf32>
    %176 = arith.negf %175 : vector<2x128xf32>
    %177 = math.exp %176 : vector<2x128xf32>
    %cst_43 = arith.constant 1.000000e+00 : f32
    %178 = vector.broadcast %cst_43 : f32 to vector<2x128xf32>
    %179 = arith.addf %178, %177 : vector<2x128xf32>
    %180 = arith.divf %178, %179 : vector<2x128xf32>
    %181 = arith.mulf %172, %125 : vector<2x128xf32>
    %182 = arith.mulf %166, %174 : vector<2x128xf32>
    %183 = arith.addf %181, %182 : vector<2x128xf32>
    %184 = math.tanh %183 : vector<2x128xf32>
    %185 = arith.mulf %180, %184 : vector<2x128xf32>
    %c3_i32 = arith.constant 3 : i32
    %186 = arith.index_cast %c3_i32 : i32 to index
    %c0_44 = arith.constant 0 : index
    %c0_45 = arith.constant 0 : index
    %187 = vector.load %arg1[%186, %c0_44, %c0_45] : memref<4x2x512xf32, #tpu.memory_space<vmem>>, vector<1x2x512xf32>
    %188 = vector.shape_cast %187 : vector<1x2x512xf32> to vector<2x512xf32>
    %cst_46 = arith.constant dense<0.000000e+00> : vector<2x512xf32>
    %189 = tpu.matmul %157, %3, %cst_46 {dimension_numbers = #tpu.dot_dimension_numbers<[1], [0], [0], [1], [0, 0, 1, 1], [], []>} : vector<2x128xf32>, vector<128x512xf32>, vector<2x512xf32> -> vector<2x512xf32>
    %190 = arith.addf %188, %189 : vector<2x512xf32>
    %191 = vector.extract_strided_slice %190 {offsets = [0, 0], sizes = [2, 128], strides = [1, 1]} : vector<2x512xf32> to vector<2x128xf32>
    %192 = arith.negf %191 : vector<2x128xf32>
    %193 = math.exp %192 : vector<2x128xf32>
    %cst_47 = arith.constant 1.000000e+00 : f32
    %194 = vector.broadcast %cst_47 : f32 to vector<2x128xf32>
    %195 = arith.addf %194, %193 : vector<2x128xf32>
    %196 = arith.divf %194, %195 : vector<2x128xf32>
    %197 = vector.extract_strided_slice %190 {offsets = [0, 128], sizes = [2, 128], strides = [1, 1]} : vector<2x512xf32> to vector<2x128xf32>
    %198 = arith.negf %197 : vector<2x128xf32>
    %199 = math.exp %198 : vector<2x128xf32>
    %cst_48 = arith.constant 1.000000e+00 : f32
    %200 = vector.broadcast %cst_48 : f32 to vector<2x128xf32>
    %201 = arith.addf %200, %199 : vector<2x128xf32>
    %202 = arith.divf %200, %201 : vector<2x128xf32>
    %203 = vector.extract_strided_slice %190 {offsets = [0, 256], sizes = [2, 128], strides = [1, 1]} : vector<2x512xf32> to vector<2x128xf32>
    %204 = math.tanh %203 : vector<2x128xf32>
    %205 = vector.extract_strided_slice %190 {offsets = [0, 384], sizes = [2, 128], strides = [1, 1]} : vector<2x512xf32> to vector<2x128xf32>
    %206 = arith.negf %205 : vector<2x128xf32>
    %207 = math.exp %206 : vector<2x128xf32>
    %cst_49 = arith.constant 1.000000e+00 : f32
    %208 = vector.broadcast %cst_49 : f32 to vector<2x128xf32>
    %209 = arith.addf %208, %207 : vector<2x128xf32>
    %210 = arith.divf %208, %209 : vector<2x128xf32>
    %211 = arith.mulf %202, %155 : vector<2x128xf32>
    %212 = arith.mulf %196, %204 : vector<2x128xf32>
    %213 = arith.addf %211, %212 : vector<2x128xf32>
    %214 = math.tanh %213 : vector<2x128xf32>
    %215 = arith.mulf %210, %214 : vector<2x128xf32>
    %216 = tpu.concatenate %215, %185 in 1 : vector<2x128xf32>, vector<2x128xf32> -> vector<2x256xf32>
    %cst_50 = arith.constant dense<0.000000e+00> : vector<2x512xf32>
    %217 = tpu.matmul %216, %4, %cst_50 {dimension_numbers = #tpu.dot_dimension_numbers<[1], [0], [0], [1], [0, 0, 1, 1], [], []>} : vector<2x256xf32>, vector<256x512xf32>, vector<2x512xf32> -> vector<2x512xf32>
    %218 = arith.addf %217, %7 : vector<2x512xf32>
    %219 = vector.extract_strided_slice %218 {offsets = [0, 0], sizes = [2, 128], strides = [1, 1]} : vector<2x512xf32> to vector<2x128xf32>
    %220 = arith.negf %219 : vector<2x128xf32>
    %221 = math.exp %220 : vector<2x128xf32>
    %cst_51 = arith.constant 1.000000e+00 : f32
    %222 = vector.broadcast %cst_51 : f32 to vector<2x128xf32>
    %223 = arith.addf %222, %221 : vector<2x128xf32>
    %224 = arith.divf %222, %223 : vector<2x128xf32>
    %225 = vector.extract_strided_slice %218 {offsets = [0, 128], sizes = [2, 128], strides = [1, 1]} : vector<2x512xf32> to vector<2x128xf32>
    %226 = arith.negf %225 : vector<2x128xf32>
    %227 = math.exp %226 : vector<2x128xf32>
    %cst_52 = arith.constant 1.000000e+00 : f32
    %228 = vector.broadcast %cst_52 : f32 to vector<2x128xf32>
    %229 = arith.addf %228, %227 : vector<2x128xf32>
    %230 = arith.divf %228, %229 : vector<2x128xf32>
    %231 = vector.extract_strided_slice %218 {offsets = [0, 256], sizes = [2, 128], strides = [1, 1]} : vector<2x512xf32> to vector<2x128xf32>
    %232 = math.tanh %231 : vector<2x128xf32>
    %233 = vector.extract_strided_slice %218 {offsets = [0, 384], sizes = [2, 128], strides = [1, 1]} : vector<2x512xf32> to vector<2x128xf32>
    %234 = arith.negf %233 : vector<2x128xf32>
    %235 = math.exp %234 : vector<2x128xf32>
    %cst_53 = arith.constant 1.000000e+00 : f32
    %236 = vector.broadcast %cst_53 : f32 to vector<2x128xf32>
    %237 = arith.addf %236, %235 : vector<2x128xf32>
    %238 = arith.divf %236, %237 : vector<2x128xf32>
    %239 = arith.mulf %230, %183 : vector<2x128xf32>
    %240 = arith.mulf %224, %232 : vector<2x128xf32>
    %241 = arith.addf %239, %240 : vector<2x128xf32>
    %242 = math.tanh %241 : vector<2x128xf32>
    %243 = arith.mulf %238, %242 : vector<2x128xf32>
    %c4_i32 = arith.constant 4 : i32
    %c0_54 = arith.constant 0 : index
    %c0_55 = arith.constant 0 : index
    %244 = vector.load %arg8[%c0_54, %c0_55] : memref<2x128xf32, #tpu.memory_space<vmem>>, vector<2x128xf32>
    tpu.vector_store %arg8[%c0_54, %c0_55], %215 {strides = array<i32>} : memref<2x128xf32, #tpu.memory_space<vmem>>, vector<2x128xf32>,
    %c0_56 = arith.constant 0 : index
    %c0_57 = arith.constant 0 : index
    %245 = vector.load %arg9[%c0_56, %c0_57] : memref<2x128xf32, #tpu.memory_space<vmem>>, vector<2x128xf32>
    tpu.vector_store %arg9[%c0_56, %c0_57], %213 {strides = array<i32>} : memref<2x128xf32, #tpu.memory_space<vmem>>, vector<2x128xf32>,
    %c0_58 = arith.constant 0 : index
    %c0_59 = arith.constant 0 : index
    %246 = vector.load %arg10[%c0_58, %c0_59] : memref<2x128xf32, #tpu.memory_space<vmem>>, vector<2x128xf32>
    tpu.vector_store %arg10[%c0_58, %c0_59], %243 {strides = array<i32>} : memref<2x128xf32, #tpu.memory_space<vmem>>, vector<2x128xf32>,
    %c0_60 = arith.constant 0 : index
    %c0_61 = arith.constant 0 : index
    %247 = vector.load %arg11[%c0_60, %c0_61] : memref<2x128xf32, #tpu.memory_space<vmem>>, vector<2x128xf32>
    tpu.vector_store %arg11[%c0_60, %c0_61], %241 {strides = array<i32>} : memref<2x128xf32, #tpu.memory_space<vmem>>, vector<2x128xf32>,
    %c1_i32_62 = arith.constant 1 : i32
    %248 = arith.cmpi eq, %arg0, %c1_i32_62 : i32
    %249 = arith.extui %248 : i1 to i32
    %c0_i32_63 = arith.constant 0 : i32
    %250 = arith.cmpi ne, %249, %c0_i32_63 : i32
    scf.if %250 {
      %c0_64 = arith.constant 0 : index
      %c0_65 = arith.constant 0 : index
      %251 = vector.load %arg5[%c0_64, %c0_65] : memref<1x128xf32, #tpu.memory_space<vmem>>, vector<1x128xf32>
      %252 = vector.broadcast %251 : vector<1x128xf32> to vector<2x128xf32>
      %253 = arith.mulf %243, %252 : vector<2x128xf32>
      %cst_66 = arith.constant dense<0.000000e+00> : vector<2xf32>
      %254 = vector.multi_reduction <add>, %253, %cst_66 [1] : vector<2x128xf32> to vector<2xf32>
      %255 = vector.shape_cast %254 : vector<2xf32> to vector<2x1xf32>
      %c0_67 = arith.constant 0 : index
      %c0_68 = arith.constant 0 : index
      %256 = vector.load %arg6[%c0_67, %c0_68] : memref<1x1xf32, #tpu.memory_space<vmem>>, vector<1x1xf32>
      %257 = vector.broadcast %256 : vector<1x1xf32> to vector<2x1xf32>
      %258 = arith.addf %255, %257 : vector<2x1xf32>
      %c0_69 = arith.constant 0 : index
      %c0_70 = arith.constant 0 : index
      %259 = vector.load %arg7[%c0_69, %c0_70] : memref<2x1xf32, #tpu.memory_space<vmem>>, vector<2x1xf32>
      tpu.vector_store %arg7[%c0_69, %c0_70], %258 {strides = array<i32>} : memref<2x1xf32, #tpu.memory_space<vmem>>, vector<2x1xf32>,
    } else {
    }
    return
  }
  func.func @transform_0(%arg0: i32) -> (i32, i32, i32) {
    %c0_i32 = arith.constant 0 : i32
    %c0_i32_0 = arith.constant 0 : i32
    %c0_i32_1 = arith.constant 0 : i32
    return %arg0, %c0_i32, %c0_i32_0 : i32, i32, i32
  }
  func.func @transform_1(%arg0: i32) -> (i32, i32) {
    %c0_i32 = arith.constant 0 : i32
    %c0_i32_0 = arith.constant 0 : i32
    %c0_i32_1 = arith.constant 0 : i32
    return %c0_i32, %c0_i32_0 : i32, i32
  }
  func.func @transform_2(%arg0: i32) -> (i32, i32) {
    %c0_i32 = arith.constant 0 : i32
    %c0_i32_0 = arith.constant 0 : i32
    %c0_i32_1 = arith.constant 0 : i32
    return %c0_i32, %c0_i32_0 : i32, i32
  }
  func.func @transform_3(%arg0: i32) -> (i32, i32) {
    %c0_i32 = arith.constant 0 : i32
    %c0_i32_0 = arith.constant 0 : i32
    %c0_i32_1 = arith.constant 0 : i32
    return %c0_i32, %c0_i32_0 : i32, i32
  }
  func.func @transform_4(%arg0: i32) -> (i32, i32) {
    %c0_i32 = arith.constant 0 : i32
    %c0_i32_0 = arith.constant 0 : i32
    %c0_i32_1 = arith.constant 0 : i32
    return %c0_i32, %c0_i32_0 : i32, i32
  }
  func.func @transform_5(%arg0: i32) -> (i32, i32) {
    %c0_i32 = arith.constant 0 : i32
    %c0_i32_0 = arith.constant 0 : i32
    %c0_i32_1 = arith.constant 0 : i32
    return %c0_i32, %c0_i32_0 : i32, i32
  }
  func.func @transform_6(%arg0: i32) -> (i32, i32) {
    %c0_i32 = arith.constant 0 : i32
    %c0_i32_0 = arith.constant 0 : i32
    %c0_i32_1 = arith.constant 0 : i32
    return %c0_i32, %c0_i32_0 : i32, i32
  }
}

</mosaic_0001>

<bundles_post_ra>
// kernel: lstm_regressor.1
= control target key start
LH: loop header
LB: loop body
LE: loop exit
PB: predicated region body
PF: predicated region fallthrough
CT: control target
= control target key end

     0   :  { %s2404_s23 = smov 0   ;;  %s5217_s0 = inlined_call_operand.vmem [shape: f32[8,2,512], index: 0, kind: input, shape index: {}]   ;;  %s5218_s1 = inlined_call_operand.vmem [shape: f32[128,512], index: 1, kind: input, shape index: {}]   ;;  %s5219_s2 = inlined_call_operand.vmem [shape: f32[256,512], index: 2, kind: input, shape index: {}]   ;;  %s5220_s3 = inlined_call_operand.vmem [shape: f32[1,512], index: 3, kind: input, shape index: {}]   ;;  %s5221_s4 = inlined_call_operand.vmem [shape: f32[1,128], index: 4, kind: input, shape index: {}]   ;;  %s5222_s5 = inlined_call_operand.<no memory space> [shape: f32[1,1], index: 5, kind: input, shape index: {}]   ;;  %s5223_s6 = inlined_call_operand.vmem [shape: f32[2,1], index: 6, kind: output, shape index: {}]  }
   0x1   :  { %v11_v0 = vstv %s5222_s5 }
   0x2   :  { %12 = vst [vmem:[#allocation6] sm:$0x1] %v11_v0 }
   0x3 LB: > { %s2410_s24 = sadd.s32 4294967295, %s2361_s23   ;;  %p1986_p0 = scmp.ge.s32.totalorder %s2361_s23, 1  ;;  %s2361_s23 = sphi %s2404_s23, %s18_s23  }
   0x4   : > { %p211_p1 = scmp.lt.s32.totalorder %s2361_s23, 3 }
   0x6   : > { %p212_p2 = pnand %p1986_p0, %p211_p1 }
   0x8   : > { %215 = sbr.rel (%p212_p2) target bundleno = 1582 (0x62e), region = 44 }
   0xd   : > { %s1987_s25 = sshll.u32 %s2410_s24, 2  ;;  %p1990_p4 = scmp.ne.s32.totalorder %s2410_s24, 0 }
   0xe   : > { %p238_p3 = scmp.lt.s32.totalorder %s1987_s25, 7 }
   0xf   : > { %247 = sbr.rel (%p1990_p4) target bundleno = 23 (0x17), region = 48 }
  0x10   : > { %s6141_s25 = smov (!%p238_p3, %s1987_s25), 7 }
  0x11   : > { %s2023_s5 = sshll.u32 %s6141_s25, 3 }
  0x12   : > { %s2418_s28 = scalar_lea.vmem %s5217_s0, %s2023_s5 }
  0x14   : > { %v2363_v1 = vmov 0.0  }
  0x15   : > { %248 = vst [vmem:[#allocation2] sm:$0x3] %v2363_v1  ;;  %249 = vst [vmem:[#allocation3] sm:$0x3] %v2363_v1 }
  0x16   : > { %250 = vst [vmem:[#allocation4] sm:$0x3] %v2363_v1  ;;  %251 = vst [vmem:[#allocation5] sm:$0x3] %v2363_v1 }
  0x17 PF: > { %v2424_v2 = vld [vmem:[%s5218_s1 + $0x1e8] sm:$0xff]  ;;  %v2429_v3 = vld [vmem:[%s5218_s1 + $0x1f8] sm:$0xff]  ;;  %v2434_v4 = vld [vmem:[%s5218_s1 + $0x1e0] sm:$0xff]  ;;  %p2018_p5 = scmp.ne.s32.totalorder %s2410_s24, 1 }
  0x18   : > { %471 = vmatprep.subr.mxu0 %v2424_v2  ;;  %542 = vmatprep.subr.mxu1 %v2429_v3  ;;  %v2441_v5 = vld [vmem:[%s5218_s1 + $0x1f0] sm:$0xff]  ;;  %v2446_v6 = vld [vmem:[%s5218_s1 + $0x1c8] sm:$0xff]  ;;  %v2451_v7 = vld [vmem:[%s5218_s1 + $0x1d8] sm:$0xff] }
  0x19   : > { %472 = vmatpush1.msra.mxu0 %v2434_v4  ;;  %543 = vmatpush1.msra.mxu1 %v2441_v5  ;;  %v2458_v8 = vld [vmem:[%s5218_s1 + $0x1c0] sm:$0xff]  ;;  %v2463_v9 = vld [vmem:[%s5218_s1 + $0x1d0] sm:$0xff]  ;;  %v2468_v10 = vld [vmem:[%s5218_s1 + $0x1a8] sm:$0xff] }
  0x1a   : > { %473 = vmatprep.subr.mxu0 %v2446_v6  ;;  %544 = vmatprep.subr.mxu1 %v2451_v7  ;;  %v2475_v11 = vld [vmem:[%s5218_s1 + $0x1b8] sm:$0xff]  ;;  %v2480_v12 = vld [vmem:[%s5218_s1 + $0x1a0] sm:$0xff]  ;;  %v2485_v13 = vld [vmem:[%s5218_s1 + $0x1b0] sm:$0xff] }
  0x1b   : > { %474 = vmatpush1.msra.mxu0 %v2458_v8  ;;  %545 = vmatpush1.msra.mxu1 %v2463_v9  ;;  %v2492_v14 = vld [vmem:[%s5218_s1 + $0x188] sm:$0xff]  ;;  %v2497_v15 = vld [vmem:[%s5218_s1 + $0x198] sm:$0xff]  ;;  %v2504_v16 = vld [vmem:[%s5218_s1 + $0x180] sm:$0xff] }
  0x1c   : > { %475 = vmatprep.subr.mxu0 %v2468_v10  ;;  %546 = vmatprep.subr.mxu1 %v2475_v11  ;;  %v2509_v17 = vld [vmem:[%s5218_s1 + $0x190] sm:$0xff]  ;;  %v2516_v18 = vld [vmem:[%s5218_s1 + $0x168] sm:$0xff]  ;;  %v2521_v19 = vld [vmem:[%s5218_s1 + $0x178] sm:$0xff] }
  0x1d   : > { %476 = vmatpush1.msra.mxu0 %v2480_v12  ;;  %547 = vmatpush1.msra.mxu1 %v2485_v13  ;;  %v2528_v20 = vld [vmem:[%s5218_s1 + $0x160] sm:$0xff]  ;;  %v2533_v21 = vld [vmem:[%s5218_s1 + $0x170] sm:$0xff]  ;;  %v2540_v22 = vld [vmem:[%s5218_s1 + $0x148] sm:$0xff] }
  0x1e   : > { %477 = vmatprep.subr.mxu0 %v2492_v14  ;;  %548 = vmatprep.subr.mxu1 %v2497_v15  ;;  %v2545_v23 = vld [vmem:[%s5218_s1 + $0x158] sm:$0xff]  ;;  %v2552_v24 = vld [vmem:[%s5218_s1 + $0x140] sm:$0xff]  ;;  %v2557_v25 = vld [vmem:[%s5218_s1 + $0x150] sm:$0xff] }
  0x1f   : > { %478 = vmatpush1.msra.mxu0 %v2504_v16  ;;  %549 = vmatpush1.msra.mxu1 %v2509_v17  ;;  %v2564_v26 = vld [vmem:[%s5218_s1 + $0x128] sm:$0xff]  ;;  %v2569_v27 = vld [vmem:[%s5218_s1 + $0x138] sm:$0xff]  ;;  %v2576_v28 = vld [vmem:[%s5218_s1 + $0x120] sm:$0xff] }
  0x20   : > { %479 = vmatprep.subr.mxu0 %v2516_v18  ;;  %550 = vmatprep.subr.mxu1 %v2521_v19  ;;  %v2581_v29 = vld [vmem:[%s5218_s1 + $0x130] sm:$0xff]  ;;  %v2588_v30 = vld [vmem:[%s5218_s1 + $0x108] sm:$0xff]  ;;  %v2593_v31 = vld [vmem:[%s5218_s1 + $0x118] sm:$0xff] }
  0x21   : > { %480 = vmatpush1.msra.mxu0 %v2528_v20  ;;  %551 = vmatpush1.msra.mxu1 %v2533_v21  ;;  %v2600_v32 = vld [vmem:[%s5218_s1 + $0x100] sm:$0xff]  ;;  %v2605_v33 = vld [vmem:[%s5218_s1 + $0x110] sm:$0xff]  ;;  %v2612_v34 = vld [vmem:[%s5218_s1 + $0xe8] sm:$0xff] }
  0x22   : > { %481 = vmatprep.subr.mxu0 %v2540_v22  ;;  %552 = vmatprep.subr.mxu1 %v2545_v23  ;;  %v2617_v35 = vld [vmem:[%s5218_s1 + $0xf8] sm:$0xff]  ;;  %v2624_v36 = vld [vmem:[%s5218_s1 + $0xe0] sm:$0xff]  ;;  %v2629_v37 = vld [vmem:[%s5218_s1 + $0xf0] sm:$0xff] }
  0x23   : > { %482 = vmatpush1.msra.mxu0 %v2552_v24  ;;  %553 = vmatpush1.msra.mxu1 %v2557_v25  ;;  %v2636_v38 = vld [vmem:[%s5218_s1 + $0xc8] sm:$0xff]  ;;  %v2641_v39 = vld [vmem:[%s5218_s1 + $0xd8] sm:$0xff]  ;;  %v2648_v40 = vld [vmem:[%s5218_s1 + $0xc0] sm:$0xff] }
  0x24   : > { %483 = vmatprep.subr.mxu0 %v2564_v26  ;;  %554 = vmatprep.subr.mxu1 %v2569_v27  ;;  %v2653_v41 = vld [vmem:[%s5218_s1 + $0xd0] sm:$0xff]  ;;  %v2660_v42 = vld [vmem:[%s5218_s1 + $0xa8] sm:$0xff]  ;;  %v2665_v43 = vld [vmem:[%s5218_s1 + $0xb8] sm:$0xff] }
  0x25   : > { %484 = vmatpush1.msra.mxu0 %v2576_v28  ;;  %555 = vmatpush1.msra.mxu1 %v2581_v29  ;;  %v2672_v44 = vld [vmem:[%s5218_s1 + $0xa0] sm:$0xff]  ;;  %v2677_v45 = vld [vmem:[%s5218_s1 + $0xb0] sm:$0xff]  ;;  %v2684_v46 = vld [vmem:[%s5218_s1 + $0x88] sm:$0xff] }
  0x26   : > { %485 = vmatprep.subr.mxu0 %v2588_v30  ;;  %556 = vmatprep.subr.mxu1 %v2593_v31  ;;  %v2689_v47 = vld [vmem:[%s5218_s1 + $0x98] sm:$0xff]  ;;  %v2696_v48 = vld [vmem:[%s5218_s1 + $0x80] sm:$0xff]  ;;  %v2701_v49 = vld [vmem:[%s5218_s1 + $0x90] sm:$0xff] }
  0x27   : > { %486 = vmatpush1.msra.mxu0 %v2600_v32  ;;  %557 = vmatpush1.msra.mxu1 %v2605_v33  ;;  %5534 = vst [vmem:[#allocation7_spill] sm:$0xff] %v2689_v47  ;;  %5535 = vst [vmem:[#allocation8_spill] sm:$0xff] %v2696_v48  ;;  %v2708_v50 = vld [vmem:[%s5218_s1 + $0x68] sm:$0xff]  ;;  %v2713_v51 = vld [vmem:[%s5218_s1 + $0x78] sm:$0xff] }
  0x28   : > { %487 = vmatprep.subr.mxu0 %v2612_v34  ;;  %558 = vmatprep.subr.mxu1 %v2617_v35  ;;  %5536 = vst [vmem:[#allocation9_spill] sm:$0xff] %v2701_v49  ;;  %5537 = vst [vmem:[#allocation10_spill] sm:$0xff] %v2708_v50  ;;  %v2720_v52 = vld [vmem:[%s5218_s1 + $0x60] sm:$0xff]  ;;  %v2725_v53 = vld [vmem:[%s5218_s1 + $0x70] sm:$0xff] }
  0x29   : > { %488 = vmatpush1.msra.mxu0 %v2624_v36  ;;  %559 = vmatpush1.msra.mxu1 %v2629_v37  ;;  %5538 = vst [vmem:[#allocation11_spill] sm:$0xff] %v2713_v51  ;;  %5539 = vst [vmem:[#allocation12_spill] sm:$0xff] %v2720_v52  ;;  %v2732_v54 = vld [vmem:[%s5218_s1 + $0x48] sm:$0xff]  ;;  %v2737_v55 = vld [vmem:[%s5218_s1 + $0x58] sm:$0xff] }
  0x2a   : > { %489 = vmatprep.subr.mxu0 %v2636_v38  ;;  %560 = vmatprep.subr.mxu1 %v2641_v39  ;;  %5540 = vst [vmem:[#allocation13_spill] sm:$0xff] %v2725_v53  ;;  %5541 = vst [vmem:[#allocation14_spill] sm:$0xff] %v2732_v54  ;;  %v2744_v56 = vld [vmem:[%s5218_s1 + $0x40] sm:$0xff]  ;;  %v2749_v57 = vld [vmem:[%s5218_s1 + $0x50] sm:$0xff] }
  0x2b   : > { %490 = vmatpush1.msra.mxu0 %v2648_v40  ;;  %561 = vmatpush1.msra.mxu1 %v2653_v41  ;;  %5542 = vst [vmem:[#allocation15_spill] sm:$0xff] %v2737_v55  ;;  %5543 = vst [vmem:[#allocation16_spill] sm:$0xff] %v2744_v56  ;;  %v2756_v58 = vld [vmem:[%s5218_s1 + $0x28] sm:$0xff]  ;;  %v2761_v59 = vld [vmem:[%s5218_s1 + $0x38] sm:$0xff] }
  0x2c   : > { %491 = vmatprep.subr.mxu0 %v2660_v42  ;;  %562 = vmatprep.subr.mxu1 %v2665_v43  ;;  %5544 = vst [vmem:[#allocation17_spill] sm:$0xff] %v2749_v57  ;;  %5545 = vst [vmem:[#allocation18_spill] sm:$0xff] %v2756_v58  ;;  %v2768_v60 = vld [vmem:[%s5218_s1 + $0x20] sm:$0xff]  ;;  %v2773_v61 = vld [vmem:[%s5218_s1 + $0x30] sm:$0xff] }
  0x2d   : > { %492 = vmatpush1.msra.mxu0 %v2672_v44  ;;  %563 = vmatpush1.msra.mxu1 %v2677_v45  ;;  %5546 = vst [vmem:[#allocation19_spill] sm:$0xff] %v2761_v59  ;;  %5547 = vst [vmem:[#allocation20_spill] sm:$0xff] %v2768_v60  ;;  %v2780_v62 = vld [vmem:[%s5218_s1 + $0x8] sm:$0xff]  ;;  %v2785_v63 = vld [vmem:[%s5218_s1 + $0x18] sm:$0xff] }
  0x2e   : > { %493 = vmatprep.subr.mxu0 %v2684_v46  ;;  %564 = vmatprep.subr.mxu1 %v2689_v47  ;;  %5548 = vst [vmem:[#allocation21_spill] sm:$0xff] %v2773_v61  ;;  %5549 = vst [vmem:[#allocation22_spill] sm:$0xff] %v2780_v62  ;;  %v2792_v0 = vld [vmem:[%s5218_s1] sm:$0xff]  ;;  %v2799_v1 = vld [vmem:[%s5218_s1 + $0x10] sm:$0xff] }
  0x2f   : > { %494 = vmatpush1.msra.mxu0 %v2696_v48  ;;  %565 = vmatpush1.msra.mxu1 %v2701_v49  ;;  %5550 = vst [vmem:[#allocation23_spill] sm:$0xff] %v2785_v63  ;;  %5551 = vst [vmem:[#allocation24_spill] sm:$0xff] %v2792_v0 }
  0x30   : > { %495 = vmatprep.subr.mxu0 %v2708_v50  ;;  %566 = vmatprep.subr.mxu1 %v2713_v51  ;;  %5552 = vst [vmem:[#allocation25_spill] sm:$0xff] %v2799_v1 }
  0x31   : > { %496 = vmatpush1.msra.mxu0 %v2720_v52  ;;  %567 = vmatpush1.msra.mxu1 %v2725_v53 }
  0x32   : > { %497 = vmatprep.subr.mxu0 %v2732_v54  ;;  %568 = vmatprep.subr.mxu1 %v2737_v55 }
  0x33   : > { %498 = vmatpush1.msra.mxu0 %v2744_v56  ;;  %569 = vmatpush1.msra.mxu1 %v2749_v57  ;;  %v468_v57 = vld [vmem:[#allocation4] sm:$0x3] }
  0x34   : > { %499 = vmatprep.subr.mxu0 %v2756_v58  ;;  %570 = vmatprep.subr.mxu1 %v2761_v59  ;;  %v466_v58 = vld [vmem:[#allocation2] sm:$0x3]  ;;  %v5228_v59 = vmov 0.0  }
  0x35   : > { %500 = vmatpush1.msra.mxu0 %v2768_v60  ;;  %571 = vmatpush1.msra.mxu1 %v2773_v61  ;;  %v2810_v61 = vld [vmem:[%s5219_s2 + $0x1e8] sm:$0xff]  ;;  %v3255_v60 = vld [vmem:[%s5219_s2 + $0x3b0] sm:$0xff] }
  0x36   : > { %501 = vmatprep.subr.mxu0 %v2780_v62  ;;  %572 = vmatprep.subr.mxu1 %v2785_v63  ;;  %5553 = vst [vmem:[#allocation26_spill] sm:$0xff] %v2810_v61  ;;  %v2815_v63 = vld [vmem:[%s5219_s2 + $0x1f8] sm:$0xff]  ;;  %v3238_v62 = vld [vmem:[%s5219_s2 + $0x3a8] sm:$0xff]  ;;  %5628 = vst [vmem:[#allocation101_spill] sm:$0xff] %v3255_v60 }
  0x37   : > { %502 = vmatpush1.msra.mxu0 %v2792_v0  ;;  %535 = vmatprep.mubr.f32.mxu0 %v5228_v59  ;;  %5554 = vst [vmem:[#allocation27_spill] sm:$0xff] %v2815_v63  ;;  %v3221_v0 = vld [vmem:[%s5219_s2 + $0x3d8] sm:$0xff]  ;;  %5625 = vst [vmem:[#allocation98_spill] sm:$0xff] %v3238_v62 }
  0x38   : > { %573 = vmatpush1.msra.mxu1 %v2799_v1  ;;  %606 = vmatprep.mubr.f32.mxu1 %v5228_v59  ;;  %v2822_v59 = vld [vmem:[%s5219_s2 + $0x1e0] sm:$0xff]  ;;  %5622 = vst [vmem:[#allocation95_spill] sm:$0xff] %v3221_v0 }
  0x39   : > { %536 = vmatmul.mubr.f32.vlgmr.msra.gmra.mxu0 %v466_v58  ;;  %607 = vmatmul.mubr.f32.vlgmr.msra.gmra.mxu1 %v466_v58  ;;  %5555 = vst [vmem:[#allocation28_spill] sm:$0xff] %v2822_v59  ;;  %v2827_v58 = vld [vmem:[%s5219_s2 + $0x1f0] sm:$0xff]  ;;  %v3204_v1 = vld [vmem:[%s5219_s2 + $0x3e0] sm:$0xff] }
  0x3a   : > { %667 = vmatprep.subr.mxu0 %v2810_v61  ;;  %738 = vmatprep.subr.mxu1 %v2815_v63  ;;  %5556 = vst [vmem:[#allocation29_spill] sm:$0xff] %v2827_v58  ;;  %v2834_v61 = vld [vmem:[%s5219_s2 + $0x1c8] sm:$0xff]  ;;  %v2839_v63 = vld [vmem:[%s5219_s2 + $0x1d8] sm:$0xff]  ;;  %5619 = vst [vmem:[#allocation92_spill] sm:$0xff] %v3204_v1 }
  0x3b   : > { %668 = vmatpush1.msra.mxu0 %v2822_v59  ;;  %739 = vmatpush1.msra.mxu1 %v2827_v58  ;;  %5557 = vst [vmem:[#allocation30_spill] sm:$0xff] %v2834_v61  ;;  %5558 = vst [vmem:[#allocation31_spill] sm:$0xff] %v2839_v63  ;;  %v2846_v59 = vld [vmem:[%s5219_s2 + $0x1c0] sm:$0xff]  ;;  %v2851_v58 = vld [vmem:[%s5219_s2 + $0x1d0] sm:$0xff] }
  0x3c   : > { %669 = vmatprep.subr.mxu0 %v2834_v61  ;;  %740 = vmatprep.subr.mxu1 %v2839_v63  ;;  %5559 = vst [vmem:[#allocation32_spill] sm:$0xff] %v2846_v59  ;;  %5560 = vst [vmem:[#allocation33_spill] sm:$0xff] %v2851_v58  ;;  %v2858_v61 = vld [vmem:[%s5219_s2 + $0x1a8] sm:$0xff]  ;;  %v2863_v63 = vld [vmem:[%s5219_s2 + $0x1b8] sm:$0xff] }
  0x3d   : > { %670 = vmatpush1.msra.mxu0 %v2846_v59  ;;  %741 = vmatpush1.msra.mxu1 %v2851_v58  ;;  %5561 = vst [vmem:[#allocation34_spill] sm:$0xff] %v2858_v61  ;;  %5562 = vst [vmem:[#allocation35_spill] sm:$0xff] %v2863_v63  ;;  %v2870_v59 = vld [vmem:[%s5219_s2 + $0x1a0] sm:$0xff]  ;;  %v2875_v58 = vld [vmem:[%s5219_s2 + $0x1b0] sm:$0xff] }
  0x3e   : > { %671 = vmatprep.subr.mxu0 %v2858_v61  ;;  %742 = vmatprep.subr.mxu1 %v2863_v63  ;;  %5563 = vst [vmem:[#allocation36_spill] sm:$0xff] %v2870_v59  ;;  %5564 = vst [vmem:[#allocation37_spill] sm:$0xff] %v2875_v58  ;;  %v2882_v61 = vld [vmem:[%s5219_s2 + $0x188] sm:$0xff]  ;;  %v2887_v63 = vld [vmem:[%s5219_s2 + $0x198] sm:$0xff] }
  0x3f   : > { %672 = vmatpush1.msra.mxu0 %v2870_v59  ;;  %743 = vmatpush1.msra.mxu1 %v2875_v58  ;;  %5565 = vst [vmem:[#allocation38_spill] sm:$0xff] %v2882_v61  ;;  %5566 = vst [vmem:[#allocation39_spill] sm:$0xff] %v2887_v63  ;;  %v2894_v59 = vld [vmem:[%s5219_s2 + $0x180] sm:$0xff]  ;;  %v2899_v58 = vld [vmem:[%s5219_s2 + $0x190] sm:$0xff] }
  0x40   : > { %673 = vmatprep.subr.mxu0 %v2882_v61  ;;  %744 = vmatprep.subr.mxu1 %v2887_v63  ;;  %5567 = vst [vmem:[#allocation40_spill] sm:$0xff] %v2894_v59  ;;  %5568 = vst [vmem:[#allocation41_spill] sm:$0xff] %v2899_v58  ;;  %v2906_v61 = vld [vmem:[%s5219_s2 + $0x168] sm:$0xff]  ;;  %v2911_v63 = vld [vmem:[%s5219_s2 + $0x178] sm:$0xff] }
  0x41   : > { %674 = vmatpush1.msra.mxu0 %v2894_v59  ;;  %745 = vmatpush1.msra.mxu1 %v2899_v58  ;;  %5569 = vst [vmem:[#allocation42_spill] sm:$0xff] %v2906_v61  ;;  %5570 = vst [vmem:[#allocation43_spill] sm:$0xff] %v2911_v63  ;;  %v2918_v59 = vld [vmem:[%s5219_s2 + $0x160] sm:$0xff]  ;;  %v2923_v58 = vld [vmem:[%s5219_s2 + $0x170] sm:$0xff] }
  0x42   : > { %675 = vmatprep.subr.mxu0 %v2906_v61  ;;  %746 = vmatprep.subr.mxu1 %v2911_v63  ;;  %5571 = vst [vmem:[#allocation44_spill] sm:$0xff] %v2918_v59  ;;  %5572 = vst [vmem:[#allocation45_spill] sm:$0xff] %v2923_v58  ;;  %v2930_v61 = vld [vmem:[%s5219_s2 + $0x148] sm:$0xff]  ;;  %v2935_v63 = vld [vmem:[%s5219_s2 + $0x158] sm:$0xff] }
  0x43   : > { %676 = vmatpush1.msra.mxu0 %v2918_v59  ;;  %747 = vmatpush1.msra.mxu1 %v2923_v58  ;;  %5573 = vst [vmem:[#allocation46_spill] sm:$0xff] %v2930_v61  ;;  %5574 = vst [vmem:[#allocation47_spill] sm:$0xff] %v2935_v63  ;;  %v2942_v59 = vld [vmem:[%s5219_s2 + $0x140] sm:$0xff]  ;;  %v2947_v58 = vld [vmem:[%s5219_s2 + $0x150] sm:$0xff] }
  0x44   : > { %677 = vmatprep.subr.mxu0 %v2930_v61  ;;  %748 = vmatprep.subr.mxu1 %v2935_v63  ;;  %5575 = vst [vmem:[#allocation48_spill] sm:$0xff] %v2942_v59  ;;  %5576 = vst [vmem:[#allocation49_spill] sm:$0xff] %v2947_v58  ;;  %v2954_v61 = vld [vmem:[%s5219_s2 + $0x128] sm:$0xff]  ;;  %v2959_v63 = vld [vmem:[%s5219_s2 + $0x138] sm:$0xff] }
  0x45   : > { %678 = vmatpush1.msra.mxu0 %v2942_v59  ;;  %749 = vmatpush1.msra.mxu1 %v2947_v58  ;;  %5577 = vst [vmem:[#allocation50_spill] sm:$0xff] %v2954_v61  ;;  %5578 = vst [vmem:[#allocation51_spill] sm:$0xff] %v2959_v63  ;;  %v2966_v59 = vld [vmem:[%s5219_s2 + $0x120] sm:$0xff]  ;;  %v2971_v58 = vld [vmem:[%s5219_s2 + $0x130] sm:$0xff] }
  0x46   : > { %679 = vmatprep.subr.mxu0 %v2954_v61  ;;  %750 = vmatprep.subr.mxu1 %v2959_v63  ;;  %5579 = vst [vmem:[#allocation52_spill] sm:$0xff] %v2966_v59  ;;  %5580 = vst [vmem:[#allocation53_spill] sm:$0xff] %v2971_v58  ;;  %v2978_v61 = vld [vmem:[%s5219_s2 + $0x108] sm:$0xff]  ;;  %v2983_v63 = vld [vmem:[%s5219_s2 + $0x118] sm:$0xff] }
  0x47   : > { %680 = vmatpush1.msra.mxu0 %v2966_v59  ;;  %751 = vmatpush1.msra.mxu1 %v2971_v58  ;;  %5581 = vst [vmem:[#allocation54_spill] sm:$0xff] %v2978_v61  ;;  %5582 = vst [vmem:[#allocation55_spill] sm:$0xff] %v2983_v63  ;;  %v2990_v59 = vld [vmem:[%s5219_s2 + $0x100] sm:$0xff]  ;;  %v2995_v58 = vld [vmem:[%s5219_s2 + $0x110] sm:$0xff] }
  0x48   : > { %681 = vmatprep.subr.mxu0 %v2978_v61  ;;  %752 = vmatprep.subr.mxu1 %v2983_v63  ;;  %5583 = vst [vmem:[#allocation56_spill] sm:$0xff] %v2990_v59  ;;  %5584 = vst [vmem:[#allocation57_spill] sm:$0xff] %v2995_v58  ;;  %v3002_v61 = vld [vmem:[%s5219_s2 + $0xe8] sm:$0xff]  ;;  %v3007_v63 = vld [vmem:[%s5219_s2 + $0xf8] sm:$0xff] }
  0x49   : > { %682 = vmatpush1.msra.mxu0 %v2990_v59  ;;  %753 = vmatpush1.msra.mxu1 %v2995_v58  ;;  %5585 = vst [vmem:[#allocation58_spill] sm:$0xff] %v3002_v61  ;;  %5586 = vst [vmem:[#allocation59_spill] sm:$0xff] %v3007_v63  ;;  %v3014_v59 = vld [vmem:[%s5219_s2 + $0xe0] sm:$0xff]  ;;  %v3019_v58 = vld [vmem:[%s5219_s2 + $0xf0] sm:$0xff] }
  0x4a   : > { %683 = vmatprep.subr.mxu0 %v3002_v61  ;;  %754 = vmatprep.subr.mxu1 %v3007_v63  ;;  %5587 = vst [vmem:[#allocation60_spill] sm:$0xff] %v3014_v59  ;;  %5588 = vst [vmem:[#allocation61_spill] sm:$0xff] %v3019_v58  ;;  %v3026_v61 = vld [vmem:[%s5219_s2 + $0xc8] sm:$0xff]  ;;  %v3031_v63 = vld [vmem:[%s5219_s2 + $0xd8] sm:$0xff] }
  0x4b   : > { %684 = vmatpush1.msra.mxu0 %v3014_v59  ;;  %755 = vmatpush1.msra.mxu1 %v3019_v58  ;;  %5589 = vst [vmem:[#allocation62_spill] sm:$0xff] %v3026_v61  ;;  %5590 = vst [vmem:[#allocation63_spill] sm:$0xff] %v3031_v63  ;;  %v3038_v59 = vld [vmem:[%s5219_s2 + $0xc0] sm:$0xff]  ;;  %v3043_v58 = vld [vmem:[%s5219_s2 + $0xd0] sm:$0xff] }
  0x4c   : > { %685 = vmatprep.subr.mxu0 %v3026_v61  ;;  %756 = vmatprep.subr.mxu1 %v3031_v63  ;;  %5591 = vst [vmem:[#allocation64_spill] sm:$0xff] %v3038_v59  ;;  %5592 = vst [vmem:[#allocation65_spill] sm:$0xff] %v3043_v58  ;;  %v3050_v61 = vld [vmem:[%s5219_s2 + $0xa8] sm:$0xff]  ;;  %v3055_v63 = vld [vmem:[%s5219_s2 + $0xb8] sm:$0xff] }
  0x4d   : > { %686 = vmatpush1.msra.mxu0 %v3038_v59  ;;  %757 = vmatpush1.msra.mxu1 %v3043_v58  ;;  %5593 = vst [vmem:[#allocation66_spill] sm:$0xff] %v3050_v61  ;;  %5594 = vst [vmem:[#allocation67_spill] sm:$0xff] %v3055_v63  ;;  %v3062_v59 = vld [vmem:[%s5219_s2 + $0xa0] sm:$0xff]  ;;  %v3067_v58 = vld [vmem:[%s5219_s2 + $0xb0] sm:$0xff] }
  0x4e   : > { %687 = vmatprep.subr.mxu0 %v3050_v61  ;;  %758 = vmatprep.subr.mxu1 %v3055_v63  ;;  %5595 = vst [vmem:[#allocation68_spill] sm:$0xff] %v3062_v59  ;;  %5596 = vst [vmem:[#allocation69_spill] sm:$0xff] %v3067_v58  ;;  %v3074_v61 = vld [vmem:[%s5219_s2 + $0x88] sm:$0xff]  ;;  %v3079_v63 = vld [vmem:[%s5219_s2 + $0x98] sm:$0xff] }
  0x4f   : > { %688 = vmatpush1.msra.mxu0 %v3062_v59  ;;  %759 = vmatpush1.msra.mxu1 %v3067_v58  ;;  %5597 = vst [vmem:[#allocation70_spill] sm:$0xff] %v3074_v61  ;;  %5598 = vst [vmem:[#allocation71_spill] sm:$0xff] %v3079_v63  ;;  %v3086_v59 = vld [vmem:[%s5219_s2 + $0x80] sm:$0xff]  ;;  %v3091_v58 = vld [vmem:[%s5219_s2 + $0x90] sm:$0xff] }
  0x50   : > { %689 = vmatprep.subr.mxu0 %v3074_v61  ;;  %760 = vmatprep.subr.mxu1 %v3079_v63  ;;  %5599 = vst [vmem:[#allocation72_spill] sm:$0xff] %v3086_v59  ;;  %5600 = vst [vmem:[#allocation73_spill] sm:$0xff] %v3091_v58  ;;  %v3098_v61 = vld [vmem:[%s5219_s2 + $0x68] sm:$0xff]  ;;  %v3103_v63 = vld [vmem:[%s5219_s2 + $0x78] sm:$0xff] }
  0x51   : > { %690 = vmatpush1.msra.mxu0 %v3086_v59  ;;  %761 = vmatpush1.msra.mxu1 %v3091_v58  ;;  %5601 = vst [vmem:[#allocation74_spill] sm:$0xff] %v3098_v61  ;;  %5602 = vst [vmem:[#allocation75_spill] sm:$0xff] %v3103_v63  ;;  %v3110_v59 = vld [vmem:[%s5219_s2 + $0x60] sm:$0xff]  ;;  %v3115_v58 = vld [vmem:[%s5219_s2 + $0x70] sm:$0xff] }
  0x52   : > { %691 = vmatprep.subr.mxu0 %v3098_v61  ;;  %762 = vmatprep.subr.mxu1 %v3103_v63  ;;  %5603 = vst [vmem:[#allocation76_spill] sm:$0xff] %v3110_v59  ;;  %5604 = vst [vmem:[#allocation77_spill] sm:$0xff] %v3115_v58  ;;  %v3122_v61 = vld [vmem:[%s5219_s2 + $0x48] sm:$0xff]  ;;  %v3127_v63 = vld [vmem:[%s5219_s2 + $0x58] sm:$0xff] }
  0x53   : > { %692 = vmatpush1.msra.mxu0 %v3110_v59  ;;  %763 = vmatpush1.msra.mxu1 %v3115_v58  ;;  %5605 = vst [vmem:[#allocation78_spill] sm:$0xff] %v3122_v61  ;;  %5606 = vst [vmem:[#allocation79_spill] sm:$0xff] %v3127_v63  ;;  %v3134_v59 = vld [vmem:[%s5219_s2 + $0x40] sm:$0xff]  ;;  %v3139_v58 = vld [vmem:[%s5219_s2 + $0x50] sm:$0xff] }
  0x54   : > { %693 = vmatprep.subr.mxu0 %v3122_v61  ;;  %764 = vmatprep.subr.mxu1 %v3127_v63  ;;  %5607 = vst [vmem:[#allocation80_spill] sm:$0xff] %v3134_v59  ;;  %5608 = vst [vmem:[#allocation81_spill] sm:$0xff] %v3139_v58  ;;  %v3146_v61 = vld [vmem:[%s5219_s2 + $0x28] sm:$0xff]  ;;  %v3151_v63 = vld [vmem:[%s5219_s2 + $0x38] sm:$0xff] }
  0x55   : > { %694 = vmatpush1.msra.mxu0 %v3134_v59  ;;  %765 = vmatpush1.msra.mxu1 %v3139_v58  ;;  %5609 = vst [vmem:[#allocation82_spill] sm:$0xff] %v3146_v61  ;;  %5610 = vst [vmem:[#allocation83_spill] sm:$0xff] %v3151_v63  ;;  %v3158_v59 = vld [vmem:[%s5219_s2 + $0x20] sm:$0xff]  ;;  %v3163_v58 = vld [vmem:[%s5219_s2 + $0x30] sm:$0xff] }
  0x56   : > { %695 = vmatprep.subr.mxu0 %v3146_v61  ;;  %766 = vmatprep.subr.mxu1 %v3151_v63  ;;  %5611 = vst [vmem:[#allocation84_spill] sm:$0xff] %v3158_v59  ;;  %5612 = vst [vmem:[#allocation85_spill] sm:$0xff] %v3163_v58  ;;  %v3170_v61 = vld [vmem:[%s5219_s2 + $0x8] sm:$0xff]  ;;  %v3175_v63 = vld [vmem:[%s5219_s2 + $0x18] sm:$0xff] }
  0x57   : > { %696 = vmatpush1.msra.mxu0 %v3158_v59  ;;  %767 = vmatpush1.msra.mxu1 %v3163_v58  ;;  %5613 = vst [vmem:[#allocation86_spill] sm:$0xff] %v3170_v61  ;;  %5614 = vst [vmem:[#allocation87_spill] sm:$0xff] %v3175_v63  ;;  %v3182_v59 = vld [vmem:[%s5219_s2] sm:$0xff]  ;;  %v3187_v58 = vld [vmem:[%s5219_s2 + $0x10] sm:$0xff] }
  0x58   : > { %697 = vmatprep.subr.mxu0 %v3170_v61  ;;  %768 = vmatprep.subr.mxu1 %v3175_v63  ;;  %5615 = vst [vmem:[#allocation88_spill] sm:$0xff] %v3182_v59  ;;  %5616 = vst [vmem:[#allocation89_spill] sm:$0xff] %v3187_v58  ;;  %v3194_v61 = vld [vmem:[%s5219_s2 + $0x3e8] sm:$0xff]  ;;  %v3199_v63 = vld [vmem:[%s5219_s2 + $0x3f8] sm:$0xff] }
  0x59   : > { %698 = vmatpush1.msra.mxu0 %v3182_v59  ;;  %769 = vmatpush1.msra.mxu1 %v3187_v58  ;;  %5617 = vst [vmem:[#allocation90_spill] sm:$0xff] %v3194_v61  ;;  %5618 = vst [vmem:[#allocation91_spill] sm:$0xff] %v3199_v63  ;;  %v3211_v58 = vld [vmem:[%s5219_s2 + $0x3f0] sm:$0xff]  ;;  %v3216_v59 = vld [vmem:[%s5219_s2 + $0x3c8] sm:$0xff] }
  0x5a   : > { %699 = vmatprep.subr.mxu0 %v3194_v61  ;;  %770 = vmatprep.subr.mxu1 %v3199_v63  ;;  %5620 = vst [vmem:[#allocation93_spill] sm:$0xff] %v3211_v58  ;;  %5621 = vst [vmem:[#allocation94_spill] sm:$0xff] %v3216_v59  ;;  %v3228_v63 = vld [vmem:[%s5219_s2 + $0x3c0] sm:$0xff]  ;;  %v3233_v61 = vld [vmem:[%s5219_s2 + $0x3d0] sm:$0xff] }
  0x5b   : > { %700 = vmatpush2.msra.mxu0 %v3204_v1  ;;  %771 = vmatpush2.msra.mxu1 %v3211_v58  ;;  %5623 = vst [vmem:[#allocation96_spill] sm:$0xff] %v3228_v63  ;;  %5624 = vst [vmem:[#allocation97_spill] sm:$0xff] %v3233_v61  ;;  %v3245_v58 = vld [vmem:[%s5219_s2 + $0x3b8] sm:$0xff]  ;;  %v3250_v1 = vld [vmem:[%s5219_s2 + $0x3a0] sm:$0xff] }
  0x5c   : > { %701 = vmatprep.subr.mxu0 %v3216_v59  ;;  %772 = vmatprep.subr.mxu1 %v3221_v0  ;;  %5626 = vst [vmem:[#allocation99_spill] sm:$0xff] %v3245_v58  ;;  %5627 = vst [vmem:[#allocation100_spill] sm:$0xff] %v3250_v1  ;;  %v3262_v0 = vld [vmem:[%s5219_s2 + $0x388] sm:$0xff]  ;;  %v3267_v59 = vld [vmem:[%s5219_s2 + $0x398] sm:$0xff] }
  0x5d   : > { %702 = vmatpush2.msra.mxu0 %v3228_v63  ;;  %773 = vmatpush2.msra.mxu1 %v3233_v61  ;;  %5629 = vst [vmem:[#allocation102_spill] sm:$0xff] %v3262_v0  ;;  %5630 = vst [vmem:[#allocation103_spill] sm:$0xff] %v3267_v59  ;;  %v3274_v63 = vld [vmem:[%s5219_s2 + $0x380] sm:$0xff]  ;;  %v3279_v61 = vld [vmem:[%s5219_s2 + $0x390] sm:$0xff] }
  0x5e   : > { %703 = vmatprep.subr.mxu0 %v3238_v62  ;;  %774 = vmatprep.subr.mxu1 %v3245_v58  ;;  %5631 = vst [vmem:[#allocation104_spill] sm:$0xff] %v3274_v63  ;;  %5632 = vst [vmem:[#allocation105_spill] sm:$0xff] %v3279_v61  ;;  %v3286_v62 = vld [vmem:[%s5219_s2 + $0x368] sm:$0xff]  ;;  %v3291_v58 = vld [vmem:[%s5219_s2 + $0x378] sm:$0xff] }
  0x5f   : > { %704 = vmatpush2.msra.mxu0 %v3250_v1  ;;  %775 = vmatpush2.msra.mxu1 %v3255_v60  ;;  %5633 = vst [vmem:[#allocation106_spill] sm:$0xff] %v3286_v62  ;;  %5634 = vst [vmem:[#allocation107_spill] sm:$0xff] %v3291_v58  ;;  %v3298_v1 = vld [vmem:[%s5219_s2 + $0x360] sm:$0xff]  ;;  %v3303_v60 = vld [vmem:[%s5219_s2 + $0x370] sm:$0xff] }
  0x60   : > { %705 = vmatprep.subr.mxu0 %v3262_v0  ;;  %776 = vmatprep.subr.mxu1 %v3267_v59  ;;  %5635 = vst [vmem:[#allocation108_spill] sm:$0xff] %v3298_v1  ;;  %5636 = vst [vmem:[#allocation109_spill] sm:$0xff] %v3303_v60  ;;  %v3310_v0 = vld [vmem:[%s5219_s2 + $0x348] sm:$0xff]  ;;  %v3315_v59 = vld [vmem:[%s5219_s2 + $0x358] sm:$0xff] }
  0x61   : > { %706 = vmatpush2.msra.mxu0 %v3274_v63  ;;  %777 = vmatpush2.msra.mxu1 %v3279_v61  ;;  %5637 = vst [vmem:[#allocation110_spill] sm:$0xff] %v3310_v0  ;;  %5638 = vst [vmem:[#allocation111_spill] sm:$0xff] %v3315_v59  ;;  %v3322_v63 = vld [vmem:[%s5219_s2 + $0x340] sm:$0xff]  ;;  %v3327_v61 = vld [vmem:[%s5219_s2 + $0x350] sm:$0xff] }
  0x62   : > { %707 = vmatprep.subr.mxu0 %v3286_v62  ;;  %778 = vmatprep.subr.mxu1 %v3291_v58  ;;  %5639 = vst [vmem:[#allocation112_spill] sm:$0xff] %v3322_v63  ;;  %5640 = vst [vmem:[#allocation113_spill] sm:$0xff] %v3327_v61  ;;  %v3334_v62 = vld [vmem:[%s5219_s2 + $0x328] sm:$0xff]  ;;  %v3339_v58 = vld [vmem:[%s5219_s2 + $0x338] sm:$0xff] }
  0x63   : > { %708 = vmatpush2.msra.mxu0 %v3298_v1  ;;  %779 = vmatpush2.msra.mxu1 %v3303_v60  ;;  %5641 = vst [vmem:[#allocation114_spill] sm:$0xff] %v3334_v62  ;;  %5642 = vst [vmem:[#allocation115_spill] sm:$0xff] %v3339_v58  ;;  %v3346_v1 = vld [vmem:[%s5219_s2 + $0x320] sm:$0xff]  ;;  %v3351_v60 = vld [vmem:[%s5219_s2 + $0x330] sm:$0xff] }
  0x64   : > { %709 = vmatprep.subr.mxu0 %v3310_v0  ;;  %780 = vmatprep.subr.mxu1 %v3315_v59  ;;  %5643 = vst [vmem:[#allocation116_spill] sm:$0xff] %v3346_v1  ;;  %5644 = vst [vmem:[#allocation117_spill] sm:$0xff] %v3351_v60  ;;  %v3358_v0 = vld [vmem:[%s5219_s2 + $0x308] sm:$0xff]  ;;  %v3363_v59 = vld [vmem:[%s5219_s2 + $0x318] sm:$0xff] }
  0x65   : > { %710 = vmatpush2.msra.mxu0 %v3322_v63  ;;  %781 = vmatpush2.msra.mxu1 %v3327_v61  ;;  %5645 = vst [vmem:[#allocation118_spill] sm:$0xff] %v3358_v0  ;;  %5646 = vst [vmem:[#allocation119_spill] sm:$0xff] %v3363_v59  ;;  %v3370_v63 = vld [vmem:[%s5219_s2 + $0x300] sm:$0xff]  ;;  %v3375_v61 = vld [vmem:[%s5219_s2 + $0x310] sm:$0xff] }
  0x66   : > { %711 = vmatprep.subr.mxu0 %v3334_v62  ;;  %782 = vmatprep.subr.mxu1 %v3339_v58  ;;  %5647 = vst [vmem:[#allocation120_spill] sm:$0xff] %v3370_v63  ;;  %5648 = vst [vmem:[#allocation121_spill] sm:$0xff] %v3375_v61  ;;  %v3382_v62 = vld [vmem:[%s5219_s2 + $0x2e8] sm:$0xff]  ;;  %v3387_v58 = vld [vmem:[%s5219_s2 + $0x2f8] sm:$0xff] }
  0x67   : > { %712 = vmatpush2.msra.mxu0 %v3346_v1  ;;  %783 = vmatpush2.msra.mxu1 %v3351_v60  ;;  %5649 = vst [vmem:[#allocation122_spill] sm:$0xff] %v3382_v62  ;;  %5650 = vst [vmem:[#allocation123_spill] sm:$0xff] %v3387_v58  ;;  %v3394_v1 = vld [vmem:[%s5219_s2 + $0x2e0] sm:$0xff]  ;;  %v3399_v60 = vld [vmem:[%s5219_s2 + $0x2f0] sm:$0xff] }
  0x68   : > { %713 = vmatprep.subr.mxu0 %v3358_v0  ;;  %784 = vmatprep.subr.mxu1 %v3363_v59  ;;  %5651 = vst [vmem:[#allocation124_spill] sm:$0xff] %v3394_v1  ;;  %5652 = vst [vmem:[#allocation125_spill] sm:$0xff] %v3399_v60  ;;  %v3406_v0 = vld [vmem:[%s5219_s2 + $0x2c8] sm:$0xff]  ;;  %v3411_v59 = vld [vmem:[%s5219_s2 + $0x2d8] sm:$0xff] }
  0x69   : > { %714 = vmatpush2.msra.mxu0 %v3370_v63  ;;  %785 = vmatpush2.msra.mxu1 %v3375_v61  ;;  %5653 = vst [vmem:[#allocation126_spill] sm:$0xff] %v3406_v0  ;;  %5654 = vst [vmem:[#allocation127_spill] sm:$0xff] %v3411_v59  ;;  %v3418_v63 = vld [vmem:[%s5219_s2 + $0x2c0] sm:$0xff]  ;;  %v3423_v61 = vld [vmem:[%s5219_s2 + $0x2d0] sm:$0xff] }
  0x6a   : > { %715 = vmatprep.subr.mxu0 %v3382_v62  ;;  %786 = vmatprep.subr.mxu1 %v3387_v58  ;;  %5655 = vst [vmem:[#allocation128_spill] sm:$0xff] %v3418_v63  ;;  %5656 = vst [vmem:[#allocation129_spill] sm:$0xff] %v3423_v61  ;;  %v3430_v62 = vld [vmem:[%s5219_s2 + $0x2a8] sm:$0xff]  ;;  %v3435_v58 = vld [vmem:[%s5219_s2 + $0x2b8] sm:$0xff] }
  0x6b   : > { %716 = vmatpush2.msra.mxu0 %v3394_v1  ;;  %787 = vmatpush2.msra.mxu1 %v3399_v60  ;;  %5657 = vst [vmem:[#allocation130_spill] sm:$0xff] %v3430_v62  ;;  %5658 = vst [vmem:[#allocation131_spill] sm:$0xff] %v3435_v58  ;;  %v3442_v1 = vld [vmem:[%s5219_s2 + $0x2a0] sm:$0xff]  ;;  %v3447_v60 = vld [vmem:[%s5219_s2 + $0x2b0] sm:$0xff] }
  0x6c   : > { %717 = vmatprep.subr.mxu0 %v3406_v0  ;;  %788 = vmatprep.subr.mxu1 %v3411_v59  ;;  %5659 = vst [vmem:[#allocation132_spill] sm:$0xff] %v3442_v1  ;;  %5660 = vst [vmem:[#allocation133_spill] sm:$0xff] %v3447_v60  ;;  %v3454_v0 = vld [vmem:[%s5219_s2 + $0x288] sm:$0xff]  ;;  %v3459_v59 = vld [vmem:[%s5219_s2 + $0x298] sm:$0xff] }
  0x6d   : > { %718 = vmatpush2.msra.mxu0 %v3418_v63  ;;  %789 = vmatpush2.msra.mxu1 %v3423_v61  ;;  %5661 = vst [vmem:[#allocation134_spill] sm:$0xff] %v3454_v0  ;;  %5662 = vst [vmem:[#allocation135_spill] sm:$0xff] %v3459_v59  ;;  %v3466_v63 = vld [vmem:[%s5219_s2 + $0x280] sm:$0xff]  ;;  %v3471_v61 = vld [vmem:[%s5219_s2 + $0x290] sm:$0xff] }
  0x6e   : > { %719 = vmatprep.subr.mxu0 %v3430_v62  ;;  %790 = vmatprep.subr.mxu1 %v3435_v58  ;;  %5663 = vst [vmem:[#allocation136_spill] sm:$0xff] %v3466_v63  ;;  %5664 = vst [vmem:[#allocation137_spill] sm:$0xff] %v3471_v61  ;;  %v3478_v62 = vld [vmem:[%s5219_s2 + $0x268] sm:$0xff]  ;;  %v3483_v58 = vld [vmem:[%s5219_s2 + $0x278] sm:$0xff] }
  0x6f   : > { %720 = vmatpush2.msra.mxu0 %v3442_v1  ;;  %791 = vmatpush2.msra.mxu1 %v3447_v60  ;;  %5665 = vst [vmem:[#allocation138_spill] sm:$0xff] %v3478_v62  ;;  %5666 = vst [vmem:[#allocation139_spill] sm:$0xff] %v3483_v58  ;;  %v3490_v1 = vld [vmem:[%s5219_s2 + $0x260] sm:$0xff]  ;;  %v3495_v60 = vld [vmem:[%s5219_s2 + $0x270] sm:$0xff] }
  0x70   : > { %721 = vmatprep.subr.mxu0 %v3454_v0  ;;  %792 = vmatprep.subr.mxu1 %v3459_v59  ;;  %5667 = vst [vmem:[#allocation140_spill] sm:$0xff] %v3490_v1  ;;  %5668 = vst [vmem:[#allocation141_spill] sm:$0xff] %v3495_v60  ;;  %v3502_v0 = vld [vmem:[%s5219_s2 + $0x248] sm:$0xff]  ;;  %v3507_v59 = vld [vmem:[%s5219_s2 + $0x258] sm:$0xff] }
  0x71   : > { %722 = vmatpush2.msra.mxu0 %v3466_v63  ;;  %793 = vmatpush2.msra.mxu1 %v3471_v61  ;;  %5669 = vst [vmem:[#allocation142_spill] sm:$0xff] %v3502_v0  ;;  %5670 = vst [vmem:[#allocation143_spill] sm:$0xff] %v3507_v59  ;;  %v3514_v63 = vld [vmem:[%s5219_s2 + $0x240] sm:$0xff]  ;;  %v3519_v61 = vld [vmem:[%s5219_s2 + $0x250] sm:$0xff] }
  0x72   : > { %723 = vmatprep.subr.mxu0 %v3478_v62  ;;  %794 = vmatprep.subr.mxu1 %v3483_v58  ;;  %5671 = vst [vmem:[#allocation144_spill] sm:$0xff] %v3514_v63  ;;  %5672 = vst [vmem:[#allocation145_spill] sm:$0xff] %v3519_v61  ;;  %v3526_v62 = vld [vmem:[%s5219_s2 + $0x228] sm:$0xff]  ;;  %v3531_v58 = vld [vmem:[%s5219_s2 + $0x238] sm:$0xff] }
  0x73   : > { %724 = vmatpush2.msra.mxu0 %v3490_v1  ;;  %795 = vmatpush2.msra.mxu1 %v3495_v60  ;;  %5673 = vst [vmem:[#allocation146_spill] sm:$0xff] %v3526_v62  ;;  %5674 = vst [vmem:[#allocation147_spill] sm:$0xff] %v3531_v58  ;;  %v3538_v1 = vld [vmem:[%s5219_s2 + $0x220] sm:$0xff]  ;;  %v3543_v60 = vld [vmem:[%s5219_s2 + $0x230] sm:$0xff] }
  0x74   : > { %725 = vmatprep.subr.mxu0 %v3502_v0  ;;  %796 = vmatprep.subr.mxu1 %v3507_v59  ;;  %5675 = vst [vmem:[#allocation148_spill] sm:$0xff] %v3538_v1  ;;  %5676 = vst [vmem:[#allocation149_spill] sm:$0xff] %v3543_v60  ;;  %v3550_v0 = vld [vmem:[%s5219_s2 + $0x208] sm:$0xff]  ;;  %v3555_v59 = vld [vmem:[%s5219_s2 + $0x218] sm:$0xff] }
  0x75   : > { %726 = vmatpush2.msra.mxu0 %v3514_v63  ;;  %797 = vmatpush2.msra.mxu1 %v3519_v61  ;;  %5677 = vst [vmem:[#allocation150_spill] sm:$0xff] %v3550_v0  ;;  %5678 = vst [vmem:[#allocation151_spill] sm:$0xff] %v3555_v59  ;;  %v3562_v63 = vld [vmem:[%s5219_s2 + $0x200] sm:$0xff]  ;;  %v3567_v61 = vld [vmem:[%s5219_s2 + $0x210] sm:$0xff] }
  0x76   : > { %727 = vmatprep.subr.mxu0 %v3526_v62  ;;  %798 = vmatprep.subr.mxu1 %v3531_v58  ;;  %5679 = vst [vmem:[#allocation152_spill] sm:$0xff] %v3562_v63  ;;  %5680 = vst [vmem:[#allocation153_spill] sm:$0xff] %v3567_v61  ;;  %v446_v58 = vlaneseq }
  0x77   : > { %728 = vmatpush2.msra.mxu0 %v3538_v1  ;;  %799 = vmatpush2.msra.mxu1 %v3543_v60  ;;  %v2365_v1 = vmov 1983009808  }
  0x78   : > { %729 = vmatprep.subr.mxu0 %v3550_v0  ;;  %800 = vmatprep.subr.mxu1 %v3555_v59  ;;  %v620_v62 = vunpack.c.l.s4 %v2365_v1  ;;  %v3577_v60 = vshrl.u32 %v446_v58, 7 }
  0x79   : > { %730 = vmatpush2.msra.mxu0 %v3562_v63  ;;  %801 = vmatpush2.msra.mxu1 %v3567_v61 }
  0x7a   : > { %731 = vmatprep.mubr.f32.mxu0 %v468_v57  ;;  %802 = vmatprep.mubr.f32.mxu1 %v468_v57  ;;  %5681 = vst [vmem:[#allocation154_spill] sm:$0xff] %v3577_v60  ;;  %v621_v56 = vunpack.c.0.s8 %v620_v62 }
  0x7b   : > { %835 = vmatprep.subr.mxu0 %v2424_v2  ;;  %906 = vmatprep.subr.mxu1 %v2429_v3  ;;  %v470_v3 = vld [vmem:[%s2418_s28] sm:$0xff] }
  0x7c   : > { %v3580_v59 = vsub.s32 %v621_v56, %v3577_v60 }
  0xf9   : > { %v537_v0 = vpop.f32.mrf.mxu0  ;;  %v608_v55 = vpop.f32.mrf.mxu1 }
  0xfb   : > { %v539_v63 = vpop.f32.mrf.mxu0  ;;  %v610_v61 = vpop.f32.mrf.mxu1 }
  0xfc   : > { %v617_v54 = vcombine.low %v537_v0, %v539_v63  ;;  %v618_v57 = vcombine.low %v608_v55, %v610_v61 }
  0xfe   : > { %v625_v2 = vrot.slane %v617_v54, %v3580_v59  ;;  %v632_v53 = vrot.slane %v618_v57, %v3580_v59 }
 0x100   : > { %v633_v52 = vcombine.low %v625_v2, %v632_v53  ;;  %v467_v53 = vld [vmem:[#allocation3] sm:$0x3] }
 0x102   : > { %v635_v51 = vadd.f32 %v633_v52, %v470_v3 }
 0x104   : > { %v1991_v1 = vmul.f32 -1.442695, %v635_v51  ;;  %v643_v58 = vrot.slane %v635_v51, 2  ;;  %v654_v50 = vrot.slane %v635_v51, 6  ;;  %v651_v60 = vrot.slane %v635_v51, 4 }
 0x106   : > { %2035 = vpow2.f32 %v1991_v1  ;;  %v1992_v62 = vmul.f32 -1.442695, %v643_v58  ;;  %v1993_v49 = vmul.f32 -1.442695, %v654_v50  ;;  %v5728_v1 = vld [vmem:[#allocation52_spill] sm:$0xff]  ;;  %v5729_v58 = vld [vmem:[#allocation53_spill] sm:$0xff] }
 0x108   : > { %2037 = vpow2.f32 %v1992_v62  ;;  %v5730_v62 = vld [vmem:[#allocation54_spill] sm:$0xff] }
 0x109   : > { %2039 = vpow2.f32 %v1993_v49 }
 0x113   : > { %v2036_v56 = vpop.eup %2035 }
 0x114   : > { %v639_v48 = vadd.f32 1.0, %v2036_v56  ;;  %v5731_v56 = vld [vmem:[#allocation55_spill] sm:$0xff] }
 0x115   : > { %v2038_v47 = vpop.eup %2037 }
 0x116   : > { %2041 = vrcp.f32 %v639_v48  ;;  %v648_v55 = vadd.f32 1.0, %v2038_v47  ;;  %v2040_v54 = vpop.eup %2039  ;;  %v5725_v47 = vld [vmem:[#allocation49_spill] sm:$0xff]  ;;  %v5726_v48 = vld [vmem:[#allocation50_spill] sm:$0xff] }
 0x117   : > { %2043 = vtanh.f32 %v651_v60  ;;  %v659_v0 = vadd.f32 1.0, %v2040_v54  ;;  %v5727_v60 = vld [vmem:[#allocation51_spill] sm:$0xff]  ;;  %v5733_v54 = vld [vmem:[#allocation57_spill] sm:$0xff] }
 0x118   : > { %2045 = vrcp.f32 %v648_v55  ;;  %v5732_v55 = vld [vmem:[#allocation56_spill] sm:$0xff] }
 0x119   : > { %2047 = vrcp.f32 %v659_v0  ;;  %v5738_v0 = vld [vmem:[#allocation62_spill] sm:$0xff] }
 0x123   : > { %v2042_v61 = vpop.eup %2041 }
 0x124   : > { %v2044_v52 = vpop.eup %2043 }
 0x125   : > { %v2046_v63 = vpop.eup %2045  ;;  %v663_v2 = vmul.f32 %v2044_v52, %v2042_v61  ;;  %v5734_v61 = vld [vmem:[#allocation58_spill] sm:$0xff]  ;;  %v5736_v52 = vld [vmem:[#allocation60_spill] sm:$0xff] }
 0x126   : > { %v662_v57 = vmul.f32 %v2046_v63, %v467_v53  ;;  %v2048_v50 = vpop.eup %2047  ;;  %v5735_v53 = vld [vmem:[#allocation59_spill] sm:$0xff]  ;;  %v5737_v63 = vld [vmem:[#allocation61_spill] sm:$0xff] }
 0x128   : > { %v3585_v3 = vadd.f32 %v663_v2, %v662_v57  ;;  %v5739_v57 = vld [vmem:[#allocation63_spill] sm:$0xff]  ;;  %v5740_v2 = vld [vmem:[#allocation64_spill] sm:$0xff] }
 0x12a   : > { %2049 = vtanh.f32 %v3585_v3 }
 0x137   : > { %v2050_v51 = vpop.eup %2049 }
 0x138   : > { %v3588_v49 = vmul.f32 %v2050_v51, %v2048_v50  ;;  %v5741_v50 = vld [vmem:[#allocation65_spill] sm:$0xff]  ;;  %v5742_v51 = vld [vmem:[#allocation66_spill] sm:$0xff] }
 0x13a   : > { %732 = vmatmul.mubr.f32.vlgmr.msra.gmra.mxu0 %v3588_v49  ;;  %803 = vmatmul.mubr.f32.vlgmr.msra.gmra.mxu1 %v3588_v49 }
 0x13b   : > { %836 = vmatpush1.msra.mxu0 %v2434_v4  ;;  %907 = vmatpush1.msra.mxu1 %v2441_v5  ;;  %v5682_v4 = vld [vmem:[#allocation7_spill] sm:$0xff]  ;;  %v5683_v5 = vld [vmem:[#allocation8_spill] sm:$0xff] }
 0x13c   : > { %837 = vmatprep.subr.mxu0 %v2446_v6  ;;  %908 = vmatprep.subr.mxu1 %v2451_v7  ;;  %v5684_v6 = vld [vmem:[#allocation9_spill] sm:$0xff]  ;;  %v5685_v7 = vld [vmem:[#allocation10_spill] sm:$0xff] }
 0x13d   : > { %838 = vmatpush1.msra.mxu0 %v2458_v8  ;;  %909 = vmatpush1.msra.mxu1 %v2463_v9  ;;  %v5686_v8 = vld [vmem:[#allocation11_spill] sm:$0xff]  ;;  %v5687_v9 = vld [vmem:[#allocation12_spill] sm:$0xff] }
 0x13e   : > { %839 = vmatprep.subr.mxu0 %v2468_v10  ;;  %910 = vmatprep.subr.mxu1 %v2475_v11  ;;  %v5688_v10 = vld [vmem:[#allocation13_spill] sm:$0xff]  ;;  %v5689_v11 = vld [vmem:[#allocation14_spill] sm:$0xff] }
 0x13f   : > { %840 = vmatpush1.msra.mxu0 %v2480_v12  ;;  %911 = vmatpush1.msra.mxu1 %v2485_v13  ;;  %v5690_v12 = vld [vmem:[#allocation15_spill] sm:$0xff]  ;;  %v5691_v13 = vld [vmem:[#allocation16_spill] sm:$0xff] }
 0x140   : > { %841 = vmatprep.subr.mxu0 %v2492_v14  ;;  %912 = vmatprep.subr.mxu1 %v2497_v15  ;;  %v5692_v14 = vld [vmem:[#allocation17_spill] sm:$0xff]  ;;  %v5693_v15 = vld [vmem:[#allocation18_spill] sm:$0xff] }
 0x141   : > { %842 = vmatpush1.msra.mxu0 %v2504_v16  ;;  %913 = vmatpush1.msra.mxu1 %v2509_v17  ;;  %v5694_v16 = vld [vmem:[#allocation19_spill] sm:$0xff]  ;;  %v5695_v17 = vld [vmem:[#allocation20_spill] sm:$0xff] }
 0x142   : > { %843 = vmatprep.subr.mxu0 %v2516_v18  ;;  %914 = vmatprep.subr.mxu1 %v2521_v19  ;;  %v5696_v18 = vld [vmem:[#allocation21_spill] sm:$0xff]  ;;  %v5697_v19 = vld [vmem:[#allocation22_spill] sm:$0xff] }
 0x143   : > { %844 = vmatpush1.msra.mxu0 %v2528_v20  ;;  %915 = vmatpush1.msra.mxu1 %v2533_v21  ;;  %v5698_v20 = vld [vmem:[#allocation23_spill] sm:$0xff]  ;;  %v5699_v21 = vld [vmem:[#allocation24_spill] sm:$0xff] }
 0x144   : > { %845 = vmatprep.subr.mxu0 %v2540_v22  ;;  %916 = vmatprep.subr.mxu1 %v2545_v23  ;;  %v5700_v22 = vmov 0.0   ;;  %v5701_v23 = vld [vmem:[#allocation25_spill] sm:$0xff] }
 0x145   : > { %846 = vmatpush1.msra.mxu0 %v2552_v24  ;;  %917 = vmatpush1.msra.mxu1 %v2557_v25  ;;  %v5702_v24 = vld [vmem:[#allocation26_spill] sm:$0xff]  ;;  %v5703_v25 = vld [vmem:[#allocation27_spill] sm:$0xff] }
 0x146   : > { %847 = vmatprep.subr.mxu0 %v2564_v26  ;;  %918 = vmatprep.subr.mxu1 %v2569_v27  ;;  %v5704_v26 = vld [vmem:[#allocation28_spill] sm:$0xff]  ;;  %v5705_v27 = vld [vmem:[#allocation29_spill] sm:$0xff] }
 0x147   : > { %848 = vmatpush1.msra.mxu0 %v2576_v28  ;;  %919 = vmatpush1.msra.mxu1 %v2581_v29  ;;  %v5706_v28 = vld [vmem:[#allocation30_spill] sm:$0xff]  ;;  %v5707_v29 = vld [vmem:[#allocation31_spill] sm:$0xff] }
 0x148   : > { %849 = vmatprep.subr.mxu0 %v2588_v30  ;;  %920 = vmatprep.subr.mxu1 %v2593_v31  ;;  %v5708_v30 = vld [vmem:[#allocation32_spill] sm:$0xff]  ;;  %v5709_v31 = vld [vmem:[#allocation33_spill] sm:$0xff] }
 0x149   : > { %850 = vmatpush1.msra.mxu0 %v2600_v32  ;;  %921 = vmatpush1.msra.mxu1 %v2605_v33  ;;  %v5710_v32 = vld [vmem:[#allocation34_spill] sm:$0xff]  ;;  %v5711_v33 = vld [vmem:[#allocation35_spill] sm:$0xff] }
 0x14a   : > { %851 = vmatprep.subr.mxu0 %v2612_v34  ;;  %922 = vmatprep.subr.mxu1 %v2617_v35  ;;  %v5712_v34 = vld [vmem:[#allocation36_spill] sm:$0xff]  ;;  %v5713_v35 = vld [vmem:[#allocation37_spill] sm:$0xff] }
 0x14b   : > { %852 = vmatpush1.msra.mxu0 %v2624_v36  ;;  %923 = vmatpush1.msra.mxu1 %v2629_v37  ;;  %v5714_v36 = vld [vmem:[#allocation38_spill] sm:$0xff]  ;;  %v5715_v37 = vld [vmem:[#allocation39_spill] sm:$0xff] }
 0x14c   : > { %853 = vmatprep.subr.mxu0 %v2636_v38  ;;  %924 = vmatprep.subr.mxu1 %v2641_v39  ;;  %v5716_v38 = vld [vmem:[#allocation40_spill] sm:$0xff]  ;;  %v5717_v39 = vld [vmem:[#allocation41_spill] sm:$0xff] }
 0x14d   : > { %854 = vmatpush1.msra.mxu0 %v2648_v40  ;;  %925 = vmatpush1.msra.mxu1 %v2653_v41  ;;  %v5718_v40 = vld [vmem:[#allocation42_spill] sm:$0xff]  ;;  %v5719_v41 = vld [vmem:[#allocation43_spill] sm:$0xff] }
 0x14e   : > { %855 = vmatprep.subr.mxu0 %v2660_v42  ;;  %926 = vmatprep.subr.mxu1 %v2665_v43  ;;  %v5720_v42 = vld [vmem:[#allocation44_spill] sm:$0xff]  ;;  %v5721_v43 = vld [vmem:[#allocation45_spill] sm:$0xff] }
 0x14f   : > { %856 = vmatpush1.msra.mxu0 %v2672_v44  ;;  %927 = vmatpush1.msra.mxu1 %v2677_v45  ;;  %v5722_v44 = vld [vmem:[#allocation46_spill] sm:$0xff]  ;;  %v5723_v45 = vld [vmem:[#allocation47_spill] sm:$0xff] }
 0x150   : > { %857 = vmatprep.subr.mxu0 %v2684_v46  ;;  %928 = vmatprep.subr.mxu1 %v5682_v4  ;;  %v5724_v46 = vld [vmem:[#allocation48_spill] sm:$0xff] }
 0x151   : > { %858 = vmatpush1.msra.mxu0 %v5683_v5  ;;  %929 = vmatpush1.msra.mxu1 %v5684_v6  ;;  %v5744_v4 = vld [vmem:[#allocation68_spill] sm:$0xff]  ;;  %v5745_v5 = vld [vmem:[#allocation69_spill] sm:$0xff]  ;;  %v5746_v6 = vld [vmem:[#allocation70_spill] sm:$0xff] }
 0x152   : > { %859 = vmatprep.subr.mxu0 %v5685_v7  ;;  %930 = vmatprep.subr.mxu1 %v5686_v8  ;;  %v5747_v7 = vld [vmem:[#allocation71_spill] sm:$0xff]  ;;  %v5748_v8 = vld [vmem:[#allocation72_spill] sm:$0xff] }
 0x153   : > { %860 = vmatpush1.msra.mxu0 %v5687_v9  ;;  %931 = vmatpush1.msra.mxu1 %v5688_v10  ;;  %v5749_v9 = vld [vmem:[#allocation73_spill] sm:$0xff]  ;;  %v5750_v10 = vld [vmem:[#allocation74_spill] sm:$0xff] }
 0x154   : > { %861 = vmatprep.subr.mxu0 %v5689_v11  ;;  %932 = vmatprep.subr.mxu1 %v5690_v12  ;;  %v5751_v11 = vld [vmem:[#allocation75_spill] sm:$0xff]  ;;  %v5752_v12 = vld [vmem:[#allocation76_spill] sm:$0xff] }
 0x155   : > { %862 = vmatpush1.msra.mxu0 %v5691_v13  ;;  %933 = vmatpush1.msra.mxu1 %v5692_v14  ;;  %v5753_v13 = vld [vmem:[#allocation77_spill] sm:$0xff]  ;;  %v5754_v14 = vld [vmem:[#allocation78_spill] sm:$0xff] }
 0x156   : > { %863 = vmatprep.subr.mxu0 %v5693_v15  ;;  %934 = vmatprep.subr.mxu1 %v5694_v16  ;;  %v5755_v15 = vld [vmem:[#allocation79_spill] sm:$0xff]  ;;  %v5756_v16 = vld [vmem:[#allocation80_spill] sm:$0xff] }
 0x157   : > { %864 = vmatpush1.msra.mxu0 %v5695_v17  ;;  %935 = vmatpush1.msra.mxu1 %v5696_v18  ;;  %v5757_v17 = vld [vmem:[#allocation81_spill] sm:$0xff]  ;;  %v5758_v18 = vld [vmem:[#allocation82_spill] sm:$0xff] }
 0x158   : > { %865 = vmatprep.subr.mxu0 %v5697_v19  ;;  %936 = vmatprep.subr.mxu1 %v5698_v20  ;;  %v5759_v19 = vld [vmem:[#allocation83_spill] sm:$0xff]  ;;  %v5760_v20 = vld [vmem:[#allocation84_spill] sm:$0xff] }
 0x159   : > { %866 = vmatpush1.msra.mxu0 %v5699_v21  ;;  %899 = vmatprep.mubr.f32.mxu0 %v5700_v22  ;;  %v5761_v21 = vld [vmem:[#allocation85_spill] sm:$0xff] }
 0x15a   : > { %937 = vmatpush1.msra.mxu1 %v5701_v23  ;;  %970 = vmatprep.mubr.f32.mxu1 %v5700_v22  ;;  %v5762_v23 = vld [vmem:[#allocation86_spill] sm:$0xff] }
 0x15b   : > { %900 = vmatmul.mubr.f32.vlgmr.msra.gmra.mxu0 %v3588_v49  ;;  %971 = vmatmul.mubr.f32.vlgmr.msra.gmra.mxu1 %v3588_v49  ;;  %v5743_v49 = vld [vmem:[#allocation67_spill] sm:$0xff] }
 0x15c   : > { %1031 = vmatprep.subr.mxu0 %v5702_v24  ;;  %1102 = vmatprep.subr.mxu1 %v5703_v25  ;;  %v5763_v24 = vld [vmem:[#allocation87_spill] sm:$0xff]  ;;  %v5764_v25 = vld [vmem:[#allocation88_spill] sm:$0xff] }
 0x15d   : > { %1032 = vmatpush1.msra.mxu0 %v5704_v26  ;;  %1103 = vmatpush1.msra.mxu1 %v5705_v27  ;;  %v5765_v26 = vld [vmem:[#allocation89_spill] sm:$0xff]  ;;  %v5766_v27 = vld [vmem:[#allocation90_spill] sm:$0xff] }
 0x15e   : > { %1033 = vmatprep.subr.mxu0 %v5706_v28  ;;  %1104 = vmatprep.subr.mxu1 %v5707_v29  ;;  %v5767_v28 = vld [vmem:[#allocation91_spill] sm:$0xff]  ;;  %v5768_v29 = vld [vmem:[#allocation92_spill] sm:$0xff] }
 0x15f   : > { %1034 = vmatpush1.msra.mxu0 %v5708_v30  ;;  %1105 = vmatpush1.msra.mxu1 %v5709_v31  ;;  %v5769_v30 = vld [vmem:[#allocation93_spill] sm:$0xff]  ;;  %v5770_v31 = vld [vmem:[#allocation94_spill] sm:$0xff] }
 0x160   : > { %1035 = vmatprep.subr.mxu0 %v5710_v32  ;;  %1106 = vmatprep.subr.mxu1 %v5711_v33  ;;  %v5771_v32 = vld [vmem:[#allocation95_spill] sm:$0xff]  ;;  %v5772_v33 = vld [vmem:[#allocation96_spill] sm:$0xff] }
 0x161   : > { %1036 = vmatpush1.msra.mxu0 %v5712_v34  ;;  %1107 = vmatpush1.msra.mxu1 %v5713_v35  ;;  %v5773_v34 = vld [vmem:[#allocation97_spill] sm:$0xff]  ;;  %v5774_v35 = vld [vmem:[#allocation98_spill] sm:$0xff] }
 0x162   : > { %1037 = vmatprep.subr.mxu0 %v5714_v36  ;;  %1108 = vmatprep.subr.mxu1 %v5715_v37  ;;  %v5775_v36 = vld [vmem:[#allocation99_spill] sm:$0xff]  ;;  %v5776_v37 = vld [vmem:[#allocation100_spill] sm:$0xff] }
 0x163   : > { %1038 = vmatpush1.msra.mxu0 %v5716_v38  ;;  %1109 = vmatpush1.msra.mxu1 %v5717_v39  ;;  %v5777_v38 = vld [vmem:[#allocation101_spill] sm:$0xff]  ;;  %v5778_v39 = vld [vmem:[#allocation102_spill] sm:$0xff] }
 0x164   : > { %1039 = vmatprep.subr.mxu0 %v5718_v40  ;;  %1110 = vmatprep.subr.mxu1 %v5719_v41  ;;  %v5779_v40 = vld [vmem:[#allocation103_spill] sm:$0xff]  ;;  %v5780_v41 = vld [vmem:[#allocation104_spill] sm:$0xff] }
 0x165   : > { %1040 = vmatpush1.msra.mxu0 %v5720_v42  ;;  %1111 = vmatpush1.msra.mxu1 %v5721_v43  ;;  %v5781_v42 = vld [vmem:[#allocation105_spill] sm:$0xff]  ;;  %v5782_v43 = vld [vmem:[#allocation106_spill] sm:$0xff] }
 0x166   : > { %1041 = vmatprep.subr.mxu0 %v5722_v44  ;;  %1112 = vmatprep.subr.mxu1 %v5723_v45  ;;  %v5783_v44 = vld [vmem:[#allocation107_spill] sm:$0xff]  ;;  %v5784_v45 = vld [vmem:[#allocation108_spill] sm:$0xff] }
 0x167   : > { %1042 = vmatpush1.msra.mxu0 %v5724_v46  ;;  %1113 = vmatpush1.msra.mxu1 %v5725_v47  ;;  %v5785_v46 = vld [vmem:[#allocation109_spill] sm:$0xff]  ;;  %v5786_v47 = vld [vmem:[#allocation110_spill] sm:$0xff] }
 0x168   : > { %1043 = vmatprep.subr.mxu0 %v5726_v48  ;;  %1114 = vmatprep.subr.mxu1 %v5727_v60  ;;  %v5787_v48 = vld [vmem:[#allocation111_spill] sm:$0xff]  ;;  %v5788_v60 = vld [vmem:[#allocation112_spill] sm:$0xff] }
 0x169   : > { %1044 = vmatpush1.msra.mxu0 %v5728_v1  ;;  %1115 = vmatpush1.msra.mxu1 %v5729_v58  ;;  %v5789_v1 = vld [vmem:[#allocation113_spill] sm:$0xff]  ;;  %v5790_v58 = vld [vmem:[#allocation114_spill] sm:$0xff] }
 0x16a   : > { %1045 = vmatprep.subr.mxu0 %v5730_v62  ;;  %1116 = vmatprep.subr.mxu1 %v5731_v56  ;;  %v5791_v62 = vld [vmem:[#allocation115_spill] sm:$0xff]  ;;  %v5792_v56 = vld [vmem:[#allocation116_spill] sm:$0xff] }
 0x16b   : > { %1046 = vmatpush1.msra.mxu0 %v5732_v55  ;;  %1117 = vmatpush1.msra.mxu1 %v5733_v54  ;;  %v5793_v55 = vld [vmem:[#allocation117_spill] sm:$0xff]  ;;  %v5794_v54 = vld [vmem:[#allocation118_spill] sm:$0xff] }
 0x16c   : > { %1047 = vmatprep.subr.mxu0 %v5734_v61  ;;  %1118 = vmatprep.subr.mxu1 %v5735_v53  ;;  %v5795_v61 = vld [vmem:[#allocation119_spill] sm:$0xff]  ;;  %v5796_v53 = vld [vmem:[#allocation120_spill] sm:$0xff] }
 0x16d   : > { %1048 = vmatpush1.msra.mxu0 %v5736_v52  ;;  %1119 = vmatpush1.msra.mxu1 %v5737_v63  ;;  %v5797_v52 = vld [vmem:[#allocation121_spill] sm:$0xff]  ;;  %v5798_v63 = vld [vmem:[#allocation122_spill] sm:$0xff] }
 0x16e   : > { %1049 = vmatprep.subr.mxu0 %v5738_v0  ;;  %1120 = vmatprep.subr.mxu1 %v5739_v57  ;;  %v5799_v0 = vld [vmem:[#allocation123_spill] sm:$0xff]  ;;  %v5800_v57 = vld [vmem:[#allocation124_spill] sm:$0xff] }
 0x16f   : > { %1050 = vmatpush1.msra.mxu0 %v5740_v2  ;;  %1121 = vmatpush1.msra.mxu1 %v5741_v50  ;;  %v5801_v2 = vld [vmem:[#allocation125_spill] sm:$0xff]  ;;  %v5802_v50 = vld [vmem:[#allocation126_spill] sm:$0xff] }
 0x170   : > { %1051 = vmatprep.subr.mxu0 %v5742_v51  ;;  %1122 = vmatprep.subr.mxu1 %v5743_v49  ;;  %v5803_v51 = vld [vmem:[#allocation127_spill] sm:$0xff]  ;;  %v5804_v49 = vld [vmem:[#allocation128_spill] sm:$0xff] }
 0x171   : > { %1052 = vmatpush1.msra.mxu0 %v5744_v4  ;;  %1123 = vmatpush1.msra.mxu1 %v5745_v5  ;;  %v5805_v4 = vld [vmem:[#allocation129_spill] sm:$0xff]  ;;  %v5806_v5 = vld [vmem:[#allocation130_spill] sm:$0xff] }
 0x172   : > { %1053 = vmatprep.subr.mxu0 %v5746_v6  ;;  %1124 = vmatprep.subr.mxu1 %v5747_v7  ;;  %v5807_v6 = vld [vmem:[#allocation131_spill] sm:$0xff]  ;;  %v5808_v7 = vld [vmem:[#allocation132_spill] sm:$0xff] }
 0x173   : > { %1054 = vmatpush1.msra.mxu0 %v5748_v8  ;;  %1125 = vmatpush1.msra.mxu1 %v5749_v9  ;;  %v5809_v8 = vld [vmem:[#allocation133_spill] sm:$0xff]  ;;  %v5810_v9 = vld [vmem:[#allocation134_spill] sm:$0xff] }
 0x174   : > { %1055 = vmatprep.subr.mxu0 %v5750_v10  ;;  %1126 = vmatprep.subr.mxu1 %v5751_v11  ;;  %v5811_v10 = vld [vmem:[#allocation135_spill] sm:$0xff]  ;;  %v5812_v11 = vld [vmem:[#allocation136_spill] sm:$0xff] }
 0x175   : > { %1056 = vmatpush1.msra.mxu0 %v5752_v12  ;;  %1127 = vmatpush1.msra.mxu1 %v5753_v13  ;;  %v5813_v12 = vld [vmem:[#allocation137_spill] sm:$0xff]  ;;  %v5814_v13 = vld [vmem:[#allocation138_spill] sm:$0xff] }
 0x176   : > { %1057 = vmatprep.subr.mxu0 %v5754_v14  ;;  %1128 = vmatprep.subr.mxu1 %v5755_v15  ;;  %v5815_v14 = vld [vmem:[#allocation139_spill] sm:$0xff]  ;;  %v5816_v15 = vld [vmem:[#allocation140_spill] sm:$0xff] }
 0x177   : > { %1058 = vmatpush1.msra.mxu0 %v5756_v16  ;;  %1129 = vmatpush1.msra.mxu1 %v5757_v17  ;;  %v5817_v16 = vld [vmem:[#allocation141_spill] sm:$0xff]  ;;  %v5818_v17 = vld [vmem:[#allocation142_spill] sm:$0xff] }
 0x178   : > { %1059 = vmatprep.subr.mxu0 %v5758_v18  ;;  %1130 = vmatprep.subr.mxu1 %v5759_v19  ;;  %v5819_v18 = vld [vmem:[#allocation143_spill] sm:$0xff]  ;;  %v5820_v19 = vld [vmem:[#allocation144_spill] sm:$0xff] }
 0x179   : > { %1060 = vmatpush1.msra.mxu0 %v5760_v20  ;;  %1131 = vmatpush1.msra.mxu1 %v5761_v21  ;;  %v5821_v20 = vld [vmem:[#allocation145_spill] sm:$0xff]  ;;  %v5822_v21 = vld [vmem:[#allocation146_spill] sm:$0xff] }
 0x17a   : > { %1061 = vmatprep.subr.mxu0 %v5762_v23  ;;  %1132 = vmatprep.subr.mxu1 %v5763_v24  ;;  %v5823_v23 = vld [vmem:[#allocation147_spill] sm:$0xff]  ;;  %v5824_v24 = vld [vmem:[#allocation148_spill] sm:$0xff] }
 0x17b   : > { %1062 = vmatpush1.msra.mxu0 %v5764_v25  ;;  %1133 = vmatpush1.msra.mxu1 %v5765_v26  ;;  %v5825_v25 = vld [vmem:[#allocation149_spill] sm:$0xff]  ;;  %v5826_v26 = vld [vmem:[#allocation150_spill] sm:$0xff] }
 0x17c   : > { %1063 = vmatprep.subr.mxu0 %v5766_v27  ;;  %1134 = vmatprep.subr.mxu1 %v5767_v28  ;;  %v5827_v27 = vld [vmem:[#allocation151_spill] sm:$0xff]  ;;  %v5828_v28 = vld [vmem:[#allocation152_spill] sm:$0xff] }
 0x17d   : > { %1064 = vmatpush2.msra.mxu0 %v5768_v29  ;;  %1135 = vmatpush2.msra.mxu1 %v5769_v30  ;;  %v5829_v29 = vld [vmem:[#allocation153_spill] sm:$0xff]  ;;  %v3789_v30 = vld [vmem:[%s5218_s1 + $0x1e8] sm:$0xff] }
 0x17e   : > { %1065 = vmatprep.subr.mxu0 %v5770_v31  ;;  %1136 = vmatprep.subr.mxu1 %v5771_v32  ;;  %v3795_v31 = vld [vmem:[%s5218_s1 + $0x1f8] sm:$0xff]  ;;  %v5830_v32 = vld [vmem:[#allocation154_spill] sm:$0xff] }
 0x17f   : > { %1066 = vmatpush2.msra.mxu0 %v5772_v33  ;;  %1137 = vmatpush2.msra.mxu1 %v5773_v34  ;;  %v448_v33 = vsub.s32 0, %v5830_v32  ;;  %v444_v34 = vld [vmem:[%s5220_s3] sm:$0xf] }
 0x180   : > { %1067 = vmatprep.subr.mxu0 %v5774_v35  ;;  %1138 = vmatprep.subr.mxu1 %v5775_v36  ;;  %v452_v35 = vsub.s32 1, %v5830_v32 }
 0x181   : > { %1068 = vmatpush2.msra.mxu0 %v5776_v37  ;;  %1139 = vmatpush2.msra.mxu1 %v5777_v38  ;;  %v3803_v36 = vrot.slane %v444_v34, %v448_v33 }
 0x182   : > { %1069 = vmatprep.subr.mxu0 %v5778_v39  ;;  %1140 = vmatprep.subr.mxu1 %v5779_v40  ;;  %v3805_v37 = vrot.slane %v444_v34, %v452_v35 }
 0x183   : > { %1070 = vmatpush2.msra.mxu0 %v5780_v41  ;;  %1141 = vmatpush2.msra.mxu1 %v5781_v42  ;;  %5831 = vst [vmem:[#allocation7_spill] sm:$0xff] %v3803_v36 }
 0x184   : > { %1071 = vmatprep.subr.mxu0 %v5782_v43  ;;  %1142 = vmatprep.subr.mxu1 %v5783_v44  ;;  %5832 = vst [vmem:[#allocation8_spill] sm:$0xff] %v3805_v37  ;;  %v460_v43 = vsub.s32 3, %v5830_v32 }
 0x185   : > { %1072 = vmatpush2.msra.mxu0 %v5784_v45  ;;  %1143 = vmatpush2.msra.mxu1 %v5785_v46 }
 0x186   : > { %1073 = vmatprep.subr.mxu0 %v5786_v47  ;;  %1144 = vmatprep.subr.mxu1 %v5787_v48  ;;  %v3810_v46 = vrot.slane %v444_v34, %v460_v43  ;;  %v456_v48 = vsub.s32 2, %v5830_v32 }
 0x187   : > { %1074 = vmatpush2.msra.mxu0 %v5788_v60  ;;  %1145 = vmatpush2.msra.mxu1 %v5789_v1 }
 0x188   : > { %1075 = vmatprep.subr.mxu0 %v5790_v58  ;;  %1146 = vmatprep.subr.mxu1 %v5791_v62  ;;  %5833 = vst [vmem:[#allocation9_spill] sm:$0xff] %v3810_v46  ;;  %v3814_v1 = vrot.slane %v444_v34, %v456_v48  ;;  %v3858_v48 = vld [vmem:[%s5218_s1 + $0x1c0] sm:$0xff] }
 0x189   : > { %1076 = vmatpush2.msra.mxu0 %v5792_v56  ;;  %1147 = vmatpush2.msra.mxu1 %v5793_v55 }
 0x18a   : > { %1077 = vmatprep.subr.mxu0 %v5794_v54  ;;  %1148 = vmatprep.subr.mxu1 %v5795_v61  ;;  %5834 = vst [vmem:[#allocation10_spill] sm:$0xff] %v3814_v1 }
 0x18b   : > { %1078 = vmatpush2.msra.mxu0 %v5796_v53  ;;  %1149 = vmatpush2.msra.mxu1 %v5797_v52 }
 0x18c   : > { %1079 = vmatprep.subr.mxu0 %v5798_v63  ;;  %1150 = vmatprep.subr.mxu1 %v5799_v0 }
 0x18d   : > { %1080 = vmatpush2.msra.mxu0 %v5800_v57  ;;  %1151 = vmatpush2.msra.mxu1 %v5801_v2  ;;  %v469_v57 = vld [vmem:[#allocation5] sm:$0x3] }
 0x18e   : > { %1081 = vmatprep.subr.mxu0 %v5802_v50  ;;  %1152 = vmatprep.subr.mxu1 %v5803_v51 }
 0x18f   : > { %1082 = vmatpush2.msra.mxu0 %v5804_v49  ;;  %1153 = vmatpush2.msra.mxu1 %v5805_v4 }
 0x190   : > { %1083 = vmatprep.subr.mxu0 %v5806_v5  ;;  %1154 = vmatprep.subr.mxu1 %v5807_v6 }
 0x191   : > { %1084 = vmatpush2.msra.mxu0 %v5808_v7  ;;  %1155 = vmatpush2.msra.mxu1 %v5809_v8 }
 0x192   : > { %1085 = vmatprep.subr.mxu0 %v5810_v9  ;;  %1156 = vmatprep.subr.mxu1 %v5811_v10 }
 0x193   : > { %1086 = vmatpush2.msra.mxu0 %v5812_v11  ;;  %1157 = vmatpush2.msra.mxu1 %v5813_v12  ;;  %v1997_v11 = vld [vmem:[%s2418_s28 + $0x8] sm:$0xff] }
 0x194   : > { %1087 = vmatprep.subr.mxu0 %v5814_v13  ;;  %1158 = vmatprep.subr.mxu1 %v5815_v14 }
 0x195   : > { %1088 = vmatpush2.msra.mxu0 %v5816_v15  ;;  %1159 = vmatpush2.msra.mxu1 %v5817_v16 }
 0x196   : > { %1089 = vmatprep.subr.mxu0 %v5818_v17  ;;  %1160 = vmatprep.subr.mxu1 %v5819_v18 }
 0x197   : > { %1090 = vmatpush2.msra.mxu0 %v5820_v19  ;;  %1161 = vmatpush2.msra.mxu1 %v5821_v20 }
 0x198   : > { %1091 = vmatprep.subr.mxu0 %v5822_v21  ;;  %1162 = vmatprep.subr.mxu1 %v5823_v23 }
 0x199   : > { %1092 = vmatpush2.msra.mxu0 %v5824_v24  ;;  %1163 = vmatpush2.msra.mxu1 %v5825_v25 }
 0x19a   : > { %1093 = vmatprep.subr.mxu0 %v5826_v26  ;;  %1164 = vmatprep.subr.mxu1 %v5827_v27 }
 0x19b   : > { %1094 = vmatpush2.msra.mxu0 %v5828_v28  ;;  %1165 = vmatpush2.msra.mxu1 %v5829_v29 }
 0x19c   : > { %1199 = vmatprep.subr.mxu0 %v3789_v30  ;;  %1270 = vmatprep.subr.mxu1 %v3795_v31 }
 0x1fa   : > { %v733_v38 = vpop.f32.mrf.mxu0  ;;  %v804_v44 = vpop.f32.mrf.mxu1 }
 0x1fb   : > { %v734_v39 = vadd.f32 %v733_v38, %v3803_v36  ;;  %v805_v56 = vadd.f32 %v804_v44, %v3814_v1  ;;  %v3834_v44 = vld [vmem:[%s5218_s1 + $0x1e0] sm:$0xff] }
 0x1fc   : > { %v735_v40 = vpop.f32.mrf.mxu0  ;;  %v806_v47 = vpop.f32.mrf.mxu1 }
 0x1fd   : > { %v1994_v41 = vmul.f32 -1.442695, %v734_v39  ;;  %v736_v42 = vadd.f32 %v735_v40, %v3805_v37  ;;  %v807_v60 = vadd.f32 %v806_v47, %v3810_v46  ;;  %v3852_v47 = vld [vmem:[%s5218_s1 + $0x1d8] sm:$0xff] }
 0x1ff   : > { %2051 = vpow2.f32 %v1994_v41  ;;  %v1995_v45 = vmul.f32 -1.442695, %v736_v42  ;;  %v1996_v58 = vmul.f32 -1.442695, %v807_v60  ;;  %v3864_v60 = vld [vmem:[%s5218_s1 + $0x1d0] sm:$0xff] }
 0x201   : > { %2053 = vpow2.f32 %v1995_v45  ;;  %v3846_v45 = vld [vmem:[%s5218_s1 + $0x1c8] sm:$0xff] }
 0x202   : > { %2055 = vpow2.f32 %v1996_v58  ;;  %v3870_v58 = vld [vmem:[%s5218_s1 + $0x1a8] sm:$0xff] }
 0x20c   : > { %v2052_v62 = vpop.eup %2051 }
 0x20d   : > { %v812_v55 = vadd.f32 1.0, %v2052_v62  ;;  %v3876_v62 = vld [vmem:[%s5218_s1 + $0x1b8] sm:$0xff] }
 0x20e   : > { %v2054_v54 = vpop.eup %2053 }
 0x20f   : > { %2057 = vrcp.f32 %v812_v55  ;;  %v818_v61 = vadd.f32 1.0, %v2054_v54  ;;  %v2056_v53 = vpop.eup %2055  ;;  %v3888_v55 = vld [vmem:[%s5218_s1 + $0x1b0] sm:$0xff]  ;;  %v3894_v54 = vld [vmem:[%s5218_s1 + $0x188] sm:$0xff] }
 0x210   : > { %2059 = vtanh.f32 %v805_v56  ;;  %v825_v4 = vadd.f32 1.0, %v2056_v53  ;;  %v3882_v56 = vld [vmem:[%s5218_s1 + $0x1a0] sm:$0xff] }
 0x211   : > { %2061 = vrcp.f32 %v818_v61  ;;  %v3900_v61 = vld [vmem:[%s5218_s1 + $0x198] sm:$0xff]  ;;  %v3906_v53 = vld [vmem:[%s5218_s1 + $0x180] sm:$0xff] }
 0x212   : > { %2063 = vrcp.f32 %v825_v4  ;;  %v3960_v4 = vld [vmem:[%s5218_s1 + $0x150] sm:$0xff] }
 0x21b   : > { %v901_v52 = vpop.f32.mrf.mxu0  ;;  %v972_v63 = vpop.f32.mrf.mxu1 }
 0x21c   : > { %v2058_v0 = vpop.eup %2057 }
 0x21d   : > { %v2060_v2 = vpop.eup %2059  ;;  %v903_v50 = vpop.f32.mrf.mxu0 }
 0x21e   : > { %v974_v51 = vpop.f32.mrf.mxu1  ;;  %v2062_v49 = vpop.eup %2061  ;;  %v981_v5 = vcombine.low %v901_v52, %v903_v50  ;;  %v829_v7 = vmul.f32 %v2060_v2, %v2058_v0  ;;  %v3912_v52 = vld [vmem:[%s5218_s1 + $0x190] sm:$0xff]  ;;  %v3924_v0 = vld [vmem:[%s5218_s1 + $0x178] sm:$0xff]  ;;  %v3942_v50 = vld [vmem:[%s5218_s1 + $0x148] sm:$0xff] }
 0x21f   : > { %v982_v6 = vcombine.low %v972_v63, %v974_v51  ;;  %v828_v8 = vmul.f32 %v2062_v49, %v469_v57  ;;  %v2064_v18 = vpop.eup %2063  ;;  %v3918_v63 = vld [vmem:[%s5218_s1 + $0x168] sm:$0xff]  ;;  %v3930_v57 = vld [vmem:[%s5218_s1 + $0x160] sm:$0xff]  ;;  %v3936_v2 = vld [vmem:[%s5218_s1 + $0x170] sm:$0xff] }
 0x220   : > { %v989_v9 = vrot.slane %v981_v5, %v3580_v59  ;;  %v3948_v51 = vld [vmem:[%s5218_s1 + $0x158] sm:$0xff]  ;;  %v3954_v49 = vld [vmem:[%s5218_s1 + $0x140] sm:$0xff]  ;;  %v3966_v5 = vld [vmem:[%s5218_s1 + $0x128] sm:$0xff] }
 0x221   : > { %v996_v10 = vrot.slane %v982_v6, %v3580_v59  ;;  %v3820_v12 = vadd.f32 %v829_v7, %v828_v8  ;;  %v3972_v6 = vld [vmem:[%s5218_s1 + $0x138] sm:$0xff]  ;;  %v3978_v7 = vld [vmem:[%s5218_s1 + $0x120] sm:$0xff]  ;;  %v3984_v8 = vld [vmem:[%s5218_s1 + $0x130] sm:$0xff] }
 0x223   : > { %v997_v13 = vcombine.low %v989_v9, %v996_v10  ;;  %2065 = vtanh.f32 %v3820_v12  ;;  %v3990_v9 = vld [vmem:[%s5218_s1 + $0x108] sm:$0xff]  ;;  %v3996_v10 = vld [vmem:[%s5218_s1 + $0x118] sm:$0xff] }
 0x225   : > { %v999_v14 = vadd.f32 %v1997_v11, %v997_v13  ;;  %v4002_v11 = vld [vmem:[%s5218_s1 + $0x100] sm:$0xff]  ;;  %v4008_v13 = vld [vmem:[%s5218_s1 + $0x110] sm:$0xff] }
 0x227   : > { %v1998_v15 = vmul.f32 -1.442695, %v999_v14  ;;  %v1007_v16 = vrot.slane %v999_v14, 2  ;;  %v1018_v19 = vrot.slane %v999_v14, 6  ;;  %v1015_v25 = vrot.slane %v999_v14, 4  ;;  %v4014_v14 = vld [vmem:[%s5218_s1 + $0xe8] sm:$0xff] }
 0x229   : > { %2067 = vpow2.f32 %v1998_v15  ;;  %v1999_v17 = vmul.f32 -1.442695, %v1007_v16  ;;  %v2000_v23 = vmul.f32 -1.442695, %v1018_v19  ;;  %v4020_v15 = vld [vmem:[%s5218_s1 + $0xf8] sm:$0xff]  ;;  %v4026_v16 = vld [vmem:[%s5218_s1 + $0xe0] sm:$0xff] }
 0x22a   : > { %v4044_v19 = vld [vmem:[%s5218_s1 + $0xd8] sm:$0xff] }
 0x22b   : > { %2069 = vpow2.f32 %v1999_v17  ;;  %v4032_v17 = vld [vmem:[%s5218_s1 + $0xf0] sm:$0xff] }
 0x22c   : > { %2071 = vpow2.f32 %v2000_v23  ;;  %v4062_v23 = vld [vmem:[%s5218_s1 + $0xa8] sm:$0xff] }
 0x230   : > { %v2066_v20 = vpop.eup %2065 }
 0x231   : > { %v832_v21 = vmul.f32 %v2066_v20, %v2064_v18  ;;  %v4038_v18 = vld [vmem:[%s5218_s1 + $0xc8] sm:$0xff]  ;;  %v4050_v20 = vld [vmem:[%s5218_s1 + $0xc0] sm:$0xff] }
 0x233   : > { %1095 = vmatprep.mubr.f32.mxu0 %v832_v21  ;;  %1166 = vmatprep.mubr.f32.mxu1 %v832_v21  ;;  %v4056_v21 = vld [vmem:[%s5218_s1 + $0xd0] sm:$0xff] }
 0x236   : > { %v2068_v24 = vpop.eup %2067 }
 0x237   : > { %v1003_v26 = vadd.f32 1.0, %v2068_v24  ;;  %v4068_v24 = vld [vmem:[%s5218_s1 + $0xb8] sm:$0xff] }
 0x238   : > { %v2070_v27 = vpop.eup %2069 }
 0x239   : > { %2073 = vrcp.f32 %v1003_v26  ;;  %v1012_v28 = vadd.f32 1.0, %v2070_v27  ;;  %v2072_v29 = vpop.eup %2071  ;;  %v4080_v26 = vld [vmem:[%s5218_s1 + $0xb0] sm:$0xff]  ;;  %v4086_v27 = vld [vmem:[%s5218_s1 + $0x88] sm:$0xff] }
 0x23a   : > { %2075 = vtanh.f32 %v1015_v25  ;;  %v1023_v35 = vadd.f32 1.0, %v2072_v29  ;;  %v4074_v25 = vld [vmem:[%s5218_s1 + $0xa0] sm:$0xff]  ;;  %5836 = vst [vmem:[#allocation12_spill] sm:$0xff] %v4080_v26  ;;  %5837 = vst [vmem:[#allocation13_spill] sm:$0xff] %v4086_v27 }
 0x23b   : > { %2077 = vrcp.f32 %v1012_v28  ;;  %5835 = vst [vmem:[#allocation11_spill] sm:$0xff] %v4074_v25  ;;  %v4092_v28 = vld [vmem:[%s5218_s1 + $0x98] sm:$0xff]  ;;  %v4098_v29 = vld [vmem:[%s5218_s1 + $0x80] sm:$0xff] }
 0x23c   : > { %2079 = vrcp.f32 %v1023_v35  ;;  %5838 = vst [vmem:[#allocation14_spill] sm:$0xff] %v4092_v28  ;;  %5839 = vst [vmem:[#allocation15_spill] sm:$0xff] %v4098_v29  ;;  %v4122_v35 = vld [vmem:[%s5218_s1 + $0x60] sm:$0xff] }
 0x23d   : > { %5843 = vst [vmem:[#allocation19_spill] sm:$0xff] %v4122_v35 }
 0x246   : > { %v2074_v32 = vpop.eup %2073 }
 0x247   : > { %v2076_v33 = vpop.eup %2075 }
 0x248   : > { %v2078_v34 = vpop.eup %2077  ;;  %v1027_v39 = vmul.f32 %v2076_v33, %v2074_v32  ;;  %v4104_v32 = vld [vmem:[%s5218_s1 + $0x90] sm:$0xff]  ;;  %v4110_v33 = vld [vmem:[%s5218_s1 + $0x68] sm:$0xff] }
 0x249   : > { %v1026_v38 = vmul.f32 %v2078_v34, %v3585_v3  ;;  %v2080_v41 = vpop.eup %2079  ;;  %v3840_v3 = vld [vmem:[%s5218_s1 + $0x1f0] sm:$0xff]  ;;  %5840 = vst [vmem:[#allocation16_spill] sm:$0xff] %v4104_v32  ;;  %5841 = vst [vmem:[#allocation17_spill] sm:$0xff] %v4110_v33  ;;  %v4116_v34 = vld [vmem:[%s5218_s1 + $0x78] sm:$0xff] }
 0x24a   : > { %5842 = vst [vmem:[#allocation18_spill] sm:$0xff] %v4116_v34 }
 0x24b   : > { %v3824_v40 = vadd.f32 %v1027_v39, %v1026_v38  ;;  %v4128_v38 = vld [vmem:[%s5218_s1 + $0x70] sm:$0xff]  ;;  %v4134_v39 = vld [vmem:[%s5218_s1 + $0x48] sm:$0xff] }
 0x24c   : > { %5844 = vst [vmem:[#allocation20_spill] sm:$0xff] %v4128_v38  ;;  %5845 = vst [vmem:[#allocation21_spill] sm:$0xff] %v4134_v39 }
 0x24d   : > { %2081 = vtanh.f32 %v3824_v40 }
 0x25a   : > { %v2082_v42 = vpop.eup %2081 }
 0x25b   : > { %v3827_v43 = vmul.f32 %v2082_v42, %v2080_v41  ;;  %v4140_v41 = vld [vmem:[%s5218_s1 + $0x58] sm:$0xff]  ;;  %v4146_v42 = vld [vmem:[%s5218_s1 + $0x40] sm:$0xff] }
 0x25c   : > { %5846 = vst [vmem:[#allocation22_spill] sm:$0xff] %v4140_v41  ;;  %5847 = vst [vmem:[#allocation23_spill] sm:$0xff] %v4146_v42 }
 0x25d   : > { %1096 = vmatmul.mubr.f32.vlgmr.msra.gmra.mxu0 %v3827_v43  ;;  %1167 = vmatmul.mubr.f32.vlgmr.msra.gmra.mxu1 %v3827_v43 }
 0x25e   : > { %1200 = vmatpush1.msra.mxu0 %v3834_v44  ;;  %1271 = vmatpush1.msra.mxu1 %v3840_v3 }
 0x25f   : > { %1201 = vmatprep.subr.mxu0 %v3846_v45  ;;  %1272 = vmatprep.subr.mxu1 %v3852_v47 }
 0x260   : > { %1202 = vmatpush1.msra.mxu0 %v3858_v48  ;;  %1273 = vmatpush1.msra.mxu1 %v3864_v60 }
 0x261   : > { %1203 = vmatprep.subr.mxu0 %v3870_v58  ;;  %1274 = vmatprep.subr.mxu1 %v3876_v62 }
 0x262   : > { %1204 = vmatpush1.msra.mxu0 %v3882_v56  ;;  %1275 = vmatpush1.msra.mxu1 %v3888_v55 }
 0x263   : > { %1205 = vmatprep.subr.mxu0 %v3894_v54  ;;  %1276 = vmatprep.subr.mxu1 %v3900_v61 }
 0x264   : > { %1206 = vmatpush1.msra.mxu0 %v3906_v53  ;;  %1277 = vmatpush1.msra.mxu1 %v3912_v52 }
 0x265   : > { %1207 = vmatprep.subr.mxu0 %v3918_v63  ;;  %1278 = vmatprep.subr.mxu1 %v3924_v0 }
 0x266   : > { %1208 = vmatpush1.msra.mxu0 %v3930_v57  ;;  %1279 = vmatpush1.msra.mxu1 %v3936_v2 }
 0x267   : > { %1209 = vmatprep.subr.mxu0 %v3942_v50  ;;  %1280 = vmatprep.subr.mxu1 %v3948_v51 }
 0x268   : > { %1210 = vmatpush1.msra.mxu0 %v3954_v49  ;;  %1281 = vmatpush1.msra.mxu1 %v3960_v4 }
 0x269   : > { %1211 = vmatprep.subr.mxu0 %v3966_v5  ;;  %1282 = vmatprep.subr.mxu1 %v3972_v6 }
 0x26a   : > { %1212 = vmatpush1.msra.mxu0 %v3978_v7  ;;  %1283 = vmatpush1.msra.mxu1 %v3984_v8 }
 0x26b   : > { %1213 = vmatprep.subr.mxu0 %v3990_v9  ;;  %1284 = vmatprep.subr.mxu1 %v3996_v10 }
 0x26c   : > { %1214 = vmatpush1.msra.mxu0 %v4002_v11  ;;  %1285 = vmatpush1.msra.mxu1 %v4008_v13 }
 0x26d   : > { %1215 = vmatprep.subr.mxu0 %v4014_v14  ;;  %1286 = vmatprep.subr.mxu1 %v4020_v15 }
 0x26e   : > { %1216 = vmatpush1.msra.mxu0 %v4026_v16  ;;  %1287 = vmatpush1.msra.mxu1 %v4032_v17 }
 0x26f   : > { %1217 = vmatprep.subr.mxu0 %v4038_v18  ;;  %1288 = vmatprep.subr.mxu1 %v4044_v19 }
 0x270   : > { %1218 = vmatpush1.msra.mxu0 %v4050_v20  ;;  %1289 = vmatpush1.msra.mxu1 %v4056_v21 }
 0x271   : > { %1219 = vmatprep.subr.mxu0 %v4062_v23  ;;  %1290 = vmatprep.subr.mxu1 %v4068_v24 }
 0x272   : > { %1220 = vmatpush1.msra.mxu0 %v4074_v25  ;;  %1291 = vmatpush1.msra.mxu1 %v4080_v26 }
 0x273   : > { %1221 = vmatprep.subr.mxu0 %v4086_v27  ;;  %1292 = vmatprep.subr.mxu1 %v4092_v28 }
 0x274   : > { %1222 = vmatpush1.msra.mxu0 %v4098_v29  ;;  %1293 = vmatpush1.msra.mxu1 %v4104_v32 }
 0x275   : > { %1223 = vmatprep.subr.mxu0 %v4110_v33  ;;  %1294 = vmatprep.subr.mxu1 %v4116_v34 }
 0x276   : > { %1224 = vmatpush1.msra.mxu0 %v4122_v35  ;;  %1295 = vmatpush1.msra.mxu1 %v4128_v38  ;;  %v4152_v38 = vld [vmem:[%s5218_s1 + $0x50] sm:$0xff] }
 0x277   : > { %1225 = vmatprep.subr.mxu0 %v4134_v39  ;;  %1296 = vmatprep.subr.mxu1 %v4140_v41  ;;  %5848 = vst [vmem:[#allocation24_spill] sm:$0xff] %v4152_v38  ;;  %v4158_v39 = vld [vmem:[%s5218_s1 + $0x28] sm:$0xff]  ;;  %v4164_v41 = vld [vmem:[%s5218_s1 + $0x38] sm:$0xff] }
 0x278   : > { %1226 = vmatpush1.msra.mxu0 %v4146_v42  ;;  %1297 = vmatpush1.msra.mxu1 %v4152_v38  ;;  %5849 = vst [vmem:[#allocation25_spill] sm:$0xff] %v4158_v39  ;;  %5850 = vst [vmem:[#allocation26_spill] sm:$0xff] %v4164_v41  ;;  %v4170_v42 = vld [vmem:[%s5218_s1 + $0x20] sm:$0xff]  ;;  %v4176_v38 = vld [vmem:[%s5218_s1 + $0x30] sm:$0xff] }
 0x279   : > { %1227 = vmatprep.subr.mxu0 %v4158_v39  ;;  %1298 = vmatprep.subr.mxu1 %v4164_v41  ;;  %5851 = vst [vmem:[#allocation27_spill] sm:$0xff] %v4170_v42  ;;  %5852 = vst [vmem:[#allocation28_spill] sm:$0xff] %v4176_v38  ;;  %v4182_v39 = vld [vmem:[%s5218_s1 + $0x8] sm:$0xff]  ;;  %v4188_v41 = vld [vmem:[%s5218_s1 + $0x18] sm:$0xff] }
 0x27a   : > { %1228 = vmatpush1.msra.mxu0 %v4170_v42  ;;  %1299 = vmatpush1.msra.mxu1 %v4176_v38  ;;  %5853 = vst [vmem:[#allocation29_spill] sm:$0xff] %v4182_v39  ;;  %5854 = vst [vmem:[#allocation30_spill] sm:$0xff] %v4188_v41  ;;  %v4194_v42 = vld [vmem:[%s5218_s1] sm:$0xff] }
 0x27b   : > { %1229 = vmatprep.subr.mxu0 %v4182_v39  ;;  %1300 = vmatprep.subr.mxu1 %v4188_v41  ;;  %5855 = vst [vmem:[#allocation31_spill] sm:$0xff] %v4194_v42  ;;  %v4201_v39 = vld [vmem:[%s5218_s1 + $0x10] sm:$0xff]  ;;  %v4210_v41 = vld [vmem:[%s5219_s2 + $0x1e8] sm:$0xff] }
 0x27c   : > { %1230 = vmatpush1.msra.mxu0 %v4194_v42  ;;  %1263 = vmatprep.mubr.f32.mxu0 %v5700_v22  ;;  %5856 = vst [vmem:[#allocation32_spill] sm:$0xff] %v4201_v39  ;;  %5857 = vst [vmem:[#allocation33_spill] sm:$0xff] %v4210_v41  ;;  %v4216_v42 = vld [vmem:[%s5219_s2 + $0x1f8] sm:$0xff] }
 0x27d   : > { %1301 = vmatpush1.msra.mxu1 %v4201_v39  ;;  %1334 = vmatprep.mubr.f32.mxu1 %v5700_v22  ;;  %5858 = vst [vmem:[#allocation34_spill] sm:$0xff] %v4216_v42  ;;  %v4222_v39 = vld [vmem:[%s5219_s2 + $0x1e0] sm:$0xff] }
 0x27e   : > { %1264 = vmatmul.mubr.f32.vlgmr.msra.gmra.mxu0 %v3827_v43  ;;  %1335 = vmatmul.mubr.f32.vlgmr.msra.gmra.mxu1 %v3827_v43  ;;  %5859 = vst [vmem:[#allocation35_spill] sm:$0xff] %v4222_v39  ;;  %v4228_v43 = vld [vmem:[%s5219_s2 + $0x1f0] sm:$0xff] }
 0x27f   : > { %1395 = vmatprep.subr.mxu0 %v4210_v41  ;;  %1466 = vmatprep.subr.mxu1 %v4216_v42  ;;  %5860 = vst [vmem:[#allocation36_spill] sm:$0xff] %v4228_v43  ;;  %v4234_v41 = vld [vmem:[%s5219_s2 + $0x1c8] sm:$0xff]  ;;  %v4240_v42 = vld [vmem:[%s5219_s2 + $0x1d8] sm:$0xff] }
 0x280   : > { %1396 = vmatpush1.msra.mxu0 %v4222_v39  ;;  %1467 = vmatpush1.msra.mxu1 %v4228_v43  ;;  %5861 = vst [vmem:[#allocation37_spill] sm:$0xff] %v4234_v41  ;;  %5862 = vst [vmem:[#allocation38_spill] sm:$0xff] %v4240_v42  ;;  %v4246_v39 = vld [vmem:[%s5219_s2 + $0x1c0] sm:$0xff]  ;;  %v4252_v43 = vld [vmem:[%s5219_s2 + $0x1d0] sm:$0xff] }
 0x281   : > { %1397 = vmatprep.subr.mxu0 %v4234_v41  ;;  %1468 = vmatprep.subr.mxu1 %v4240_v42  ;;  %5863 = vst [vmem:[#allocation39_spill] sm:$0xff] %v4246_v39  ;;  %5864 = vst [vmem:[#allocation40_spill] sm:$0xff] %v4252_v43  ;;  %v4258_v41 = vld [vmem:[%s5219_s2 + $0x1a8] sm:$0xff]  ;;  %v4264_v42 = vld [vmem:[%s5219_s2 + $0x1b8] sm:$0xff] }
 0x282   : > { %1398 = vmatpush1.msra.mxu0 %v4246_v39  ;;  %1469 = vmatpush1.msra.mxu1 %v4252_v43  ;;  %5865 = vst [vmem:[#allocation41_spill] sm:$0xff] %v4258_v41  ;;  %5866 = vst [vmem:[#allocation42_spill] sm:$0xff] %v4264_v42  ;;  %v4270_v39 = vld [vmem:[%s5219_s2 + $0x1a0] sm:$0xff]  ;;  %v4276_v43 = vld [vmem:[%s5219_s2 + $0x1b0] sm:$0xff] }
 0x283   : > { %1399 = vmatprep.subr.mxu0 %v4258_v41  ;;  %1470 = vmatprep.subr.mxu1 %v4264_v42  ;;  %5867 = vst [vmem:[#allocation43_spill] sm:$0xff] %v4270_v39  ;;  %5868 = vst [vmem:[#allocation44_spill] sm:$0xff] %v4276_v43  ;;  %v4282_v41 = vld [vmem:[%s5219_s2 + $0x188] sm:$0xff]  ;;  %v4288_v42 = vld [vmem:[%s5219_s2 + $0x198] sm:$0xff] }
 0x284   : > { %1400 = vmatpush1.msra.mxu0 %v4270_v39  ;;  %1471 = vmatpush1.msra.mxu1 %v4276_v43  ;;  %5869 = vst [vmem:[#allocation45_spill] sm:$0xff] %v4282_v41  ;;  %5870 = vst [vmem:[#allocation46_spill] sm:$0xff] %v4288_v42  ;;  %v4294_v39 = vld [vmem:[%s5219_s2 + $0x180] sm:$0xff]  ;;  %v4300_v43 = vld [vmem:[%s5219_s2 + $0x190] sm:$0xff] }
 0x285   : > { %1401 = vmatprep.subr.mxu0 %v4282_v41  ;;  %1472 = vmatprep.subr.mxu1 %v4288_v42  ;;  %5871 = vst [vmem:[#allocation47_spill] sm:$0xff] %v4294_v39  ;;  %5872 = vst [vmem:[#allocation48_spill] sm:$0xff] %v4300_v43  ;;  %v4306_v41 = vld [vmem:[%s5219_s2 + $0x168] sm:$0xff]  ;;  %v4312_v42 = vld [vmem:[%s5219_s2 + $0x178] sm:$0xff] }
 0x286   : > { %1402 = vmatpush1.msra.mxu0 %v4294_v39  ;;  %1473 = vmatpush1.msra.mxu1 %v4300_v43  ;;  %5873 = vst [vmem:[#allocation49_spill] sm:$0xff] %v4306_v41  ;;  %5874 = vst [vmem:[#allocation50_spill] sm:$0xff] %v4312_v42  ;;  %v4318_v39 = vld [vmem:[%s5219_s2 + $0x160] sm:$0xff]  ;;  %v4324_v43 = vld [vmem:[%s5219_s2 + $0x170] sm:$0xff] }
 0x287   : > { %1403 = vmatprep.subr.mxu0 %v4306_v41  ;;  %1474 = vmatprep.subr.mxu1 %v4312_v42  ;;  %5875 = vst [vmem:[#allocation51_spill] sm:$0xff] %v4318_v39  ;;  %5876 = vst [vmem:[#allocation52_spill] sm:$0xff] %v4324_v43  ;;  %v4330_v41 = vld [vmem:[%s5219_s2 + $0x148] sm:$0xff]  ;;  %v4336_v42 = vld [vmem:[%s5219_s2 + $0x158] sm:$0xff] }
 0x288   : > { %1404 = vmatpush1.msra.mxu0 %v4318_v39  ;;  %1475 = vmatpush1.msra.mxu1 %v4324_v43  ;;  %5877 = vst [vmem:[#allocation53_spill] sm:$0xff] %v4330_v41  ;;  %5878 = vst [vmem:[#allocation54_spill] sm:$0xff] %v4336_v42  ;;  %v4342_v39 = vld [vmem:[%s5219_s2 + $0x140] sm:$0xff]  ;;  %v4348_v43 = vld [vmem:[%s5219_s2 + $0x150] sm:$0xff] }
 0x289   : > { %1405 = vmatprep.subr.mxu0 %v4330_v41  ;;  %1476 = vmatprep.subr.mxu1 %v4336_v42  ;;  %5879 = vst [vmem:[#allocation55_spill] sm:$0xff] %v4342_v39  ;;  %5880 = vst [vmem:[#allocation56_spill] sm:$0xff] %v4348_v43  ;;  %v4354_v41 = vld [vmem:[%s5219_s2 + $0x128] sm:$0xff]  ;;  %v4360_v42 = vld [vmem:[%s5219_s2 + $0x138] sm:$0xff] }
 0x28a   : > { %1406 = vmatpush1.msra.mxu0 %v4342_v39  ;;  %1477 = vmatpush1.msra.mxu1 %v4348_v43  ;;  %5881 = vst [vmem:[#allocation57_spill] sm:$0xff] %v4354_v41  ;;  %5882 = vst [vmem:[#allocation58_spill] sm:$0xff] %v4360_v42  ;;  %v4366_v39 = vld [vmem:[%s5219_s2 + $0x120] sm:$0xff]  ;;  %v4372_v43 = vld [vmem:[%s5219_s2 + $0x130] sm:$0xff] }
 0x28b   : > { %1407 = vmatprep.subr.mxu0 %v4354_v41  ;;  %1478 = vmatprep.subr.mxu1 %v4360_v42  ;;  %5883 = vst [vmem:[#allocation59_spill] sm:$0xff] %v4366_v39  ;;  %5884 = vst [vmem:[#allocation60_spill] sm:$0xff] %v4372_v43  ;;  %v4378_v41 = vld [vmem:[%s5219_s2 + $0x108] sm:$0xff]  ;;  %v4384_v42 = vld [vmem:[%s5219_s2 + $0x118] sm:$0xff] }
 0x28c   : > { %1408 = vmatpush1.msra.mxu0 %v4366_v39  ;;  %1479 = vmatpush1.msra.mxu1 %v4372_v43  ;;  %5885 = vst [vmem:[#allocation61_spill] sm:$0xff] %v4378_v41  ;;  %5886 = vst [vmem:[#allocation62_spill] sm:$0xff] %v4384_v42  ;;  %v4390_v39 = vld [vmem:[%s5219_s2 + $0x100] sm:$0xff]  ;;  %v4396_v43 = vld [vmem:[%s5219_s2 + $0x110] sm:$0xff] }
 0x28d   : > { %1409 = vmatprep.subr.mxu0 %v4378_v41  ;;  %1480 = vmatprep.subr.mxu1 %v4384_v42  ;;  %5887 = vst [vmem:[#allocation63_spill] sm:$0xff] %v4390_v39  ;;  %5888 = vst [vmem:[#allocation64_spill] sm:$0xff] %v4396_v43  ;;  %v4402_v41 = vld [vmem:[%s5219_s2 + $0xe8] sm:$0xff]  ;;  %v4408_v42 = vld [vmem:[%s5219_s2 + $0xf8] sm:$0xff] }
 0x28e   : > { %1410 = vmatpush1.msra.mxu0 %v4390_v39  ;;  %1481 = vmatpush1.msra.mxu1 %v4396_v43  ;;  %5889 = vst [vmem:[#allocation65_spill] sm:$0xff] %v4402_v41  ;;  %5890 = vst [vmem:[#allocation66_spill] sm:$0xff] %v4408_v42  ;;  %v4414_v39 = vld [vmem:[%s5219_s2 + $0xe0] sm:$0xff]  ;;  %v4420_v43 = vld [vmem:[%s5219_s2 + $0xf0] sm:$0xff] }
 0x28f   : > { %1411 = vmatprep.subr.mxu0 %v4402_v41  ;;  %1482 = vmatprep.subr.mxu1 %v4408_v42  ;;  %5891 = vst [vmem:[#allocation67_spill] sm:$0xff] %v4414_v39  ;;  %5892 = vst [vmem:[#allocation68_spill] sm:$0xff] %v4420_v43  ;;  %v4426_v41 = vld [vmem:[%s5219_s2 + $0xc8] sm:$0xff]  ;;  %v4432_v42 = vld [vmem:[%s5219_s2 + $0xd8] sm:$0xff] }
 0x290   : > { %1412 = vmatpush1.msra.mxu0 %v4414_v39  ;;  %1483 = vmatpush1.msra.mxu1 %v4420_v43  ;;  %5893 = vst [vmem:[#allocation69_spill] sm:$0xff] %v4426_v41  ;;  %5894 = vst [vmem:[#allocation70_spill] sm:$0xff] %v4432_v42  ;;  %v4438_v39 = vld [vmem:[%s5219_s2 + $0xc0] sm:$0xff]  ;;  %v4444_v43 = vld [vmem:[%s5219_s2 + $0xd0] sm:$0xff] }
 0x291   : > { %1413 = vmatprep.subr.mxu0 %v4426_v41  ;;  %1484 = vmatprep.subr.mxu1 %v4432_v42  ;;  %5895 = vst [vmem:[#allocation71_spill] sm:$0xff] %v4438_v39  ;;  %5896 = vst [vmem:[#allocation72_spill] sm:$0xff] %v4444_v43  ;;  %v4450_v41 = vld [vmem:[%s5219_s2 + $0xa8] sm:$0xff]  ;;  %v4456_v42 = vld [vmem:[%s5219_s2 + $0xb8] sm:$0xff] }
 0x292   : > { %1414 = vmatpush1.msra.mxu0 %v4438_v39  ;;  %1485 = vmatpush1.msra.mxu1 %v4444_v43  ;;  %5897 = vst [vmem:[#allocation73_spill] sm:$0xff] %v4450_v41  ;;  %5898 = vst [vmem:[#allocation74_spill] sm:$0xff] %v4456_v42  ;;  %v4462_v39 = vld [vmem:[%s5219_s2 + $0xa0] sm:$0xff]  ;;  %v4468_v43 = vld [vmem:[%s5219_s2 + $0xb0] sm:$0xff] }
 0x293   : > { %1415 = vmatprep.subr.mxu0 %v4450_v41  ;;  %1486 = vmatprep.subr.mxu1 %v4456_v42  ;;  %5899 = vst [vmem:[#allocation75_spill] sm:$0xff] %v4462_v39  ;;  %5900 = vst [vmem:[#allocation76_spill] sm:$0xff] %v4468_v43  ;;  %v4474_v41 = vld [vmem:[%s5219_s2 + $0x88] sm:$0xff]  ;;  %v4480_v42 = vld [vmem:[%s5219_s2 + $0x98] sm:$0xff] }
 0x294   : > { %1416 = vmatpush1.msra.mxu0 %v4462_v39  ;;  %1487 = vmatpush1.msra.mxu1 %v4468_v43  ;;  %5901 = vst [vmem:[#allocation77_spill] sm:$0xff] %v4474_v41  ;;  %5902 = vst [vmem:[#allocation78_spill] sm:$0xff] %v4480_v42  ;;  %v4486_v39 = vld [vmem:[%s5219_s2 + $0x80] sm:$0xff]  ;;  %v4492_v43 = vld [vmem:[%s5219_s2 + $0x90] sm:$0xff] }
 0x295   : > { %1417 = vmatprep.subr.mxu0 %v4474_v41  ;;  %1488 = vmatprep.subr.mxu1 %v4480_v42  ;;  %5903 = vst [vmem:[#allocation79_spill] sm:$0xff] %v4486_v39  ;;  %5904 = vst [vmem:[#allocation80_spill] sm:$0xff] %v4492_v43  ;;  %v4498_v41 = vld [vmem:[%s5219_s2 + $0x68] sm:$0xff]  ;;  %v4504_v42 = vld [vmem:[%s5219_s2 + $0x78] sm:$0xff] }
 0x296   : > { %1418 = vmatpush1.msra.mxu0 %v4486_v39  ;;  %1489 = vmatpush1.msra.mxu1 %v4492_v43  ;;  %5905 = vst [vmem:[#allocation81_spill] sm:$0xff] %v4498_v41  ;;  %5906 = vst [vmem:[#allocation82_spill] sm:$0xff] %v4504_v42  ;;  %v4510_v39 = vld [vmem:[%s5219_s2 + $0x60] sm:$0xff]  ;;  %v4516_v43 = vld [vmem:[%s5219_s2 + $0x70] sm:$0xff] }
 0x297   : > { %1419 = vmatprep.subr.mxu0 %v4498_v41  ;;  %1490 = vmatprep.subr.mxu1 %v4504_v42  ;;  %5907 = vst [vmem:[#allocation83_spill] sm:$0xff] %v4510_v39  ;;  %5908 = vst [vmem:[#allocation84_spill] sm:$0xff] %v4516_v43  ;;  %v4522_v41 = vld [vmem:[%s5219_s2 + $0x48] sm:$0xff]  ;;  %v4528_v42 = vld [vmem:[%s5219_s2 + $0x58] sm:$0xff] }
 0x298   : > { %1420 = vmatpush1.msra.mxu0 %v4510_v39  ;;  %1491 = vmatpush1.msra.mxu1 %v4516_v43  ;;  %5909 = vst [vmem:[#allocation85_spill] sm:$0xff] %v4522_v41  ;;  %5910 = vst [vmem:[#allocation86_spill] sm:$0xff] %v4528_v42  ;;  %v4534_v39 = vld [vmem:[%s5219_s2 + $0x40] sm:$0xff]  ;;  %v4540_v43 = vld [vmem:[%s5219_s2 + $0x50] sm:$0xff] }
 0x299   : > { %1421 = vmatprep.subr.mxu0 %v4522_v41  ;;  %1492 = vmatprep.subr.mxu1 %v4528_v42  ;;  %5911 = vst [vmem:[#allocation87_spill] sm:$0xff] %v4534_v39  ;;  %5912 = vst [vmem:[#allocation88_spill] sm:$0xff] %v4540_v43  ;;  %v4546_v41 = vld [vmem:[%s5219_s2 + $0x28] sm:$0xff]  ;;  %v4552_v42 = vld [vmem:[%s5219_s2 + $0x38] sm:$0xff] }
 0x29a   : > { %1422 = vmatpush1.msra.mxu0 %v4534_v39  ;;  %1493 = vmatpush1.msra.mxu1 %v4540_v43  ;;  %5913 = vst [vmem:[#allocation89_spill] sm:$0xff] %v4546_v41  ;;  %5914 = vst [vmem:[#allocation90_spill] sm:$0xff] %v4552_v42  ;;  %v4558_v39 = vld [vmem:[%s5219_s2 + $0x20] sm:$0xff]  ;;  %v4564_v43 = vld [vmem:[%s5219_s2 + $0x30] sm:$0xff] }
 0x29b   : > { %1423 = vmatprep.subr.mxu0 %v4546_v41  ;;  %1494 = vmatprep.subr.mxu1 %v4552_v42  ;;  %5915 = vst [vmem:[#allocation91_spill] sm:$0xff] %v4558_v39  ;;  %5916 = vst [vmem:[#allocation92_spill] sm:$0xff] %v4564_v43  ;;  %v4570_v41 = vld [vmem:[%s5219_s2 + $0x8] sm:$0xff]  ;;  %v4576_v42 = vld [vmem:[%s5219_s2 + $0x18] sm:$0xff] }
 0x29c   : > { %1424 = vmatpush1.msra.mxu0 %v4558_v39  ;;  %1495 = vmatpush1.msra.mxu1 %v4564_v43  ;;  %5917 = vst [vmem:[#allocation93_spill] sm:$0xff] %v4570_v41  ;;  %5918 = vst [vmem:[#allocation94_spill] sm:$0xff] %v4576_v42  ;;  %v4582_v39 = vld [vmem:[%s5219_s2] sm:$0xff]  ;;  %v4588_v43 = vld [vmem:[%s5219_s2 + $0x10] sm:$0xff] }
 0x29d   : > { %1425 = vmatprep.subr.mxu0 %v4570_v41  ;;  %1496 = vmatprep.subr.mxu1 %v4576_v42  ;;  %5919 = vst [vmem:[#allocation95_spill] sm:$0xff] %v4582_v39  ;;  %5920 = vst [vmem:[#allocation96_spill] sm:$0xff] %v4588_v43  ;;  %v4594_v41 = vld [vmem:[%s5219_s2 + $0x3e8] sm:$0xff]  ;;  %v4600_v42 = vld [vmem:[%s5219_s2 + $0x3f8] sm:$0xff] }
 0x29e   : > { %1426 = vmatpush1.msra.mxu0 %v4582_v39  ;;  %1497 = vmatpush1.msra.mxu1 %v4588_v43  ;;  %5921 = vst [vmem:[#allocation97_spill] sm:$0xff] %v4594_v41  ;;  %5922 = vst [vmem:[#allocation98_spill] sm:$0xff] %v4600_v42  ;;  %v4606_v39 = vld [vmem:[%s5219_s2 + $0x3e0] sm:$0xff]  ;;  %v4612_v43 = vld [vmem:[%s5219_s2 + $0x3f0] sm:$0xff] }
 0x29f   : > { %1427 = vmatprep.subr.mxu0 %v4594_v41  ;;  %1498 = vmatprep.subr.mxu1 %v4600_v42  ;;  %5923 = vst [vmem:[#allocation99_spill] sm:$0xff] %v4606_v39  ;;  %5924 = vst [vmem:[#allocation100_spill] sm:$0xff] %v4612_v43  ;;  %v4618_v41 = vld [vmem:[%s5219_s2 + $0x3c8] sm:$0xff]  ;;  %v4624_v42 = vld [vmem:[%s5219_s2 + $0x3d8] sm:$0xff] }
 0x2a0   : > { %1428 = vmatpush2.msra.mxu0 %v4606_v39  ;;  %1499 = vmatpush2.msra.mxu1 %v4612_v43  ;;  %5925 = vst [vmem:[#allocation101_spill] sm:$0xff] %v4618_v41  ;;  %5926 = vst [vmem:[#allocation102_spill] sm:$0xff] %v4624_v42  ;;  %v4630_v39 = vld [vmem:[%s5219_s2 + $0x3c0] sm:$0xff]  ;;  %v4636_v43 = vld [vmem:[%s5219_s2 + $0x3d0] sm:$0xff] }
 0x2a1   : > { %1429 = vmatprep.subr.mxu0 %v4618_v41  ;;  %1500 = vmatprep.subr.mxu1 %v4624_v42  ;;  %5927 = vst [vmem:[#allocation103_spill] sm:$0xff] %v4630_v39  ;;  %5928 = vst [vmem:[#allocation104_spill] sm:$0xff] %v4636_v43  ;;  %v4642_v41 = vld [vmem:[%s5219_s2 + $0x3a8] sm:$0xff]  ;;  %v4648_v42 = vld [vmem:[%s5219_s2 + $0x3b8] sm:$0xff] }
 0x2a2   : > { %1430 = vmatpush2.msra.mxu0 %v4630_v39  ;;  %1501 = vmatpush2.msra.mxu1 %v4636_v43  ;;  %5929 = vst [vmem:[#allocation105_spill] sm:$0xff] %v4642_v41  ;;  %5930 = vst [vmem:[#allocation106_spill] sm:$0xff] %v4648_v42  ;;  %v4654_v39 = vld [vmem:[%s5219_s2 + $0x3a0] sm:$0xff]  ;;  %v4660_v43 = vld [vmem:[%s5219_s2 + $0x3b0] sm:$0xff] }
 0x2a3   : > { %1431 = vmatprep.subr.mxu0 %v4642_v41  ;;  %1502 = vmatprep.subr.mxu1 %v4648_v42  ;;  %5931 = vst [vmem:[#allocation107_spill] sm:$0xff] %v4654_v39  ;;  %5932 = vst [vmem:[#allocation108_spill] sm:$0xff] %v4660_v43  ;;  %v4666_v41 = vld [vmem:[%s5219_s2 + $0x388] sm:$0xff]  ;;  %v4672_v42 = vld [vmem:[%s5219_s2 + $0x398] sm:$0xff] }
 0x2a4   : > { %1432 = vmatpush2.msra.mxu0 %v4654_v39  ;;  %1503 = vmatpush2.msra.mxu1 %v4660_v43  ;;  %5933 = vst [vmem:[#allocation109_spill] sm:$0xff] %v4666_v41  ;;  %5934 = vst [vmem:[#allocation110_spill] sm:$0xff] %v4672_v42  ;;  %v4678_v39 = vld [vmem:[%s5219_s2 + $0x380] sm:$0xff]  ;;  %v4684_v43 = vld [vmem:[%s5219_s2 + $0x390] sm:$0xff] }
 0x2a5   : > { %1433 = vmatprep.subr.mxu0 %v4666_v41  ;;  %1504 = vmatprep.subr.mxu1 %v4672_v42  ;;  %5935 = vst [vmem:[#allocation111_spill] sm:$0xff] %v4678_v39  ;;  %5936 = vst [vmem:[#allocation112_spill] sm:$0xff] %v4684_v43  ;;  %v4690_v41 = vld [vmem:[%s5219_s2 + $0x368] sm:$0xff]  ;;  %v4696_v42 = vld [vmem:[%s5219_s2 + $0x378] sm:$0xff] }
 0x2a6   : > { %1434 = vmatpush2.msra.mxu0 %v4678_v39  ;;  %1505 = vmatpush2.msra.mxu1 %v4684_v43  ;;  %5937 = vst [vmem:[#allocation113_spill] sm:$0xff] %v4690_v41  ;;  %5938 = vst [vmem:[#allocation114_spill] sm:$0xff] %v4696_v42  ;;  %v4702_v39 = vld [vmem:[%s5219_s2 + $0x360] sm:$0xff]  ;;  %v4708_v43 = vld [vmem:[%s5219_s2 + $0x370] sm:$0xff] }
 0x2a7   : > { %1435 = vmatprep.subr.mxu0 %v4690_v41  ;;  %1506 = vmatprep.subr.mxu1 %v4696_v42  ;;  %5939 = vst [vmem:[#allocation115_spill] sm:$0xff] %v4702_v39  ;;  %5940 = vst [vmem:[#allocation116_spill] sm:$0xff] %v4708_v43  ;;  %v4714_v41 = vld [vmem:[%s5219_s2 + $0x348] sm:$0xff]  ;;  %v4720_v42 = vld [vmem:[%s5219_s2 + $0x358] sm:$0xff] }
 0x2a8   : > { %1436 = vmatpush2.msra.mxu0 %v4702_v39  ;;  %1507 = vmatpush2.msra.mxu1 %v4708_v43  ;;  %5941 = vst [vmem:[#allocation117_spill] sm:$0xff] %v4714_v41  ;;  %5942 = vst [vmem:[#allocation118_spill] sm:$0xff] %v4720_v42  ;;  %v4726_v39 = vld [vmem:[%s5219_s2 + $0x340] sm:$0xff]  ;;  %v4732_v43 = vld [vmem:[%s5219_s2 + $0x350] sm:$0xff] }
 0x2a9   : > { %1437 = vmatprep.subr.mxu0 %v4714_v41  ;;  %1508 = vmatprep.subr.mxu1 %v4720_v42  ;;  %5943 = vst [vmem:[#allocation119_spill] sm:$0xff] %v4726_v39  ;;  %5944 = vst [vmem:[#allocation120_spill] sm:$0xff] %v4732_v43  ;;  %v4738_v41 = vld [vmem:[%s5219_s2 + $0x328] sm:$0xff]  ;;  %v4744_v42 = vld [vmem:[%s5219_s2 + $0x338] sm:$0xff] }
 0x2aa   : > { %1438 = vmatpush2.msra.mxu0 %v4726_v39  ;;  %1509 = vmatpush2.msra.mxu1 %v4732_v43  ;;  %5945 = vst [vmem:[#allocation121_spill] sm:$0xff] %v4738_v41  ;;  %5946 = vst [vmem:[#allocation122_spill] sm:$0xff] %v4744_v42  ;;  %v4750_v39 = vld [vmem:[%s5219_s2 + $0x320] sm:$0xff]  ;;  %v4756_v43 = vld [vmem:[%s5219_s2 + $0x330] sm:$0xff] }
 0x2ab   : > { %1439 = vmatprep.subr.mxu0 %v4738_v41  ;;  %1510 = vmatprep.subr.mxu1 %v4744_v42  ;;  %5947 = vst [vmem:[#allocation123_spill] sm:$0xff] %v4750_v39  ;;  %5948 = vst [vmem:[#allocation124_spill] sm:$0xff] %v4756_v43  ;;  %v4762_v41 = vld [vmem:[%s5219_s2 + $0x308] sm:$0xff]  ;;  %v4768_v42 = vld [vmem:[%s5219_s2 + $0x318] sm:$0xff] }
 0x2ac   : > { %1440 = vmatpush2.msra.mxu0 %v4750_v39  ;;  %1511 = vmatpush2.msra.mxu1 %v4756_v43  ;;  %5949 = vst [vmem:[#allocation125_spill] sm:$0xff] %v4762_v41  ;;  %5950 = vst [vmem:[#allocation126_spill] sm:$0xff] %v4768_v42  ;;  %v4774_v39 = vld [vmem:[%s5219_s2 + $0x300] sm:$0xff]  ;;  %v4780_v43 = vld [vmem:[%s5219_s2 + $0x310] sm:$0xff] }
 0x2ad   : > { %1441 = vmatprep.subr.mxu0 %v4762_v41  ;;  %1512 = vmatprep.subr.mxu1 %v4768_v42  ;;  %5951 = vst [vmem:[#allocation127_spill] sm:$0xff] %v4774_v39  ;;  %5952 = vst [vmem:[#allocation128_spill] sm:$0xff] %v4780_v43  ;;  %v4786_v41 = vld [vmem:[%s5219_s2 + $0x2e8] sm:$0xff]  ;;  %v4792_v42 = vld [vmem:[%s5219_s2 + $0x2f8] sm:$0xff] }
 0x2ae   : > { %1442 = vmatpush2.msra.mxu0 %v4774_v39  ;;  %1513 = vmatpush2.msra.mxu1 %v4780_v43  ;;  %5953 = vst [vmem:[#allocation129_spill] sm:$0xff] %v4786_v41  ;;  %5954 = vst [vmem:[#allocation130_spill] sm:$0xff] %v4792_v42  ;;  %v4798_v39 = vld [vmem:[%s5219_s2 + $0x2e0] sm:$0xff]  ;;  %v4804_v43 = vld [vmem:[%s5219_s2 + $0x2f0] sm:$0xff] }
 0x2af   : > { %1443 = vmatprep.subr.mxu0 %v4786_v41  ;;  %1514 = vmatprep.subr.mxu1 %v4792_v42  ;;  %5955 = vst [vmem:[#allocation131_spill] sm:$0xff] %v4798_v39  ;;  %5956 = vst [vmem:[#allocation132_spill] sm:$0xff] %v4804_v43  ;;  %v4810_v41 = vld [vmem:[%s5219_s2 + $0x2c8] sm:$0xff]  ;;  %v4816_v42 = vld [vmem:[%s5219_s2 + $0x2d8] sm:$0xff] }
 0x2b0   : > { %1444 = vmatpush2.msra.mxu0 %v4798_v39  ;;  %1515 = vmatpush2.msra.mxu1 %v4804_v43  ;;  %5957 = vst [vmem:[#allocation133_spill] sm:$0xff] %v4810_v41  ;;  %5958 = vst [vmem:[#allocation134_spill] sm:$0xff] %v4816_v42  ;;  %v4822_v39 = vld [vmem:[%s5219_s2 + $0x2c0] sm:$0xff]  ;;  %v4828_v43 = vld [vmem:[%s5219_s2 + $0x2d0] sm:$0xff] }
 0x2b1   : > { %1445 = vmatprep.subr.mxu0 %v4810_v41  ;;  %1516 = vmatprep.subr.mxu1 %v4816_v42  ;;  %5959 = vst [vmem:[#allocation135_spill] sm:$0xff] %v4822_v39  ;;  %5960 = vst [vmem:[#allocation136_spill] sm:$0xff] %v4828_v43  ;;  %v4834_v41 = vld [vmem:[%s5219_s2 + $0x2a8] sm:$0xff]  ;;  %v4840_v42 = vld [vmem:[%s5219_s2 + $0x2b8] sm:$0xff] }
 0x2b2   : > { %1446 = vmatpush2.msra.mxu0 %v4822_v39  ;;  %1517 = vmatpush2.msra.mxu1 %v4828_v43  ;;  %5961 = vst [vmem:[#allocation137_spill] sm:$0xff] %v4834_v41  ;;  %5962 = vst [vmem:[#allocation138_spill] sm:$0xff] %v4840_v42  ;;  %v4846_v39 = vld [vmem:[%s5219_s2 + $0x2a0] sm:$0xff]  ;;  %v4852_v43 = vld [vmem:[%s5219_s2 + $0x2b0] sm:$0xff] }
 0x2b3   : > { %1447 = vmatprep.subr.mxu0 %v4834_v41  ;;  %1518 = vmatprep.subr.mxu1 %v4840_v42  ;;  %5963 = vst [vmem:[#allocation139_spill] sm:$0xff] %v4846_v39  ;;  %5964 = vst [vmem:[#allocation140_spill] sm:$0xff] %v4852_v43  ;;  %v4858_v41 = vld [vmem:[%s5219_s2 + $0x288] sm:$0xff]  ;;  %v4864_v42 = vld [vmem:[%s5219_s2 + $0x298] sm:$0xff] }
 0x2b4   : > { %1448 = vmatpush2.msra.mxu0 %v4846_v39  ;;  %1519 = vmatpush2.msra.mxu1 %v4852_v43  ;;  %5965 = vst [vmem:[#allocation141_spill] sm:$0xff] %v4858_v41  ;;  %5966 = vst [vmem:[#allocation142_spill] sm:$0xff] %v4864_v42  ;;  %v4870_v39 = vld [vmem:[%s5219_s2 + $0x280] sm:$0xff]  ;;  %v4876_v43 = vld [vmem:[%s5219_s2 + $0x290] sm:$0xff] }
 0x2b5   : > { %1449 = vmatprep.subr.mxu0 %v4858_v41  ;;  %1520 = vmatprep.subr.mxu1 %v4864_v42  ;;  %5967 = vst [vmem:[#allocation143_spill] sm:$0xff] %v4870_v39  ;;  %5968 = vst [vmem:[#allocation144_spill] sm:$0xff] %v4876_v43  ;;  %v4882_v41 = vld [vmem:[%s5219_s2 + $0x268] sm:$0xff]  ;;  %v4888_v42 = vld [vmem:[%s5219_s2 + $0x278] sm:$0xff] }
 0x2b6   : > { %1450 = vmatpush2.msra.mxu0 %v4870_v39  ;;  %1521 = vmatpush2.msra.mxu1 %v4876_v43  ;;  %5969 = vst [vmem:[#allocation145_spill] sm:$0xff] %v4882_v41  ;;  %5970 = vst [vmem:[#allocation146_spill] sm:$0xff] %v4888_v42  ;;  %v4894_v39 = vld [vmem:[%s5219_s2 + $0x260] sm:$0xff]  ;;  %v4900_v43 = vld [vmem:[%s5219_s2 + $0x270] sm:$0xff] }
 0x2b7   : > { %1451 = vmatprep.subr.mxu0 %v4882_v41  ;;  %1522 = vmatprep.subr.mxu1 %v4888_v42  ;;  %5971 = vst [vmem:[#allocation147_spill] sm:$0xff] %v4894_v39  ;;  %5972 = vst [vmem:[#allocation148_spill] sm:$0xff] %v4900_v43  ;;  %v4906_v41 = vld [vmem:[%s5219_s2 + $0x248] sm:$0xff]  ;;  %v4912_v42 = vld [vmem:[%s5219_s2 + $0x258] sm:$0xff] }
 0x2b8   : > { %1452 = vmatpush2.msra.mxu0 %v4894_v39  ;;  %1523 = vmatpush2.msra.mxu1 %v4900_v43  ;;  %5973 = vst [vmem:[#allocation149_spill] sm:$0xff] %v4906_v41  ;;  %5974 = vst [vmem:[#allocation150_spill] sm:$0xff] %v4912_v42  ;;  %v4918_v39 = vld [vmem:[%s5219_s2 + $0x240] sm:$0xff]  ;;  %v4924_v43 = vld [vmem:[%s5219_s2 + $0x250] sm:$0xff] }
 0x2b9   : > { %1453 = vmatprep.subr.mxu0 %v4906_v41  ;;  %1524 = vmatprep.subr.mxu1 %v4912_v42  ;;  %5975 = vst [vmem:[#allocation151_spill] sm:$0xff] %v4918_v39  ;;  %5976 = vst [vmem:[#allocation152_spill] sm:$0xff] %v4924_v43  ;;  %v4930_v41 = vld [vmem:[%s5219_s2 + $0x228] sm:$0xff]  ;;  %v4936_v42 = vld [vmem:[%s5219_s2 + $0x238] sm:$0xff] }
 0x2ba   : > { %1454 = vmatpush2.msra.mxu0 %v4918_v39  ;;  %1525 = vmatpush2.msra.mxu1 %v4924_v43  ;;  %5977 = vst [vmem:[#allocation153_spill] sm:$0xff] %v4930_v41  ;;  %5978 = vst [vmem:[#allocation154_spill] sm:$0xff] %v4936_v42  ;;  %v4942_v39 = vld [vmem:[%s5219_s2 + $0x220] sm:$0xff]  ;;  %v4948_v43 = vld [vmem:[%s5219_s2 + $0x230] sm:$0xff] }
 0x2bb   : > { %1455 = vmatprep.subr.mxu0 %v4930_v41  ;;  %1526 = vmatprep.subr.mxu1 %v4936_v42  ;;  %5979 = vst [vmem:[#allocation155_spill] sm:$0xff] %v4942_v39  ;;  %5980 = vst [vmem:[#allocation156_spill] sm:$0xff] %v4948_v43  ;;  %v4954_v41 = vld [vmem:[%s5219_s2 + $0x208] sm:$0xff]  ;;  %v4960_v42 = vld [vmem:[%s5219_s2 + $0x218] sm:$0xff] }
 0x2bc   : > { %1456 = vmatpush2.msra.mxu0 %v4942_v39  ;;  %1527 = vmatpush2.msra.mxu1 %v4948_v43  ;;  %5981 = vst [vmem:[#allocation157_spill] sm:$0xff] %v4954_v41  ;;  %5982 = vst [vmem:[#allocation158_spill] sm:$0xff] %v4960_v42  ;;  %v4966_v39 = vld [vmem:[%s5219_s2 + $0x200] sm:$0xff]  ;;  %v4972_v43 = vld [vmem:[%s5219_s2 + $0x210] sm:$0xff] }
 0x2bd   : > { %1457 = vmatprep.subr.mxu0 %v4954_v41  ;;  %1528 = vmatprep.subr.mxu1 %v4960_v42  ;;  %5983 = vst [vmem:[#allocation159_spill] sm:$0xff] %v4966_v39  ;;  %5984 = vst [vmem:[#allocation160_spill] sm:$0xff] %v4972_v43 }
 0x2be   : > { %1458 = vmatpush2.msra.mxu0 %v4966_v39  ;;  %1529 = vmatpush2.msra.mxu1 %v4972_v43 }
 0x2bf   : > { %1563 = vmatprep.subr.mxu0 %v3789_v30  ;;  %1634 = vmatprep.subr.mxu1 %v3795_v31 }
 0x31d   : > { %v1097_v41 = vpop.f32.mrf.mxu0  ;;  %v1168_v39 = vpop.f32.mrf.mxu1 }
 0x31e   : > { %v1098_v42 = vadd.f32 %v1097_v41, %v3803_v36  ;;  %v1169_v30 = vadd.f32 %v1168_v39, %v3814_v1 }
 0x31f   : > { %v1099_v22 = vpop.f32.mrf.mxu0  ;;  %v1170_v33 = vpop.f32.mrf.mxu1 }
 0x320   : > { %v2001_v38 = vmul.f32 -1.442695, %v1098_v42  ;;  %v1100_v35 = vadd.f32 %v1099_v22, %v3805_v37  ;;  %v1171_v32 = vadd.f32 %v1170_v33, %v3810_v46 }
 0x322   : > { %2083 = vpow2.f32 %v2001_v38  ;;  %v2002_v34 = vmul.f32 -1.442695, %v1100_v35  ;;  %v2003_v29 = vmul.f32 -1.442695, %v1171_v32 }
 0x324   : > { %2085 = vpow2.f32 %v2002_v34 }
 0x325   : > { %2087 = vpow2.f32 %v2003_v29 }
 0x32f   : > { %v2084_v43 = vpop.eup %2083 }
 0x330   : > { %v1176_v28 = vadd.f32 1.0, %v2084_v43 }
 0x331   : > { %v2086_v31 = vpop.eup %2085 }
 0x332   : > { %2089 = vrcp.f32 %v1176_v28  ;;  %v1182_v41 = vadd.f32 1.0, %v2086_v31  ;;  %v2088_v22 = vpop.eup %2087 }
 0x333   : > { %2091 = vtanh.f32 %v1169_v30  ;;  %v1189_v32 = vadd.f32 1.0, %v2088_v22  ;;  %v2004_v30 = vld [vmem:[%s2418_s28 + $0x10] sm:$0xff] }
 0x334   : > { %2093 = vrcp.f32 %v1182_v41 }
 0x335   : > { %2095 = vrcp.f32 %v1189_v32 }
 0x33e   : > { %v1265_v38 = vpop.f32.mrf.mxu0  ;;  %v1336_v42 = vpop.f32.mrf.mxu1 }
 0x33f   : > { %v2090_v35 = vpop.eup %2089 }
 0x340   : > { %v2092_v34 = vpop.eup %2091  ;;  %v1267_v37 = vpop.f32.mrf.mxu0 }
 0x341   : > { %v1338_v36 = vpop.f32.mrf.mxu1  ;;  %v2094_v33 = vpop.eup %2093  ;;  %v1345_v46 = vcombine.low %v1265_v38, %v1267_v37  ;;  %v1193_v39 = vmul.f32 %v2092_v34, %v2090_v35 }
 0x342   : > { %v1346_v27 = vcombine.low %v1336_v42, %v1338_v36  ;;  %v1192_v43 = vmul.f32 %v2094_v33, %v3820_v12  ;;  %v2096_v36 = vpop.eup %2095 }
 0x343   : > { %v1353_v28 = vrot.slane %v1345_v46, %v3580_v59 }
 0x344   : > { %v1360_v29 = vrot.slane %v1346_v27, %v3580_v59  ;;  %v4985_v31 = vadd.f32 %v1193_v39, %v1192_v43 }
 0x346   : > { %v1361_v41 = vcombine.low %v1353_v28, %v1360_v29  ;;  %2097 = vtanh.f32 %v4985_v31 }
 0x348   : > { %v1363_v1 = vadd.f32 %v2004_v30, %v1361_v41 }
 0x34a   : > { %v2005_v26 = vmul.f32 -1.442695, %v1363_v1  ;;  %v1371_v25 = vrot.slane %v1363_v1, 2  ;;  %v1382_v22 = vrot.slane %v1363_v1, 6  ;;  %v1379_v42 = vrot.slane %v1363_v1, 4 }
 0x34c   : > { %2099 = vpow2.f32 %v2005_v26  ;;  %v2006_v37 = vmul.f32 -1.442695, %v1371_v25  ;;  %v2007_v46 = vmul.f32 -1.442695, %v1382_v22  ;;  %v6027_v22 = vld [vmem:[#allocation52_spill] sm:$0xff] }
 0x34e   : > { %2101 = vpow2.f32 %v2006_v37 }
 0x34f   : > { %2103 = vpow2.f32 %v2007_v46  ;;  %v6030_v46 = vld [vmem:[#allocation55_spill] sm:$0xff] }
 0x353   : > { %v2098_v12 = vpop.eup %2097 }
 0x354   : > { %v1196_v38 = vmul.f32 %v2098_v12, %v2096_v36  ;;  %v6026_v36 = vld [vmem:[#allocation51_spill] sm:$0xff]  ;;  %v6028_v12 = vld [vmem:[#allocation53_spill] sm:$0xff] }
 0x356   : > { %1459 = vmatprep.mubr.f32.mxu0 %v1196_v38  ;;  %1530 = vmatprep.mubr.f32.mxu1 %v1196_v38  ;;  %v6029_v38 = vld [vmem:[#allocation54_spill] sm:$0xff] }
 0x359   : > { %v2100_v27 = vpop.eup %2099 }
 0x35a   : > { %v1367_v35 = vadd.f32 1.0, %v2100_v27  ;;  %v6031_v27 = vld [vmem:[#allocation56_spill] sm:$0xff] }
 0x35b   : > { %v2102_v34 = vpop.eup %2101 }
 0x35c   : > { %2105 = vrcp.f32 %v1367_v35  ;;  %v1376_v33 = vadd.f32 1.0, %v2102_v34  ;;  %v2104_v32 = vpop.eup %2103  ;;  %v6033_v35 = vld [vmem:[#allocation58_spill] sm:$0xff]  ;;  %v6034_v34 = vld [vmem:[#allocation59_spill] sm:$0xff] }
 0x35d   : > { %2107 = vtanh.f32 %v1379_v42  ;;  %v1387_v43 = vadd.f32 1.0, %v2104_v32  ;;  %v6032_v42 = vld [vmem:[#allocation57_spill] sm:$0xff] }
 0x35e   : > { %2109 = vrcp.f32 %v1376_v33  ;;  %v6035_v33 = vld [vmem:[#allocation60_spill] sm:$0xff]  ;;  %v6036_v32 = vld [vmem:[#allocation61_spill] sm:$0xff] }
 0x35f   : > { %2111 = vrcp.f32 %v1387_v43  ;;  %v6040_v43 = vld [vmem:[#allocation65_spill] sm:$0xff] }
 0x369   : > { %v2106_v26 = vpop.eup %2105 }
 0x36a   : > { %v2108_v25 = vpop.eup %2107 }
 0x36b   : > { %v2110_v39 = vpop.eup %2109  ;;  %v1391_v29 = vmul.f32 %v2108_v25, %v2106_v26  ;;  %v6037_v26 = vld [vmem:[#allocation62_spill] sm:$0xff]  ;;  %v6038_v25 = vld [vmem:[#allocation63_spill] sm:$0xff] }
 0x36c   : > { %v1390_v28 = vmul.f32 %v2110_v39, %v3824_v40  ;;  %v2112_v1 = vpop.eup %2111  ;;  %v5985_v40 = vld [vmem:[#allocation11_spill] sm:$0xff]  ;;  %v6039_v39 = vld [vmem:[#allocation64_spill] sm:$0xff] }
 0x36e   : > { %v4989_v30 = vadd.f32 %v1391_v29, %v1390_v28  ;;  %v6041_v28 = vld [vmem:[#allocation66_spill] sm:$0xff]  ;;  %v6042_v29 = vld [vmem:[#allocation67_spill] sm:$0xff] }
 0x370   : > { %2113 = vtanh.f32 %v4989_v30 }
 0x37d   : > { %v2114_v41 = vpop.eup %2113 }
 0x37e   : > { %v4992_v37 = vmul.f32 %v2114_v41, %v2112_v1  ;;  %v6043_v1 = vld [vmem:[#allocation68_spill] sm:$0xff]  ;;  %v6044_v41 = vld [vmem:[#allocation69_spill] sm:$0xff] }
 0x380   : > { %1460 = vmatmul.mubr.f32.vlgmr.msra.gmra.mxu0 %v4992_v37  ;;  %1531 = vmatmul.mubr.f32.vlgmr.msra.gmra.mxu1 %v4992_v37 }
 0x381   : > { %1564 = vmatpush1.msra.mxu0 %v3834_v44  ;;  %1635 = vmatpush1.msra.mxu1 %v3840_v3  ;;  %v5986_v44 = vld [vmem:[#allocation12_spill] sm:$0xff]  ;;  %v5987_v3 = vld [vmem:[#allocation13_spill] sm:$0xff] }
 0x382   : > { %1565 = vmatprep.subr.mxu0 %v3846_v45  ;;  %1636 = vmatprep.subr.mxu1 %v3852_v47  ;;  %v5988_v45 = vld [vmem:[#allocation14_spill] sm:$0xff]  ;;  %v5989_v47 = vld [vmem:[#allocation15_spill] sm:$0xff] }
 0x383   : > { %1566 = vmatpush1.msra.mxu0 %v3858_v48  ;;  %1637 = vmatpush1.msra.mxu1 %v3864_v60  ;;  %v5990_v48 = vld [vmem:[#allocation16_spill] sm:$0xff]  ;;  %v5991_v60 = vld [vmem:[#allocation17_spill] sm:$0xff] }
 0x384   : > { %1567 = vmatprep.subr.mxu0 %v3870_v58  ;;  %1638 = vmatprep.subr.mxu1 %v3876_v62  ;;  %v5992_v58 = vld [vmem:[#allocation18_spill] sm:$0xff]  ;;  %v5993_v62 = vld [vmem:[#allocation19_spill] sm:$0xff] }
 0x385   : > { %1568 = vmatpush1.msra.mxu0 %v3882_v56  ;;  %1639 = vmatpush1.msra.mxu1 %v3888_v55  ;;  %v5994_v56 = vld [vmem:[#allocation20_spill] sm:$0xff]  ;;  %v5995_v55 = vld [vmem:[#allocation21_spill] sm:$0xff] }
 0x386   : > { %1569 = vmatprep.subr.mxu0 %v3894_v54  ;;  %1640 = vmatprep.subr.mxu1 %v3900_v61  ;;  %v5996_v54 = vld [vmem:[#allocation22_spill] sm:$0xff]  ;;  %v5997_v61 = vld [vmem:[#allocation23_spill] sm:$0xff] }
 0x387   : > { %1570 = vmatpush1.msra.mxu0 %v3906_v53  ;;  %1641 = vmatpush1.msra.mxu1 %v3912_v52  ;;  %v5998_v53 = vld [vmem:[#allocation24_spill] sm:$0xff]  ;;  %v5999_v52 = vld [vmem:[#allocation25_spill] sm:$0xff] }
 0x388   : > { %1571 = vmatprep.subr.mxu0 %v3918_v63  ;;  %1642 = vmatprep.subr.mxu1 %v3924_v0  ;;  %v6000_v63 = vld [vmem:[#allocation26_spill] sm:$0xff]  ;;  %v6001_v0 = vld [vmem:[#allocation27_spill] sm:$0xff] }
 0x389   : > { %1572 = vmatpush1.msra.mxu0 %v3930_v57  ;;  %1643 = vmatpush1.msra.mxu1 %v3936_v2  ;;  %v6002_v57 = vld [vmem:[#allocation28_spill] sm:$0xff]  ;;  %v6003_v2 = vld [vmem:[#allocation29_spill] sm:$0xff] }
 0x38a   : > { %1573 = vmatprep.subr.mxu0 %v3942_v50  ;;  %1644 = vmatprep.subr.mxu1 %v3948_v51  ;;  %v6004_v50 = vld [vmem:[#allocation30_spill] sm:$0xff]  ;;  %v6005_v51 = vld [vmem:[#allocation31_spill] sm:$0xff] }
 0x38b   : > { %1574 = vmatpush1.msra.mxu0 %v3954_v49  ;;  %1645 = vmatpush1.msra.mxu1 %v3960_v4  ;;  %v6006_v49 = vmov 0.0   ;;  %v6007_v4 = vld [vmem:[#allocation32_spill] sm:$0xff] }
 0x38c   : > { %1575 = vmatprep.subr.mxu0 %v3966_v5  ;;  %1646 = vmatprep.subr.mxu1 %v3972_v6  ;;  %v6008_v5 = vld [vmem:[#allocation33_spill] sm:$0xff]  ;;  %v6009_v6 = vld [vmem:[#allocation34_spill] sm:$0xff] }
 0x38d   : > { %1576 = vmatpush1.msra.mxu0 %v3978_v7  ;;  %1647 = vmatpush1.msra.mxu1 %v3984_v8  ;;  %v6010_v7 = vld [vmem:[#allocation35_spill] sm:$0xff]  ;;  %v6011_v8 = vld [vmem:[#allocation36_spill] sm:$0xff] }
 0x38e   : > { %1577 = vmatprep.subr.mxu0 %v3990_v9  ;;  %1648 = vmatprep.subr.mxu1 %v3996_v10  ;;  %v6012_v9 = vld [vmem:[#allocation37_spill] sm:$0xff]  ;;  %v6013_v10 = vld [vmem:[#allocation38_spill] sm:$0xff] }
 0x38f   : > { %1578 = vmatpush1.msra.mxu0 %v4002_v11  ;;  %1649 = vmatpush1.msra.mxu1 %v4008_v13  ;;  %v6014_v11 = vld [vmem:[#allocation39_spill] sm:$0xff]  ;;  %v6015_v13 = vld [vmem:[#allocation40_spill] sm:$0xff] }
 0x390   : > { %1579 = vmatprep.subr.mxu0 %v4014_v14  ;;  %1650 = vmatprep.subr.mxu1 %v4020_v15  ;;  %v6016_v14 = vld [vmem:[#allocation41_spill] sm:$0xff]  ;;  %v6017_v15 = vld [vmem:[#allocation42_spill] sm:$0xff] }
 0x391   : > { %1580 = vmatpush1.msra.mxu0 %v4026_v16  ;;  %1651 = vmatpush1.msra.mxu1 %v4032_v17  ;;  %v6018_v16 = vld [vmem:[#allocation43_spill] sm:$0xff]  ;;  %v6019_v17 = vld [vmem:[#allocation44_spill] sm:$0xff] }
 0x392   : > { %1581 = vmatprep.subr.mxu0 %v4038_v18  ;;  %1652 = vmatprep.subr.mxu1 %v4044_v19  ;;  %v6020_v18 = vld [vmem:[#allocation45_spill] sm:$0xff]  ;;  %v6021_v19 = vld [vmem:[#allocation46_spill] sm:$0xff] }
 0x393   : > { %1582 = vmatpush1.msra.mxu0 %v4050_v20  ;;  %1653 = vmatpush1.msra.mxu1 %v4056_v21  ;;  %v6022_v20 = vld [vmem:[#allocation47_spill] sm:$0xff]  ;;  %v6023_v21 = vld [vmem:[#allocation48_spill] sm:$0xff] }
 0x394   : > { %1583 = vmatprep.subr.mxu0 %v4062_v23  ;;  %1654 = vmatprep.subr.mxu1 %v4068_v24  ;;  %v6024_v23 = vld [vmem:[#allocation49_spill] sm:$0xff]  ;;  %v6025_v24 = vld [vmem:[#allocation50_spill] sm:$0xff] }
 0x395   : > { %1584 = vmatpush1.msra.mxu0 %v5985_v40  ;;  %1655 = vmatpush1.msra.mxu1 %v5986_v44  ;;  %v6046_v40 = vld [vmem:[#allocation71_spill] sm:$0xff]  ;;  %v6047_v44 = vld [vmem:[#allocation72_spill] sm:$0xff] }
 0x396   : > { %1585 = vmatprep.subr.mxu0 %v5987_v3  ;;  %1656 = vmatprep.subr.mxu1 %v5988_v45  ;;  %v6048_v3 = vld [vmem:[#allocation73_spill] sm:$0xff]  ;;  %v6049_v45 = vld [vmem:[#allocation74_spill] sm:$0xff] }
 0x397   : > { %1586 = vmatpush1.msra.mxu0 %v5989_v47  ;;  %1657 = vmatpush1.msra.mxu1 %v5990_v48  ;;  %v6050_v47 = vld [vmem:[#allocation75_spill] sm:$0xff]  ;;  %v6051_v48 = vld [vmem:[#allocation76_spill] sm:$0xff] }
 0x398   : > { %1587 = vmatprep.subr.mxu0 %v5991_v60  ;;  %1658 = vmatprep.subr.mxu1 %v5992_v58  ;;  %v6052_v60 = vld [vmem:[#allocation77_spill] sm:$0xff]  ;;  %v6053_v58 = vld [vmem:[#allocation78_spill] sm:$0xff] }
 0x399   : > { %1588 = vmatpush1.msra.mxu0 %v5993_v62  ;;  %1659 = vmatpush1.msra.mxu1 %v5994_v56  ;;  %v6054_v62 = vld [vmem:[#allocation79_spill] sm:$0xff]  ;;  %v6055_v56 = vld [vmem:[#allocation80_spill] sm:$0xff] }
 0x39a   : > { %1589 = vmatprep.subr.mxu0 %v5995_v55  ;;  %1660 = vmatprep.subr.mxu1 %v5996_v54  ;;  %v6056_v55 = vld [vmem:[#allocation81_spill] sm:$0xff]  ;;  %v6057_v54 = vld [vmem:[#allocation82_spill] sm:$0xff] }
 0x39b   : > { %1590 = vmatpush1.msra.mxu0 %v5997_v61  ;;  %1661 = vmatpush1.msra.mxu1 %v5998_v53  ;;  %v6058_v61 = vld [vmem:[#allocation83_spill] sm:$0xff]  ;;  %v6059_v53 = vld [vmem:[#allocation84_spill] sm:$0xff] }
 0x39c   : > { %1591 = vmatprep.subr.mxu0 %v5999_v52  ;;  %1662 = vmatprep.subr.mxu1 %v6000_v63  ;;  %v6060_v52 = vld [vmem:[#allocation85_spill] sm:$0xff]  ;;  %v6061_v63 = vld [vmem:[#allocation86_spill] sm:$0xff] }
 0x39d   : > { %1592 = vmatpush1.msra.mxu0 %v6001_v0  ;;  %1663 = vmatpush1.msra.mxu1 %v6002_v57  ;;  %v6062_v0 = vld [vmem:[#allocation87_spill] sm:$0xff]  ;;  %v6063_v57 = vld [vmem:[#allocation88_spill] sm:$0xff] }
 0x39e   : > { %1593 = vmatprep.subr.mxu0 %v6003_v2  ;;  %1664 = vmatprep.subr.mxu1 %v6004_v50  ;;  %v6064_v2 = vld [vmem:[#allocation89_spill] sm:$0xff]  ;;  %v6065_v50 = vld [vmem:[#allocation90_spill] sm:$0xff] }
 0x39f   : > { %1594 = vmatpush1.msra.mxu0 %v6005_v51  ;;  %1627 = vmatprep.mubr.f32.mxu0 %v6006_v49  ;;  %v6066_v51 = vld [vmem:[#allocation91_spill] sm:$0xff] }
 0x3a0   : > { %1665 = vmatpush1.msra.mxu1 %v6007_v4  ;;  %1698 = vmatprep.mubr.f32.mxu1 %v6006_v49  ;;  %v6067_v49 = vld [vmem:[#allocation92_spill] sm:$0xff]  ;;  %v6068_v4 = vld [vmem:[#allocation93_spill] sm:$0xff] }
 0x3a1   : > { %1628 = vmatmul.mubr.f32.vlgmr.msra.gmra.mxu0 %v4992_v37  ;;  %1699 = vmatmul.mubr.f32.vlgmr.msra.gmra.mxu1 %v4992_v37  ;;  %v6045_v37 = vld [vmem:[#allocation70_spill] sm:$0xff] }
 0x3a2   : > { %1759 = vmatprep.subr.mxu0 %v6008_v5  ;;  %1830 = vmatprep.subr.mxu1 %v6009_v6  ;;  %v6069_v5 = vld [vmem:[#allocation94_spill] sm:$0xff]  ;;  %v6070_v6 = vld [vmem:[#allocation95_spill] sm:$0xff] }
 0x3a3   : > { %1760 = vmatpush1.msra.mxu0 %v6010_v7  ;;  %1831 = vmatpush1.msra.mxu1 %v6011_v8  ;;  %v6071_v7 = vld [vmem:[#allocation96_spill] sm:$0xff]  ;;  %v6072_v8 = vld [vmem:[#allocation97_spill] sm:$0xff] }
 0x3a4   : > { %1761 = vmatprep.subr.mxu0 %v6012_v9  ;;  %1832 = vmatprep.subr.mxu1 %v6013_v10  ;;  %v6073_v9 = vld [vmem:[#allocation98_spill] sm:$0xff]  ;;  %v6074_v10 = vld [vmem:[#allocation99_spill] sm:$0xff] }
 0x3a5   : > { %1762 = vmatpush1.msra.mxu0 %v6014_v11  ;;  %1833 = vmatpush1.msra.mxu1 %v6015_v13  ;;  %v6075_v11 = vld [vmem:[#allocation100_spill] sm:$0xff]  ;;  %v6076_v13 = vld [vmem:[#allocation101_spill] sm:$0xff] }
 0x3a6   : > { %1763 = vmatprep.subr.mxu0 %v6016_v14  ;;  %1834 = vmatprep.subr.mxu1 %v6017_v15  ;;  %v6077_v14 = vld [vmem:[#allocation102_spill] sm:$0xff]  ;;  %v6078_v15 = vld [vmem:[#allocation103_spill] sm:$0xff] }
 0x3a7   : > { %1764 = vmatpush1.msra.mxu0 %v6018_v16  ;;  %1835 = vmatpush1.msra.mxu1 %v6019_v17  ;;  %v6079_v16 = vld [vmem:[#allocation104_spill] sm:$0xff]  ;;  %v6080_v17 = vld [vmem:[#allocation105_spill] sm:$0xff] }
 0x3a8   : > { %1765 = vmatprep.subr.mxu0 %v6020_v18  ;;  %1836 = vmatprep.subr.mxu1 %v6021_v19  ;;  %v6081_v18 = vld [vmem:[#allocation106_spill] sm:$0xff]  ;;  %v6082_v19 = vld [vmem:[#allocation107_spill] sm:$0xff] }
 0x3a9   : > { %1766 = vmatpush1.msra.mxu0 %v6022_v20  ;;  %1837 = vmatpush1.msra.mxu1 %v6023_v21  ;;  %v6083_v20 = vld [vmem:[#allocation108_spill] sm:$0xff]  ;;  %v6084_v21 = vld [vmem:[#allocation109_spill] sm:$0xff] }
 0x3aa   : > { %1767 = vmatprep.subr.mxu0 %v6024_v23  ;;  %1838 = vmatprep.subr.mxu1 %v6025_v24  ;;  %v6085_v23 = vld [vmem:[#allocation110_spill] sm:$0xff]  ;;  %v6086_v24 = vld [vmem:[#allocation111_spill] sm:$0xff] }
 0x3ab   : > { %1768 = vmatpush1.msra.mxu0 %v6026_v36  ;;  %1839 = vmatpush1.msra.mxu1 %v6027_v22  ;;  %v6087_v36 = vld [vmem:[#allocation112_spill] sm:$0xff]  ;;  %v6088_v22 = vld [vmem:[#allocation113_spill] sm:$0xff] }
 0x3ac   : > { %1769 = vmatprep.subr.mxu0 %v6028_v12  ;;  %1840 = vmatprep.subr.mxu1 %v6029_v38  ;;  %v6089_v12 = vld [vmem:[#allocation114_spill] sm:$0xff]  ;;  %v6090_v38 = vld [vmem:[#allocation115_spill] sm:$0xff] }
 0x3ad   : > { %1770 = vmatpush1.msra.mxu0 %v6030_v46  ;;  %1841 = vmatpush1.msra.mxu1 %v6031_v27  ;;  %v6091_v46 = vld [vmem:[#allocation116_spill] sm:$0xff]  ;;  %v6092_v27 = vld [vmem:[#allocation117_spill] sm:$0xff] }
 0x3ae   : > { %1771 = vmatprep.subr.mxu0 %v6032_v42  ;;  %1842 = vmatprep.subr.mxu1 %v6033_v35  ;;  %v6093_v42 = vld [vmem:[#allocation118_spill] sm:$0xff]  ;;  %v6094_v35 = vld [vmem:[#allocation119_spill] sm:$0xff] }
 0x3af   : > { %1772 = vmatpush1.msra.mxu0 %v6034_v34  ;;  %1843 = vmatpush1.msra.mxu1 %v6035_v33  ;;  %v6095_v34 = vld [vmem:[#allocation120_spill] sm:$0xff]  ;;  %v6096_v33 = vld [vmem:[#allocation121_spill] sm:$0xff] }
 0x3b0   : > { %1773 = vmatprep.subr.mxu0 %v6036_v32  ;;  %1844 = vmatprep.subr.mxu1 %v6037_v26  ;;  %v6097_v32 = vld [vmem:[#allocation122_spill] sm:$0xff]  ;;  %v6098_v26 = vld [vmem:[#allocation123_spill] sm:$0xff] }
 0x3b1   : > { %1774 = vmatpush1.msra.mxu0 %v6038_v25  ;;  %1845 = vmatpush1.msra.mxu1 %v6039_v39  ;;  %v6099_v25 = vld [vmem:[#allocation124_spill] sm:$0xff]  ;;  %v6100_v39 = vld [vmem:[#allocation125_spill] sm:$0xff] }
 0x3b2   : > { %1775 = vmatprep.subr.mxu0 %v6040_v43  ;;  %1846 = vmatprep.subr.mxu1 %v6041_v28  ;;  %v6101_v43 = vld [vmem:[#allocation126_spill] sm:$0xff]  ;;  %v6102_v28 = vld [vmem:[#allocation127_spill] sm:$0xff] }
 0x3b3   : > { %1776 = vmatpush1.msra.mxu0 %v6042_v29  ;;  %1847 = vmatpush1.msra.mxu1 %v6043_v1  ;;  %v6103_v29 = vld [vmem:[#allocation128_spill] sm:$0xff]  ;;  %v6104_v1 = vld [vmem:[#allocation129_spill] sm:$0xff] }
 0x3b4   : > { %1777 = vmatprep.subr.mxu0 %v6044_v41  ;;  %1848 = vmatprep.subr.mxu1 %v6045_v37  ;;  %v6105_v41 = vld [vmem:[#allocation130_spill] sm:$0xff]  ;;  %v6106_v37 = vld [vmem:[#allocation131_spill] sm:$0xff] }
 0x3b5   : > { %1778 = vmatpush1.msra.mxu0 %v6046_v40  ;;  %1849 = vmatpush1.msra.mxu1 %v6047_v44  ;;  %v6107_v40 = vld [vmem:[#allocation132_spill] sm:$0xff]  ;;  %v6108_v44 = vld [vmem:[#allocation133_spill] sm:$0xff] }
 0x3b6   : > { %1779 = vmatprep.subr.mxu0 %v6048_v3  ;;  %1850 = vmatprep.subr.mxu1 %v6049_v45  ;;  %v6109_v3 = vld [vmem:[#allocation134_spill] sm:$0xff]  ;;  %v6110_v45 = vld [vmem:[#allocation135_spill] sm:$0xff] }
 0x3b7   : > { %1780 = vmatpush1.msra.mxu0 %v6050_v47  ;;  %1851 = vmatpush1.msra.mxu1 %v6051_v48  ;;  %v6111_v47 = vld [vmem:[#allocation136_spill] sm:$0xff]  ;;  %v6112_v48 = vld [vmem:[#allocation137_spill] sm:$0xff] }
 0x3b8   : > { %1781 = vmatprep.subr.mxu0 %v6052_v60  ;;  %1852 = vmatprep.subr.mxu1 %v6053_v58  ;;  %v6113_v60 = vld [vmem:[#allocation138_spill] sm:$0xff]  ;;  %v6114_v58 = vld [vmem:[#allocation139_spill] sm:$0xff] }
 0x3b9   : > { %1782 = vmatpush1.msra.mxu0 %v6054_v62  ;;  %1853 = vmatpush1.msra.mxu1 %v6055_v56  ;;  %v6115_v62 = vld [vmem:[#allocation140_spill] sm:$0xff]  ;;  %v6116_v56 = vld [vmem:[#allocation141_spill] sm:$0xff] }
 0x3ba   : > { %1783 = vmatprep.subr.mxu0 %v6056_v55  ;;  %1854 = vmatprep.subr.mxu1 %v6057_v54  ;;  %v6117_v55 = vld [vmem:[#allocation142_spill] sm:$0xff]  ;;  %v6118_v54 = vld [vmem:[#allocation143_spill] sm:$0xff] }
 0x3bb   : > { %1784 = vmatpush1.msra.mxu0 %v6058_v61  ;;  %1855 = vmatpush1.msra.mxu1 %v6059_v53  ;;  %v6119_v61 = vld [vmem:[#allocation144_spill] sm:$0xff]  ;;  %v6120_v53 = vld [vmem:[#allocation145_spill] sm:$0xff] }
 0x3bc   : > { %1785 = vmatprep.subr.mxu0 %v6060_v52  ;;  %1856 = vmatprep.subr.mxu1 %v6061_v63  ;;  %v6121_v52 = vld [vmem:[#allocation146_spill] sm:$0xff]  ;;  %v6122_v63 = vld [vmem:[#allocation147_spill] sm:$0xff] }
 0x3bd   : > { %1786 = vmatpush1.msra.mxu0 %v6062_v0  ;;  %1857 = vmatpush1.msra.mxu1 %v6063_v57  ;;  %v6123_v0 = vld [vmem:[#allocation148_spill] sm:$0xff]  ;;  %v6124_v57 = vld [vmem:[#allocation149_spill] sm:$0xff] }
 0x3be   : > { %1787 = vmatprep.subr.mxu0 %v6064_v2  ;;  %1858 = vmatprep.subr.mxu1 %v6065_v50  ;;  %v6125_v2 = vld [vmem:[#allocation150_spill] sm:$0xff]  ;;  %v6126_v50 = vld [vmem:[#allocation151_spill] sm:$0xff] }
 0x3bf   : > { %1788 = vmatpush1.msra.mxu0 %v6066_v51  ;;  %1859 = vmatpush1.msra.mxu1 %v6067_v49  ;;  %v6127_v51 = vld [vmem:[#allocation152_spill] sm:$0xff]  ;;  %v6128_v49 = vld [vmem:[#allocation153_spill] sm:$0xff] }
 0x3c0   : > { %1789 = vmatprep.subr.mxu0 %v6068_v4  ;;  %1860 = vmatprep.subr.mxu1 %v6069_v5  ;;  %v6129_v4 = vld [vmem:[#allocation154_spill] sm:$0xff]  ;;  %v6130_v5 = vld [vmem:[#allocation155_spill] sm:$0xff] }
 0x3c1   : > { %1790 = vmatpush1.msra.mxu0 %v6070_v6  ;;  %1861 = vmatpush1.msra.mxu1 %v6071_v7  ;;  %v6131_v6 = vld [vmem:[#allocation156_spill] sm:$0xff]  ;;  %v6132_v7 = vld [vmem:[#allocation157_spill] sm:$0xff] }
 0x3c2   : > { %1791 = vmatprep.subr.mxu0 %v6072_v8  ;;  %1862 = vmatprep.subr.mxu1 %v6073_v9  ;;  %v6133_v8 = vld [vmem:[#allocation158_spill] sm:$0xff]  ;;  %v6134_v9 = vld [vmem:[#allocation159_spill] sm:$0xff] }
 0x3c3   : > { %1792 = vmatpush2.msra.mxu0 %v6074_v10  ;;  %1863 = vmatpush2.msra.mxu1 %v6075_v11  ;;  %v6135_v10 = vld [vmem:[#allocation160_spill] sm:$0xff] }
 0x3c4   : > { %1793 = vmatprep.subr.mxu0 %v6076_v13  ;;  %1864 = vmatprep.subr.mxu1 %v6077_v14  ;;  %v6136_v13 = vld [vmem:[#allocation7_spill] sm:$0xff] }
 0x3c5   : > { %1794 = vmatpush2.msra.mxu0 %v6078_v15  ;;  %1865 = vmatpush2.msra.mxu1 %v6079_v16 }
 0x3c6   : > { %1795 = vmatprep.subr.mxu0 %v6080_v17  ;;  %1866 = vmatprep.subr.mxu1 %v6081_v18  ;;  %v6137_v17 = vld [vmem:[#allocation8_spill] sm:$0xff] }
 0x3c7   : > { %1796 = vmatpush2.msra.mxu0 %v6082_v19  ;;  %1867 = vmatpush2.msra.mxu1 %v6083_v20 }
 0x3c8   : > { %1797 = vmatprep.subr.mxu0 %v6084_v21  ;;  %1868 = vmatprep.subr.mxu1 %v6085_v23  ;;  %v6138_v23 = vld [vmem:[#allocation9_spill] sm:$0xff] }
 0x3c9   : > { %1798 = vmatpush2.msra.mxu0 %v6086_v24  ;;  %1869 = vmatpush2.msra.mxu1 %v6087_v36 }
 0x3ca   : > { %1799 = vmatprep.subr.mxu0 %v6088_v22  ;;  %1870 = vmatprep.subr.mxu1 %v6089_v12  ;;  %v6139_v12 = vld [vmem:[#allocation10_spill] sm:$0xff] }
 0x3cb   : > { %1800 = vmatpush2.msra.mxu0 %v6090_v38  ;;  %1871 = vmatpush2.msra.mxu1 %v6091_v46 }
 0x3cc   : > { %1801 = vmatprep.subr.mxu0 %v6092_v27  ;;  %1872 = vmatprep.subr.mxu1 %v6093_v42 }
 0x3cd   : > { %1802 = vmatpush2.msra.mxu0 %v6094_v35  ;;  %1873 = vmatpush2.msra.mxu1 %v6095_v34 }
 0x3ce   : > { %1803 = vmatprep.subr.mxu0 %v6096_v33  ;;  %1874 = vmatprep.subr.mxu1 %v6097_v32 }
 0x3cf   : > { %1804 = vmatpush2.msra.mxu0 %v6098_v26  ;;  %1875 = vmatpush2.msra.mxu1 %v6099_v25 }
 0x3d0   : > { %1805 = vmatprep.subr.mxu0 %v6100_v39  ;;  %1876 = vmatprep.subr.mxu1 %v6101_v43 }
 0x3d1   : > { %1806 = vmatpush2.msra.mxu0 %v6102_v28  ;;  %1877 = vmatpush2.msra.mxu1 %v6103_v29 }
 0x3d2   : > { %1807 = vmatprep.subr.mxu0 %v6104_v1  ;;  %1878 = vmatprep.subr.mxu1 %v6105_v41 }
 0x3d3   : > { %1808 = vmatpush2.msra.mxu0 %v6106_v37  ;;  %1879 = vmatpush2.msra.mxu1 %v6107_v40 }
 0x3d4   : > { %1809 = vmatprep.subr.mxu0 %v6108_v44  ;;  %1880 = vmatprep.subr.mxu1 %v6109_v3  ;;  %v2011_v3 = vld [vmem:[%s2418_s28 + $0x18] sm:$0xff] }
 0x3d5   : > { %1810 = vmatpush2.msra.mxu0 %v6110_v45  ;;  %1881 = vmatpush2.msra.mxu1 %v6111_v47 }
 0x3d6   : > { %1811 = vmatprep.subr.mxu0 %v6112_v48  ;;  %1882 = vmatprep.subr.mxu1 %v6113_v60 }
 0x3d7   : > { %1812 = vmatpush2.msra.mxu0 %v6114_v58  ;;  %1883 = vmatpush2.msra.mxu1 %v6115_v62 }
 0x3d8   : > { %1813 = vmatprep.subr.mxu0 %v6116_v56  ;;  %1884 = vmatprep.subr.mxu1 %v6117_v55 }
 0x3d9   : > { %1814 = vmatpush2.msra.mxu0 %v6118_v54  ;;  %1885 = vmatpush2.msra.mxu1 %v6119_v61 }
 0x3da   : > { %1815 = vmatprep.subr.mxu0 %v6120_v53  ;;  %1886 = vmatprep.subr.mxu1 %v6121_v52 }
 0x3db   : > { %1816 = vmatpush2.msra.mxu0 %v6122_v63  ;;  %1887 = vmatpush2.msra.mxu1 %v6123_v0 }
 0x3dc   : > { %1817 = vmatprep.subr.mxu0 %v6124_v57  ;;  %1888 = vmatprep.subr.mxu1 %v6125_v2 }
 0x3dd   : > { %1818 = vmatpush2.msra.mxu0 %v6126_v50  ;;  %1889 = vmatpush2.msra.mxu1 %v6127_v51 }
 0x3de   : > { %1819 = vmatprep.subr.mxu0 %v6128_v49  ;;  %1890 = vmatprep.subr.mxu1 %v6129_v4 }
 0x3df   : > { %1820 = vmatpush2.msra.mxu0 %v6130_v5  ;;  %1891 = vmatpush2.msra.mxu1 %v6131_v6 }
 0x3e0   : > { %1821 = vmatprep.subr.mxu0 %v6132_v7  ;;  %1892 = vmatprep.subr.mxu1 %v6133_v8 }
 0x3e1   : > { %1822 = vmatpush2.msra.mxu0 %v6134_v9  ;;  %1893 = vmatpush2.msra.mxu1 %v6135_v10 }
 0x440   : > { %v1461_v11 = vpop.f32.mrf.mxu0  ;;  %v1532_v19 = vpop.f32.mrf.mxu1 }
 0x441   : > { %v1462_v14 = vadd.f32 %v1461_v11, %v6136_v13  ;;  %v1533_v38 = vadd.f32 %v1532_v19, %v6139_v12 }
 0x442   : > { %v1463_v15 = vpop.f32.mrf.mxu0  ;;  %v1534_v21 = vpop.f32.mrf.mxu1 }
 0x443   : > { %v2008_v16 = vmul.f32 -1.442695, %v1462_v14  ;;  %v1464_v18 = vadd.f32 %v1463_v15, %v6137_v17  ;;  %v1535_v24 = vadd.f32 %v1534_v21, %v6138_v23 }
 0x445   : > { %2115 = vpow2.f32 %v2008_v16  ;;  %v2009_v20 = vmul.f32 -1.442695, %v1464_v18  ;;  %v2010_v36 = vmul.f32 -1.442695, %v1535_v24 }
 0x447   : > { %2117 = vpow2.f32 %v2009_v20 }
 0x448   : > { %2119 = vpow2.f32 %v2010_v36 }
 0x452   : > { %v2116_v22 = vpop.eup %2115 }
 0x453   : > { %v1540_v46 = vadd.f32 1.0, %v2116_v22 }
 0x454   : > { %v2118_v27 = vpop.eup %2117 }
 0x455   : > { %2121 = vrcp.f32 %v1540_v46  ;;  %v1546_v42 = vadd.f32 1.0, %v2118_v27  ;;  %v2120_v35 = vpop.eup %2119 }
 0x456   : > { %2123 = vtanh.f32 %v1533_v38  ;;  %v1553_v28 = vadd.f32 1.0, %v2120_v35 }
 0x457   : > { %2125 = vrcp.f32 %v1546_v42 }
 0x458   : > { %2127 = vrcp.f32 %v1553_v28 }
 0x461   : > { %v1629_v34 = vpop.f32.mrf.mxu0  ;;  %v1700_v33 = vpop.f32.mrf.mxu1 }
 0x462   : > { %v2122_v32 = vpop.eup %2121 }
 0x463   : > { %v2124_v26 = vpop.eup %2123  ;;  %v1631_v25 = vpop.f32.mrf.mxu0 }
 0x464   : > { %v1702_v39 = vpop.f32.mrf.mxu1  ;;  %v2126_v43 = vpop.eup %2125  ;;  %v1709_v29 = vcombine.low %v1629_v34, %v1631_v25  ;;  %v1557_v41 = vmul.f32 %v2124_v26, %v2122_v32 }
 0x465   : > { %v1710_v1 = vcombine.low %v1700_v33, %v1702_v39  ;;  %v1556_v37 = vmul.f32 %v2126_v43, %v4985_v31  ;;  %v2128_v56 = vpop.eup %2127 }
 0x466   : > { %v1717_v40 = vrot.slane %v1709_v29, %v3580_v59 }
 0x467   : > { %v1724_v44 = vrot.slane %v1710_v1, %v3580_v59  ;;  %v5198_v45 = vadd.f32 %v1557_v41, %v1556_v37 }
 0x469   : > { %v1725_v47 = vcombine.low %v1717_v40, %v1724_v44  ;;  %2129 = vtanh.f32 %v5198_v45 }
 0x46b   : > { %v1727_v48 = vadd.f32 %v2011_v3, %v1725_v47 }
 0x46d   : > { %v2012_v60 = vmul.f32 -1.442695, %v1727_v48  ;;  %v1735_v58 = vrot.slane %v1727_v48, 2  ;;  %v1746_v55 = vrot.slane %v1727_v48, 6  ;;  %v1743_v53 = vrot.slane %v1727_v48, 4 }
 0x46f   : > { %2131 = vpow2.f32 %v2012_v60  ;;  %v2013_v62 = vmul.f32 -1.442695, %v1735_v58  ;;  %v2014_v61 = vmul.f32 -1.442695, %v1746_v55 }
 0x471   : > { %2133 = vpow2.f32 %v2013_v62 }
 0x472   : > { %2135 = vpow2.f32 %v2014_v61 }
 0x476   : > { %v2130_v31 = vpop.eup %2129 }
 0x477   : > { %v1560_v54 = vmul.f32 %v2130_v31, %v2128_v56 }
 0x479   : > { %1823 = vmatprep.mubr.f32.mxu0 %v1560_v54  ;;  %1894 = vmatprep.mubr.f32.mxu1 %v1560_v54 }
 0x47c   : > { %v2132_v59 = vpop.eup %2131 }
 0x47d   : > { %v1731_v52 = vadd.f32 1.0, %v2132_v59 }
 0x47e   : > { %v2134_v63 = vpop.eup %2133 }
 0x47f   : > { %2137 = vrcp.f32 %v1731_v52  ;;  %v1740_v0 = vadd.f32 1.0, %v2134_v63  ;;  %v2136_v57 = vpop.eup %2135 }
 0x480   : > { %2139 = vtanh.f32 %v1743_v53  ;;  %v1751_v49 = vadd.f32 1.0, %v2136_v57 }
 0x481   : > { %2141 = vrcp.f32 %v1740_v0 }
 0x482   : > { %2143 = vrcp.f32 %v1751_v49 }
 0x48c   : > { %v2138_v2 = vpop.eup %2137 }
 0x48d   : > { %v2140_v50 = vpop.eup %2139 }
 0x48e   : > { %v2142_v51 = vpop.eup %2141  ;;  %v1755_v5 = vmul.f32 %v2140_v50, %v2138_v2 }
 0x48f   : > { %v1754_v4 = vmul.f32 %v2142_v51, %v4989_v30  ;;  %v2144_v7 = vpop.eup %2143 }
 0x491   : > { %v1756_v6 = vadd.f32 %v1755_v5, %v1754_v4 }
 0x493   : > { %2145 = vtanh.f32 %v1756_v6  ;;  %1926 = vst [vmem:[#allocation3] sm:$0x3] %v1756_v6 }
 0x4a0   : > { %v2146_v8 = vpop.eup %2145 }
 0x4a1   : > { %v1758_v9 = vmul.f32 %v2146_v8, %v2144_v7 }
 0x4a3   : > { %1824 = vmatmul.mubr.f32.vlgmr.msra.gmra.mxu0 %v1758_v9  ;;  %1925 = vst [vmem:[#allocation2] sm:$0x3] %v1758_v9  ;;  %1895 = vmatmul.mubr.f32.vlgmr.msra.gmra.mxu1 %v1758_v9 }
 0x563   : > { %v1825_v10 = vpop.f32.mrf.mxu0  ;;  %v1896_v30 = vpop.f32.mrf.mxu1 }
 0x564   : > { %v1826_v11 = vadd.f32 %v1825_v10, %v6136_v13  ;;  %v1897_v36 = vadd.f32 %v1896_v30, %v6139_v12 }
 0x565   : > { %v1827_v14 = vpop.f32.mrf.mxu0  ;;  %v1898_v19 = vpop.f32.mrf.mxu1 }
 0x566   : > { %v2015_v15 = vmul.f32 -1.442695, %v1826_v11  ;;  %v1828_v16 = vadd.f32 %v1827_v14, %v6137_v17  ;;  %v1899_v20 = vadd.f32 %v1898_v19, %v6138_v23 }
 0x568   : > { %2147 = vpow2.f32 %v2015_v15  ;;  %v2016_v18 = vmul.f32 -1.442695, %v1828_v16  ;;  %v2017_v21 = vmul.f32 -1.442695, %v1899_v20 }
 0x56a   : > { %2149 = vpow2.f32 %v2016_v18 }
 0x56b   : > { %2151 = vpow2.f32 %v2017_v21 }
 0x575   : > { %v2148_v24 = vpop.eup %2147 }
 0x576   : > { %v1904_v22 = vadd.f32 1.0, %v2148_v24 }
 0x577   : > { %v2150_v38 = vpop.eup %2149 }
 0x578   : > { %2153 = vrcp.f32 %v1904_v22  ;;  %v1910_v13 = vadd.f32 1.0, %v2150_v38  ;;  %v2152_v46 = vpop.eup %2151 }
 0x579   : > { %2155 = vtanh.f32 %v1897_v36  ;;  %v1917_v35 = vadd.f32 1.0, %v2152_v46 }
 0x57a   : > { %2157 = vrcp.f32 %v1910_v13 }
 0x57b   : > { %2159 = vrcp.f32 %v1917_v35 }
 0x585   : > { %v2154_v17 = vpop.eup %2153 }
 0x586   : > { %v2156_v27 = vpop.eup %2155 }
 0x587   : > { %v2158_v42 = vpop.eup %2157  ;;  %v1921_v34 = vmul.f32 %v2156_v27, %v2154_v17 }
 0x588   : > { %v1920_v33 = vmul.f32 %v2158_v42, %v5198_v45  ;;  %v2160_v12 = vpop.eup %2159 }
 0x58a   : > { %v1922_v23 = vadd.f32 %v1921_v34, %v1920_v33 }
 0x58c   : > { %2161 = vtanh.f32 %v1922_v23  ;;  %1928 = vst [vmem:[#allocation5] sm:$0x3] %v1922_v23 }
 0x598   : > { %1932 = sbr.rel (%p2018_p5) target bundleno = 1582 (0x62e), region = 52 }
 0x599   : > { %v2162_v32 = vpop.eup %2161 }
 0x59a   : > { %v1924_v26 = vmul.f32 %v2162_v32, %v2160_v12 }
 0x59c   : > { %1927 = vst [vmem:[#allocation4] sm:$0x3] %v1924_v26 }
 0x59d   : > { %v2019_v25 = vld [vmem:[%s5221_s4] ss:$0 sm:$0xff]  ;;  %vm1941_vm0 = vcmask 1041408   ;;  %v2020_v28 = vld [vmem:[#allocation6] ss:$0 sm:$0xff]  ;;  %vm1953_vm1 = vcmask 1024  }
 0x59e   : > { %v1940_v39 = vmul.f32 %v2019_v25, %v1924_v26 }
 0x5a0   : > { %v1942_v43 = vsel %vm1941_vm0, %v1940_v39, 0.0 }
 0x5a1   : > { %1943 = vadd.xlane.f32.xlu0 %v1942_v43 }
 0x62a   : > { %v1944_v29 = vpop.xlane.xlu0 %1943 }
 0x62b   : > { %v1952_v1 = vadd.f32 %v2020_v28, %v1944_v29 }
 0x62d   : > { %1954 = vst.msk [vmem:[%s5223_s6] sm:$0x3] %vm1953_vm1, %v1952_v1 }
 0x62e PF: > { %s18_s23 = sadd.s32 1, %s2361_s23  }
 0x62f   : > { %p15_p6 = scmp.ge.s32.totalorder %s18_s23, 4  }
 0x631   :  { %17 = sbr.rel (!%p15_p6) target bundleno = 3 (0x3), region = 81 }

</bundles_post_ra>
